<compile_context>
chip_gen: v5e
topology: v5e:2x2
jax: 0.10.0
libtpu: 0.0.40
codegen_flags: <defaults>
</compile_context>

<pallas_src>
import numpy as np
import jax
import jax.numpy as jnp
from jax import lax
from jax.experimental import pallas as pl
from jax.experimental.pallas import tpu as pltpu

# --------------------------- model hyper-parameters ---------------------------
B = 2              # batch
MSG_LEN = 8        # msg_len  (H of interaction matrix)
DIFF_LEN = 16      # diff_len (W of interaction matrix)
EMB = 16           # embedding dim
KC = 16            # kernel_count (conv out channels)
MSG_VOCAB = 20
DIFF_VOCAB = 24
N_FLAT = MSG_LEN * DIFF_LEN            # flattened spatial size, k = h*DIFF_LEN + w
POOL_H = MSG_LEN // 2
POOL_W = DIFF_LEN // 2
P = POOL_H * POOL_W
DENSE_IN = KC * P                      # kernel_count * (msg_len/2) * (diff_len/2)
H1, H2 = 1024, 32
N_TAPS = 9

# The fused kernel assumes torch's .view(B, EMB, DIFF_LEN) is an identity
# reshape (true iff DIFF_LEN == EMB) and that the 2x2/stride-2 pool divides the
# spatial dims exactly (needed by the roll-based shifted-max + even selector).
assert DIFF_LEN == EMB, "fused kernel assumes the torch .view is an identity reshape"
assert MSG_LEN % 2 == 0 and DIFF_LEN % 2 == 0


# ------------------------------ fused forward kernel ---------------------------
def _fused_cnn_kernel(msg_ids_ref, diff_ids_ref, msg_voc_ref, diff_voc_ref,
                      conv_wmat_ref, conv_b_ref, mask_ref, sel_ref,
                      w1_hbm_ref, b1_ref, w2_hbm_ref, b2_ref, w3_ref, b3_ref,
                      out_ref, w1_vmem, w2_vmem, dma_sem):
    # ---- (0) kick off the dense-weight HBM->VMEM DMAs.  They run while the
    #      embedding/interaction/conv/pool front-end computes and are awaited
    #      just before dense1 / dense2. ----
    w1_cp = pltpu.make_async_copy(w1_hbm_ref, w1_vmem, dma_sem.at[0])
    w2_cp = pltpu.make_async_copy(w2_hbm_ref, w2_vmem, dma_sem.at[1])
    w1_cp.start()
    w2_cp.start()

    hi = lax.Precision.HIGHEST  # tiny f32 front-end dots: f32 accuracy for free

    # ---- (1) embedding lookups as one-hot matmuls on the MXU (no XLA gather).
    #      Out-of-range ids silently map to a zero embedding (torch would error).
    msg_oh = (msg_ids_ref[...] == lax.broadcasted_iota(
        jnp.int32, (B * MSG_LEN, MSG_VOCAB), 1)).astype(jnp.float32)
    diff_oh = (diff_ids_ref[...] == lax.broadcasted_iota(
        jnp.int32, (B * DIFF_LEN, DIFF_VOCAB), 1)).astype(jnp.float32)
    embed_msgs = jnp.dot(msg_oh, msg_voc_ref[...], precision=hi,
                         preferred_element_type=jnp.float32)        # (B*ML, EMB)
    embed_diffs = jnp.dot(diff_oh, diff_voc_ref[...], precision=hi,
                          preferred_element_type=jnp.float32)       # (B*DL, EMB)

    # ---- (2) per-batch interaction bmm, flattened lane-dense to (B, N_FLAT) ----
    mflat_rows = []
    for b in range(B):
        msg_b = embed_msgs[b * MSG_LEN:(b + 1) * MSG_LEN, :]         # (ML, EMB)
        # torch .view(B, EMB, DIFF_LEN) is an identity reshape (DIFF_LEN == EMB).
        diff_b = embed_diffs[b * DIFF_LEN:(b + 1) * DIFF_LEN, :]     # (EMB, DL)
        inter = jnp.dot(msg_b, diff_b, precision=hi,
                        preferred_element_type=jnp.float32)          # (ML, DL)
        mflat_rows.append(jnp.concatenate(
            [inter[h:h + 1, :] for h in range(MSG_LEN)], axis=1))    # (1, N_FLAT)
    mflat = jnp.concatenate(mflat_rows, axis=0)                      # (B, N_FLAT)

    # ---- (3) 3x3 conv (pad=1), both batches at once, as ONE MXU matmul:
    #      acc[c*B+b, k] = sum_t conv_w[c,t] * tap_t[b, k].
    #      Taps are XLU lane rotations of mflat; constant validity masks zero
    #      both out-of-image neighbours and any wrapped lanes. ----
    mask = mask_ref[...]                                             # (9, N_FLAT)
    taps = []
    for di in range(3):
        for dj in range(3):
            t = di * 3 + dj
            s = (di - 1) * DIFF_LEN + (dj - 1)       # flat offset of this tap
            rolled = mflat if s == 0 else pltpu.roll(
                mflat, shift=(-s) % N_FLAT, axis=1)  # out[k] = in[(k+s) % N]
            taps.append(rolled * mask[t:t + 1, :])                   # (B, N_FLAT)
    s_all = jnp.concatenate(taps, axis=0)                            # (9*B, N_FLAT)
    acc = jnp.dot(conv_wmat_ref[...], s_all, precision=hi,
                  preferred_element_type=jnp.float32) + conv_b_ref[...]
    acc = jnp.maximum(acc, 0.0)                                      # (B*KC, N_FLAT), ReLU

    # ---- (4) 2x2 stride-2 max-pool: XLU-roll shifted maxima + even-(h,w)
    #      selector matmul.  Wrapped lanes never land on a selected position. ----
    t1 = jnp.maximum(acc, pltpu.roll(acc, shift=(-1) % N_FLAT, axis=1))
    t2 = jnp.maximum(t1, pltpu.roll(t1, shift=(-DIFF_LEN) % N_FLAT, axis=1))
    pooled = jnp.dot(t2, sel_ref[...], precision=hi,
                     preferred_element_type=jnp.float32)             # (B*KC, P), row = c*B + b

    # TODO(synk): nn.Dropout(p=0.5) modeled as inference-mode identity (no mask).

    # ---- (5) flatten to (B, KC*P): channel-major rows make each per-channel
    #      (B, P) block a contiguous sublane slice -> one lane concat, columns
    #      ordered c*P + p to match the torch flatten / w1 row order. ----
    flat = jnp.concatenate(
        [pooled[c * B:(c + 1) * B, :] for c in range(KC)],
        axis=1).astype(jnp.bfloat16)                                  # (B, DENSE_IN)

    # ---- (6) dense1/dense2/dense3, batched over B; bf16 weights, f32 accum ----
    w1_cp.wait()
    h1 = jnp.dot(flat, w1_vmem[...],
                 preferred_element_type=jnp.float32) + b1_ref[...]    # (B, H1)
    a1 = jnp.maximum(h1, 0.0).astype(jnp.bfloat16)

    w2_cp.wait()
    h2 = jnp.dot(a1, w2_vmem[...],
                 preferred_element_type=jnp.float32) + b2_ref[...]    # (B, H2)
    a2 = jnp.maximum(h2, 0.0)

    out_ref[...] = jnp.dot(a2, w3_ref[...], precision=hi,
                           preferred_element_type=jnp.float32) + b3_ref[...]   # (B, 1)


# ------------------------------ host-side constants ----------------------------
def make_pool_selector():
    sel = np.zeros((N_FLAT, P), np.float32)
    for i in range(POOL_H):
        for j in range(POOL_W):
            sel[(2 * i) * DIFF_LEN + 2 * j, i * POOL_W + j] = 1.0
    return sel


def make_tap_masks():
    m = np.zeros((N_TAPS, N_FLAT), np.float32)
    for di in range(3):
        for dj in range(3):
            t = di * 3 + dj
            for k in range(N_FLAT):
                h, w = divmod(k, DIFF_LEN)
                hh, ww = h + di - 1, w + dj - 1
                if 0 <= hh < MSG_LEN and 0 <= ww < DIFF_LEN:
                    m[t, k] = 1.0
    return m


def make_conv_wmat(conv_w):
    # (B*KC, 9*B): row c*B+b, col t*B+b' holds conv_w[c, t] iff b == b'.
    w = np.asarray(conv_w).reshape(KC, N_TAPS)
    wmat = np.zeros((B * KC, N_TAPS * B), np.float32)
    for c in range(KC):
        for t in range(N_TAPS):
            for b in range(B):
                wmat[c * B + b, t * B + b] = w[c, t]
    return wmat


def prepare_kernel_params(params):
    """One-time repack of the PyTorch-layout parameters into kernel layout."""
    conv_b = np.asarray(params["conv_b"])
    return {
        "msg_vectors": params["msg_vectors"],
        "diff_vectors": params["diff_vectors"],
        "conv_wmat": jnp.asarray(make_conv_wmat(params["conv_w"])),          # (B*KC, 9*B)
        "conv_b_rep": jnp.asarray(np.repeat(conv_b, B).reshape(B * KC, 1)),  # row c*B+b
        "tap_mask": jnp.asarray(make_tap_masks()),
        "pool_sel": jnp.asarray(make_pool_selector()),
        # dense1/dense2 weights stored bf16 in HBM (halves the dominant read);
        # they are manually DMA'd and accumulated in f32 inside the kernel.
        "w1": params["w1"].astype(jnp.bfloat16),                              # (DENSE_IN, H1)
        "b1": params["b1"],
        "w2": params["w2"].astype(jnp.bfloat16),                              # (H1, H2)
        "b2": params["b2"],
        "w3": params["w3"],
        "b3": params["b3"],
    }


# --------------------------------- forward call --------------------------------
@jax.jit
def cnn_forward(kp, retrieved_msgs, used_tokens):
    msg_ids = retrieved_msgs.astype(jnp.int32).reshape(B * MSG_LEN, 1)
    diff_ids = used_tokens.astype(jnp.int32).reshape(B * DIFF_LEN, 1)

    operands = (msg_ids, diff_ids, kp["msg_vectors"], kp["diff_vectors"],
                kp["conv_wmat"], kp["conv_b_rep"], kp["tap_mask"], kp["pool_sel"],
                kp["w1"], kp["b1"], kp["w2"], kp["b2"], kp["w3"], kp["b3"])

    vmem = pl.BlockSpec(memory_space=pltpu.MemorySpace.VMEM)
    hbm = pl.BlockSpec(memory_space=pl.ANY)        # w1 / w2: manual async copy
    in_specs = [vmem, vmem, vmem, vmem, vmem, vmem, vmem, vmem,
                hbm, vmem, hbm, vmem, vmem, vmem]

    flops = 2 * (B * MSG_LEN * MSG_VOCAB * EMB + B * DIFF_LEN * DIFF_VOCAB * EMB
                 + B * MSG_LEN * EMB * DIFF_LEN
                 + (B * KC) * (N_TAPS * B) * N_FLAT
                 + (B * KC) * N_FLAT * P
                 + B * (DENSE_IN * H1 + H1 * H2 + H2))
    bytes_accessed = sum(int(np.prod(x.shape)) * np.dtype(x.dtype).itemsize
                         for x in operands) + B * 4

    return pl.pallas_call(
        _fused_cnn_kernel,
        out_shape=jax.ShapeDtypeStruct((B, 1), jnp.float32),
        in_specs=in_specs,
        out_specs=pl.BlockSpec(memory_space=pltpu.MemorySpace.VMEM),
        scratch_shapes=[
            pltpu.VMEM((DENSE_IN, H1), jnp.bfloat16),   # w1 landing buffer
            pltpu.VMEM((H1, H2), jnp.bfloat16),         # w2 landing buffer
            pltpu.SemaphoreType.DMA((2,)),
        ],
        cost_estimate=pl.CostEstimate(flops=flops, transcendentals=0,
                                      bytes_accessed=bytes_accessed),
    )(*operands)


# --------------------------- pure-JAX f32 reference ----------------------------
def reference_forward(params, retrieved_msgs, used_tokens):
    hi = lax.Precision.HIGHEST
    embed_msgs = jnp.take(params["msg_vectors"], retrieved_msgs, axis=0)
    embed_diffs = jnp.take(params["diff_vectors"], used_tokens, axis=0)
    Bv = embed_msgs.shape[0]
    diffs_viewed = embed_diffs.reshape(Bv, EMB, DIFF_LEN)     # torch .view quirk
    inter = jnp.einsum("bmd,bdn->bmn", embed_msgs, diffs_viewed, precision=hi)
    xpad = jnp.pad(inter, ((0, 0), (1, 1), (1, 1)))
    conv = jnp.zeros((Bv, KC, MSG_LEN, DIFF_LEN), jnp.float32)
    cw = params["conv_w"]          # (KC,1,3,3)
    for di in range(3):
        for dj in range(3):
            conv = conv + (cw[:, 0, di, dj][None, :, None, None]
                           * xpad[:, None, di:di + MSG_LEN, dj:dj + DIFF_LEN])
    conv = jnp.maximum(conv + params["conv_b"][None, :, None, None], 0.0)
    pooled = conv.reshape(Bv, KC, POOL_H, 2, POOL_W, 2).max(axis=(3, 5))
    flat = pooled.reshape(Bv, -1)
    h1 = jnp.maximum(jnp.dot(flat, params["w1"], precision=hi) + params["b1"], 0.0)
    h2 = jnp.maximum(jnp.dot(h1, params["w2"], precision=hi) + params["b2"], 0.0)
    return jnp.dot(h2, params["w3"], precision=hi) + params["b3"]


# ----------------------------------- main --------------------------------------
if __name__ == "__main__":
    key = jax.random.PRNGKey(0)
    ks = jax.random.split(key, 12)

    params = {
        "msg_vectors": jax.random.normal(ks[0], (MSG_VOCAB, EMB), jnp.float32) * 0.1,
        "diff_vectors": jax.random.normal(ks[1], (DIFF_VOCAB, EMB), jnp.float32) * 0.1,
        "conv_w": jax.random.normal(ks[2], (KC, 1, 3, 3), jnp.float32) * 0.1,
        "conv_b": jax.random.normal(ks[3], (KC,), jnp.float32) * 0.1,
        "w1": jax.random.normal(ks[4], (DENSE_IN, H1), jnp.float32) * 0.05,
        "b1": jax.random.normal(ks[5], (1, H1), jnp.float32) * 0.05,
        "w2": jax.random.normal(ks[6], (H1, H2), jnp.float32) * 0.05,
        "b2": jax.random.normal(ks[7], (1, H2), jnp.float32) * 0.05,
        "w3": jax.random.normal(ks[8], (H2, 1), jnp.float32) * 0.05,
        "b3": jax.random.normal(ks[9], (1, 1), jnp.float32) * 0.05,
    }

    retrieved_msgs = jax.random.randint(ks[10], (B, MSG_LEN), 0, MSG_VOCAB,
                                        dtype=jnp.int32)
    used_tokens = jax.random.randint(ks[11], (B, DIFF_LEN), 0, DIFF_VOCAB,
                                     dtype=jnp.int32)

    kparams = prepare_kernel_params(params)   # one-time weight repack (bf16 w1/w2)

    logits = jax.block_until_ready(cnn_forward(kparams, retrieved_msgs, used_tokens))
    assert logits.shape == (B, 1) and logits.dtype == jnp.float32

    ref = jax.block_until_ready(reference_forward(params, retrieved_msgs, used_tokens))
    # Tolerance covers the deliberate bf16 quantization of w1/w2 + the bf16
    # pooled/a1 activations feeding dense1/dense2 (f32 accumulation everywhere).
    np.testing.assert_allclose(np.asarray(logits), np.asarray(ref),
                               rtol=5e-2, atol=3e-3)
    print("KERNEL_OK")
</pallas_src>

<mosaic_0001>
module attributes {stable_mosaic.version = 11 : i64} {
  func.func @_fused_cnn_kernel(%arg0: memref<16x1xi32, #tpu.memory_space<vmem>>, %arg1: memref<32x1xi32, #tpu.memory_space<vmem>>, %arg2: memref<20x16xf32, #tpu.memory_space<vmem>>, %arg3: memref<24x16xf32, #tpu.memory_space<vmem>>, %arg4: memref<32x18xf32, #tpu.memory_space<vmem>>, %arg5: memref<32x1xf32, #tpu.memory_space<vmem>>, %arg6: memref<9x128xf32, #tpu.memory_space<vmem>>, %arg7: memref<128x32xf32, #tpu.memory_space<vmem>>, %arg8: memref<512x1024xbf16, #tpu.memory_space<any>>, %arg9: memref<1x1024xf32, #tpu.memory_space<vmem>>, %arg10: memref<1024x32xbf16, #tpu.memory_space<any>>, %arg11: memref<1x32xf32, #tpu.memory_space<vmem>>, %arg12: memref<32x1xf32, #tpu.memory_space<vmem>>, %arg13: memref<1x1xf32, #tpu.memory_space<vmem>>, %arg14: memref<2x1xf32, #tpu.memory_space<vmem>>, %arg15: memref<512x1024xbf16, #tpu.memory_space<vmem>>, %arg16: memref<1024x32xbf16, #tpu.memory_space<vmem>>, %arg17: memref<2x!tpu.dma_semaphore, #tpu.memory_space<semaphore_mem>>) attributes {dimension_semantics = [], scalar_prefetch = 0 : i64, scratch_operands = 3 : i64, tpu.core_type = #tpu.core_type<tc>} {
    %c0_i32 = arith.constant 0 : i32
    %0 = tpu.memref_slice %arg17[%c0_i32] : memref<2x!tpu.dma_semaphore, #tpu.memory_space<semaphore_mem>> -> memref<1x!tpu.dma_semaphore, #tpu.memory_space<semaphore_mem>>
    %1 = tpu.memref_squeeze %0 : memref<1x!tpu.dma_semaphore, #tpu.memory_space<semaphore_mem>> -> memref<!tpu.dma_semaphore, #tpu.memory_space<semaphore_mem>>
    tpu.enqueue_dma source(%arg8 : memref<512x1024xbf16, #tpu.memory_space<any>>) target(%arg15 : memref<512x1024xbf16, #tpu.memory_space<vmem>>) target_semaphore(%1 : memref<!tpu.dma_semaphore, #tpu.memory_space<semaphore_mem>>)
    %c1_i32 = arith.constant 1 : i32
    %2 = tpu.memref_slice %arg17[%c1_i32] : memref<2x!tpu.dma_semaphore, #tpu.memory_space<semaphore_mem>> -> memref<1x!tpu.dma_semaphore, #tpu.memory_space<semaphore_mem>>
    %3 = tpu.memref_squeeze %2 : memref<1x!tpu.dma_semaphore, #tpu.memory_space<semaphore_mem>> -> memref<!tpu.dma_semaphore, #tpu.memory_space<semaphore_mem>>
    tpu.enqueue_dma source(%arg10 : memref<1024x32xbf16, #tpu.memory_space<any>>) target(%arg16 : memref<1024x32xbf16, #tpu.memory_space<vmem>>) target_semaphore(%3 : memref<!tpu.dma_semaphore, #tpu.memory_space<semaphore_mem>>)
    %c0 = arith.constant 0 : index
    %c0_0 = arith.constant 0 : index
    %4 = vector.load %arg0[%c0, %c0_0] : memref<16x1xi32, #tpu.memory_space<vmem>>, vector<16x1xi32>
    %5 = tpu.iota {dimensions = array<i32: 1>} : vector<16x20xi32>
    %6 = vector.broadcast %4 : vector<16x1xi32> to vector<16x20xi32>
    %7 = arith.cmpi eq, %6, %5 : vector<16x20xi32>
    %8 = arith.extui %7 : vector<16x20xi1> to vector<16x20xi32>
    %9 = arith.sitofp %8 : vector<16x20xi32> to vector<16x20xf32>
    %c0_1 = arith.constant 0 : index
    %c0_2 = arith.constant 0 : index
    %10 = vector.load %arg1[%c0_1, %c0_2] : memref<32x1xi32, #tpu.memory_space<vmem>>, vector<32x1xi32>
    %11 = tpu.iota {dimensions = array<i32: 1>} : vector<32x24xi32>
    %12 = vector.broadcast %10 : vector<32x1xi32> to vector<32x24xi32>
    %13 = arith.cmpi eq, %12, %11 : vector<32x24xi32>
    %14 = arith.extui %13 : vector<32x24xi1> to vector<32x24xi32>
    %15 = arith.sitofp %14 : vector<32x24xi32> to vector<32x24xf32>
    %c0_3 = arith.constant 0 : index
    %c0_4 = arith.constant 0 : index
    %16 = vector.load %arg2[%c0_3, %c0_4] : memref<20x16xf32, #tpu.memory_space<vmem>>, vector<20x16xf32>
    %cst = arith.constant dense<0.000000e+00> : vector<16x16xf32>
    %17 = tpu.matmul %9, %16, %cst {dimension_numbers = #tpu.dot_dimension_numbers<[1], [0], [0], [1], [0, 0, 1, 1], [], []>, precision = #tpu.contract_precision<fp32>} : vector<16x20xf32>, vector<20x16xf32>, vector<16x16xf32> -> vector<16x16xf32>
    %c0_5 = arith.constant 0 : index
    %c0_6 = arith.constant 0 : index
    %18 = vector.load %arg3[%c0_5, %c0_6] : memref<24x16xf32, #tpu.memory_space<vmem>>, vector<24x16xf32>
    %cst_7 = arith.constant dense<0.000000e+00> : vector<32x16xf32>
    %19 = tpu.matmul %15, %18, %cst_7 {dimension_numbers = #tpu.dot_dimension_numbers<[1], [0], [0], [1], [0, 0, 1, 1], [], []>, precision = #tpu.contract_precision<fp32>} : vector<32x24xf32>, vector<24x16xf32>, vector<32x16xf32> -> vector<32x16xf32>
    %20 = vector.extract_strided_slice %17 {offsets = [0, 0], sizes = [8, 16], strides = [1, 1]} : vector<16x16xf32> to vector<8x16xf32>
    %21 = vector.extract_strided_slice %19 {offsets = [0, 0], sizes = [16, 16], strides = [1, 1]} : vector<32x16xf32> to vector<16x16xf32>
    %cst_8 = arith.constant dense<0.000000e+00> : vector<8x16xf32>
    %22 = tpu.matmul %20, %21, %cst_8 {dimension_numbers = #tpu.dot_dimension_numbers<[1], [0], [0], [1], [0, 0, 1, 1], [], []>, precision = #tpu.contract_precision<fp32>} : vector<8x16xf32>, vector<16x16xf32>, vector<8x16xf32> -> vector<8x16xf32>
    %23 = vector.extract_strided_slice %22 {offsets = [0, 0], sizes = [1, 16], strides = [1, 1]} : vector<8x16xf32> to vector<1x16xf32>
    %24 = vector.extract_strided_slice %22 {offsets = [1, 0], sizes = [1, 16], strides = [1, 1]} : vector<8x16xf32> to vector<1x16xf32>
    %25 = vector.extract_strided_slice %22 {offsets = [2, 0], sizes = [1, 16], strides = [1, 1]} : vector<8x16xf32> to vector<1x16xf32>
    %26 = vector.extract_strided_slice %22 {offsets = [3, 0], sizes = [1, 16], strides = [1, 1]} : vector<8x16xf32> to vector<1x16xf32>
    %27 = vector.extract_strided_slice %22 {offsets = [4, 0], sizes = [1, 16], strides = [1, 1]} : vector<8x16xf32> to vector<1x16xf32>
    %28 = vector.extract_strided_slice %22 {offsets = [5, 0], sizes = [1, 16], strides = [1, 1]} : vector<8x16xf32> to vector<1x16xf32>
    %29 = vector.extract_strided_slice %22 {offsets = [6, 0], sizes = [1, 16], strides = [1, 1]} : vector<8x16xf32> to vector<1x16xf32>
    %30 = vector.extract_strided_slice %22 {offsets = [7, 0], sizes = [1, 16], strides = [1, 1]} : vector<8x16xf32> to vector<1x16xf32>
    %31 = tpu.concatenate %23, %24, %25, %26, %27, %28, %29, %30 in 1 : vector<1x16xf32>, vector<1x16xf32>, vector<1x16xf32>, vector<1x16xf32>, vector<1x16xf32>, vector<1x16xf32>, vector<1x16xf32>, vector<1x16xf32> -> vector<1x128xf32>
    %32 = vector.extract_strided_slice %17 {offsets = [8, 0], sizes = [8, 16], strides = [1, 1]} : vector<16x16xf32> to vector<8x16xf32>
    %33 = vector.extract_strided_slice %19 {offsets = [16, 0], sizes = [16, 16], strides = [1, 1]} : vector<32x16xf32> to vector<16x16xf32>
    %cst_9 = arith.constant dense<0.000000e+00> : vector<8x16xf32>
    %34 = tpu.matmul %32, %33, %cst_9 {dimension_numbers = #tpu.dot_dimension_numbers<[1], [0], [0], [1], [0, 0, 1, 1], [], []>, precision = #tpu.contract_precision<fp32>} : vector<8x16xf32>, vector<16x16xf32>, vector<8x16xf32> -> vector<8x16xf32>
    %35 = vector.extract_strided_slice %34 {offsets = [0, 0], sizes = [1, 16], strides = [1, 1]} : vector<8x16xf32> to vector<1x16xf32>
    %36 = vector.extract_strided_slice %34 {offsets = [1, 0], sizes = [1, 16], strides = [1, 1]} : vector<8x16xf32> to vector<1x16xf32>
    %37 = vector.extract_strided_slice %34 {offsets = [2, 0], sizes = [1, 16], strides = [1, 1]} : vector<8x16xf32> to vector<1x16xf32>
    %38 = vector.extract_strided_slice %34 {offsets = [3, 0], sizes = [1, 16], strides = [1, 1]} : vector<8x16xf32> to vector<1x16xf32>
    %39 = vector.extract_strided_slice %34 {offsets = [4, 0], sizes = [1, 16], strides = [1, 1]} : vector<8x16xf32> to vector<1x16xf32>
    %40 = vector.extract_strided_slice %34 {offsets = [5, 0], sizes = [1, 16], strides = [1, 1]} : vector<8x16xf32> to vector<1x16xf32>
    %41 = vector.extract_strided_slice %34 {offsets = [6, 0], sizes = [1, 16], strides = [1, 1]} : vector<8x16xf32> to vector<1x16xf32>
    %42 = vector.extract_strided_slice %34 {offsets = [7, 0], sizes = [1, 16], strides = [1, 1]} : vector<8x16xf32> to vector<1x16xf32>
    %43 = tpu.concatenate %35, %36, %37, %38, %39, %40, %41, %42 in 1 : vector<1x16xf32>, vector<1x16xf32>, vector<1x16xf32>, vector<1x16xf32>, vector<1x16xf32>, vector<1x16xf32>, vector<1x16xf32>, vector<1x16xf32> -> vector<1x128xf32>
    %44 = tpu.concatenate %31, %43 in 0 : vector<1x128xf32>, vector<1x128xf32> -> vector<2x128xf32>
    %c0_10 = arith.constant 0 : index
    %c0_11 = arith.constant 0 : index
    %45 = vector.load %arg6[%c0_10, %c0_11] : memref<9x128xf32, #tpu.memory_space<vmem>>, vector<9x128xf32>
    %c17_i32 = arith.constant 17 : i32
    %46 = tpu.dynamic_rotate %44 by %c17_i32 dim 1 : vector<2x128xf32>, i32 -> vector<2x128xf32>
    %47 = vector.extract_strided_slice %45 {offsets = [0, 0], sizes = [1, 128], strides = [1, 1]} : vector<9x128xf32> to vector<1x128xf32>
    %48 = vector.broadcast %47 : vector<1x128xf32> to vector<2x128xf32>
    %49 = arith.mulf %46, %48 : vector<2x128xf32>
    %c16_i32 = arith.constant 16 : i32
    %50 = tpu.dynamic_rotate %44 by %c16_i32 dim 1 : vector<2x128xf32>, i32 -> vector<2x128xf32>
    %51 = vector.extract_strided_slice %45 {offsets = [1, 0], sizes = [1, 128], strides = [1, 1]} : vector<9x128xf32> to vector<1x128xf32>
    %52 = vector.broadcast %51 : vector<1x128xf32> to vector<2x128xf32>
    %53 = arith.mulf %50, %52 : vector<2x128xf32>
    %c15_i32 = arith.constant 15 : i32
    %54 = tpu.dynamic_rotate %44 by %c15_i32 dim 1 : vector<2x128xf32>, i32 -> vector<2x128xf32>
    %55 = vector.extract_strided_slice %45 {offsets = [2, 0], sizes = [1, 128], strides = [1, 1]} : vector<9x128xf32> to vector<1x128xf32>
    %56 = vector.broadcast %55 : vector<1x128xf32> to vector<2x128xf32>
    %57 = arith.mulf %54, %56 : vector<2x128xf32>
    %c1_i32_12 = arith.constant 1 : i32
    %58 = tpu.dynamic_rotate %44 by %c1_i32_12 dim 1 : vector<2x128xf32>, i32 -> vector<2x128xf32>
    %59 = vector.extract_strided_slice %45 {offsets = [3, 0], sizes = [1, 128], strides = [1, 1]} : vector<9x128xf32> to vector<1x128xf32>
    %60 = vector.broadcast %59 : vector<1x128xf32> to vector<2x128xf32>
    %61 = arith.mulf %58, %60 : vector<2x128xf32>
    %62 = vector.extract_strided_slice %45 {offsets = [4, 0], sizes = [1, 128], strides = [1, 1]} : vector<9x128xf32> to vector<1x128xf32>
    %63 = vector.broadcast %62 : vector<1x128xf32> to vector<2x128xf32>
    %64 = arith.mulf %44, %63 : vector<2x128xf32>
    %c127_i32 = arith.constant 127 : i32
    %65 = tpu.dynamic_rotate %44 by %c127_i32 dim 1 : vector<2x128xf32>, i32 -> vector<2x128xf32>
    %66 = vector.extract_strided_slice %45 {offsets = [5, 0], sizes = [1, 128], strides = [1, 1]} : vector<9x128xf32> to vector<1x128xf32>
    %67 = vector.broadcast %66 : vector<1x128xf32> to vector<2x128xf32>
    %68 = arith.mulf %65, %67 : vector<2x128xf32>
    %c113_i32 = arith.constant 113 : i32
    %69 = tpu.dynamic_rotate %44 by %c113_i32 dim 1 : vector<2x128xf32>, i32 -> vector<2x128xf32>
    %70 = vector.extract_strided_slice %45 {offsets = [6, 0], sizes = [1, 128], strides = [1, 1]} : vector<9x128xf32> to vector<1x128xf32>
    %71 = vector.broadcast %70 : vector<1x128xf32> to vector<2x128xf32>
    %72 = arith.mulf %69, %71 : vector<2x128xf32>
    %c112_i32 = arith.constant 112 : i32
    %73 = tpu.dynamic_rotate %44 by %c112_i32 dim 1 : vector<2x128xf32>, i32 -> vector<2x128xf32>
    %74 = vector.extract_strided_slice %45 {offsets = [7, 0], sizes = [1, 128], strides = [1, 1]} : vector<9x128xf32> to vector<1x128xf32>
    %75 = vector.broadcast %74 : vector<1x128xf32> to vector<2x128xf32>
    %76 = arith.mulf %73, %75 : vector<2x128xf32>
    %c111_i32 = arith.constant 111 : i32
    %77 = tpu.dynamic_rotate %44 by %c111_i32 dim 1 : vector<2x128xf32>, i32 -> vector<2x128xf32>
    %78 = vector.extract_strided_slice %45 {offsets = [8, 0], sizes = [1, 128], strides = [1, 1]} : vector<9x128xf32> to vector<1x128xf32>
    %79 = vector.broadcast %78 : vector<1x128xf32> to vector<2x128xf32>
    %80 = arith.mulf %77, %79 : vector<2x128xf32>
    %81 = tpu.concatenate %49, %53, %57, %61, %64, %68, %72, %76, %80 in 0 : vector<2x128xf32>, vector<2x128xf32>, vector<2x128xf32>, vector<2x128xf32>, vector<2x128xf32>, vector<2x128xf32>, vector<2x128xf32>, vector<2x128xf32>, vector<2x128xf32> -> vector<18x128xf32>
    %c0_13 = arith.constant 0 : index
    %c0_14 = arith.constant 0 : index
    %82 = vector.load %arg4[%c0_13, %c0_14] : memref<32x18xf32, #tpu.memory_space<vmem>>, vector<32x18xf32>
    %cst_15 = arith.constant dense<0.000000e+00> : vector<32x128xf32>
    %83 = tpu.matmul %82, %81, %cst_15 {dimension_numbers = #tpu.dot_dimension_numbers<[1], [0], [0], [1], [0, 0, 1, 1], [], []>, precision = #tpu.contract_precision<fp32>} : vector<32x18xf32>, vector<18x128xf32>, vector<32x128xf32> -> vector<32x128xf32>
    %c0_16 = arith.constant 0 : index
    %c0_17 = arith.constant 0 : index
    %84 = vector.load %arg5[%c0_16, %c0_17] : memref<32x1xf32, #tpu.memory_space<vmem>>, vector<32x1xf32>
    %85 = vector.broadcast %84 : vector<32x1xf32> to vector<32x128xf32>
    %86 = arith.addf %83, %85 : vector<32x128xf32>
    %cst_18 = arith.constant 0.000000e+00 : f32
    %87 = vector.broadcast %cst_18 : f32 to vector<32x128xf32>
    %88 = arith.maximumf %86, %87 : vector<32x128xf32>
    %c127_i32_19 = arith.constant 127 : i32
    %89 = tpu.dynamic_rotate %88 by %c127_i32_19 dim 1 : vector<32x128xf32>, i32 -> vector<32x128xf32>
    %90 = arith.maximumf %88, %89 : vector<32x128xf32>
    %c112_i32_20 = arith.constant 112 : i32
    %91 = tpu.dynamic_rotate %90 by %c112_i32_20 dim 1 : vector<32x128xf32>, i32 -> vector<32x128xf32>
    %92 = arith.maximumf %90, %91 : vector<32x128xf32>
    %c0_21 = arith.constant 0 : index
    %c0_22 = arith.constant 0 : index
    %93 = vector.load %arg7[%c0_21, %c0_22] : memref<128x32xf32, #tpu.memory_space<vmem>>, vector<128x32xf32>
    %cst_23 = arith.constant dense<0.000000e+00> : vector<32x32xf32>
    %94 = tpu.matmul %92, %93, %cst_23 {dimension_numbers = #tpu.dot_dimension_numbers<[1], [0], [0], [1], [0, 0, 1, 1], [], []>, precision = #tpu.contract_precision<fp32>} : vector<32x128xf32>, vector<128x32xf32>, vector<32x32xf32> -> vector<32x32xf32>
    %95 = vector.extract_strided_slice %94 {offsets = [0, 0], sizes = [2, 32], strides = [1, 1]} : vector<32x32xf32> to vector<2x32xf32>
    %96 = vector.extract_strided_slice %94 {offsets = [2, 0], sizes = [2, 32], strides = [1, 1]} : vector<32x32xf32> to vector<2x32xf32>
    %97 = vector.extract_strided_slice %94 {offsets = [4, 0], sizes = [2, 32], strides = [1, 1]} : vector<32x32xf32> to vector<2x32xf32>
    %98 = vector.extract_strided_slice %94 {offsets = [6, 0], sizes = [2, 32], strides = [1, 1]} : vector<32x32xf32> to vector<2x32xf32>
    %99 = vector.extract_strided_slice %94 {offsets = [8, 0], sizes = [2, 32], strides = [1, 1]} : vector<32x32xf32> to vector<2x32xf32>
    %100 = vector.extract_strided_slice %94 {offsets = [10, 0], sizes = [2, 32], strides = [1, 1]} : vector<32x32xf32> to vector<2x32xf32>
    %101 = vector.extract_strided_slice %94 {offsets = [12, 0], sizes = [2, 32], strides = [1, 1]} : vector<32x32xf32> to vector<2x32xf32>
    %102 = vector.extract_strided_slice %94 {offsets = [14, 0], sizes = [2, 32], strides = [1, 1]} : vector<32x32xf32> to vector<2x32xf32>
    %103 = vector.extract_strided_slice %94 {offsets = [16, 0], sizes = [2, 32], strides = [1, 1]} : vector<32x32xf32> to vector<2x32xf32>
    %104 = vector.extract_strided_slice %94 {offsets = [18, 0], sizes = [2, 32], strides = [1, 1]} : vector<32x32xf32> to vector<2x32xf32>
    %105 = vector.extract_strided_slice %94 {offsets = [20, 0], sizes = [2, 32], strides = [1, 1]} : vector<32x32xf32> to vector<2x32xf32>
    %106 = vector.extract_strided_slice %94 {offsets = [22, 0], sizes = [2, 32], strides = [1, 1]} : vector<32x32xf32> to vector<2x32xf32>
    %107 = vector.extract_strided_slice %94 {offsets = [24, 0], sizes = [2, 32], strides = [1, 1]} : vector<32x32xf32> to vector<2x32xf32>
    %108 = vector.extract_strided_slice %94 {offsets = [26, 0], sizes = [2, 32], strides = [1, 1]} : vector<32x32xf32> to vector<2x32xf32>
    %109 = vector.extract_strided_slice %94 {offsets = [28, 0], sizes = [2, 32], strides = [1, 1]} : vector<32x32xf32> to vector<2x32xf32>
    %110 = vector.extract_strided_slice %94 {offsets = [30, 0], sizes = [2, 32], strides = [1, 1]} : vector<32x32xf32> to vector<2x32xf32>
    %111 = tpu.concatenate %95, %96, %97, %98, %99, %100, %101, %102, %103, %104, %105, %106, %107, %108, %109, %110 in 1 : vector<2x32xf32>, vector<2x32xf32>, vector<2x32xf32>, vector<2x32xf32>, vector<2x32xf32>, vector<2x32xf32>, vector<2x32xf32>, vector<2x32xf32>, vector<2x32xf32>, vector<2x32xf32>, vector<2x32xf32>, vector<2x32xf32>, vector<2x32xf32>, vector<2x32xf32>, vector<2x32xf32>, vector<2x32xf32> -> vector<2x512xf32>
    %112 = arith.truncf %111 : vector<2x512xf32> to vector<2x512xbf16>
    %c0_i32_24 = arith.constant 0 : i32
    %113 = tpu.memref_slice %arg17[%c0_i32_24] : memref<2x!tpu.dma_semaphore, #tpu.memory_space<semaphore_mem>> -> memref<1x!tpu.dma_semaphore, #tpu.memory_space<semaphore_mem>>
    %114 = tpu.memref_squeeze %113 : memref<1x!tpu.dma_semaphore, #tpu.memory_space<semaphore_mem>> -> memref<!tpu.dma_semaphore, #tpu.memory_space<semaphore_mem>>
    tpu.wait_dma2 semaphore(%114 : memref<!tpu.dma_semaphore, #tpu.memory_space<semaphore_mem>>) src(%arg8 : memref<512x1024xbf16, #tpu.memory_space<any>>) dst(%arg15 : memref<512x1024xbf16, #tpu.memory_space<vmem>>)
    %c0_25 = arith.constant 0 : index
    %c0_26 = arith.constant 0 : index
    %115 = vector.load %arg15[%c0_25, %c0_26] : memref<512x1024xbf16, #tpu.memory_space<vmem>>, vector<512x1024xbf16>
    %cst_27 = arith.constant dense<0.000000e+00> : vector<2x1024xf32>
    %116 = tpu.matmul %112, %115, %cst_27 {dimension_numbers = #tpu.dot_dimension_numbers<[1], [0], [0], [1], [0, 0, 1, 1], [], []>} : vector<2x512xbf16>, vector<512x1024xbf16>, vector<2x1024xf32> -> vector<2x1024xf32>
    %c0_28 = arith.constant 0 : index
    %c0_29 = arith.constant 0 : index
    %117 = vector.load %arg9[%c0_28, %c0_29] : memref<1x1024xf32, #tpu.memory_space<vmem>>, vector<1x1024xf32>
    %118 = vector.broadcast %117 : vector<1x1024xf32> to vector<2x1024xf32>
    %119 = arith.addf %116, %118 : vector<2x1024xf32>
    %cst_30 = arith.constant 0.000000e+00 : f32
    %120 = vector.broadcast %cst_30 : f32 to vector<2x1024xf32>
    %121 = arith.maximumf %119, %120 : vector<2x1024xf32>
    %122 = arith.truncf %121 : vector<2x1024xf32> to vector<2x1024xbf16>
    %c1_i32_31 = arith.constant 1 : i32
    %123 = tpu.memref_slice %arg17[%c1_i32_31] : memref<2x!tpu.dma_semaphore, #tpu.memory_space<semaphore_mem>> -> memref<1x!tpu.dma_semaphore, #tpu.memory_space<semaphore_mem>>
    %124 = tpu.memref_squeeze %123 : memref<1x!tpu.dma_semaphore, #tpu.memory_space<semaphore_mem>> -> memref<!tpu.dma_semaphore, #tpu.memory_space<semaphore_mem>>
    tpu.wait_dma2 semaphore(%124 : memref<!tpu.dma_semaphore, #tpu.memory_space<semaphore_mem>>) src(%arg10 : memref<1024x32xbf16, #tpu.memory_space<any>>) dst(%arg16 : memref<1024x32xbf16, #tpu.memory_space<vmem>>)
    %c0_32 = arith.constant 0 : index
    %c0_33 = arith.constant 0 : index
    %125 = vector.load %arg16[%c0_32, %c0_33] : memref<1024x32xbf16, #tpu.memory_space<vmem>>, vector<1024x32xbf16>
    %cst_34 = arith.constant dense<0.000000e+00> : vector<2x32xf32>
    %126 = tpu.matmul %122, %125, %cst_34 {dimension_numbers = #tpu.dot_dimension_numbers<[1], [0], [0], [1], [0, 0, 1, 1], [], []>} : vector<2x1024xbf16>, vector<1024x32xbf16>, vector<2x32xf32> -> vector<2x32xf32>
    %c0_35 = arith.constant 0 : index
    %c0_36 = arith.constant 0 : index
    %127 = vector.load %arg11[%c0_35, %c0_36] : memref<1x32xf32, #tpu.memory_space<vmem>>, vector<1x32xf32>
    %128 = vector.broadcast %127 : vector<1x32xf32> to vector<2x32xf32>
    %129 = arith.addf %126, %128 : vector<2x32xf32>
    %cst_37 = arith.constant 0.000000e+00 : f32
    %130 = vector.broadcast %cst_37 : f32 to vector<2x32xf32>
    %131 = arith.maximumf %129, %130 : vector<2x32xf32>
    %c0_38 = arith.constant 0 : index
    %c0_39 = arith.constant 0 : index
    %132 = vector.load %arg12[%c0_38, %c0_39] : memref<32x1xf32, #tpu.memory_space<vmem>>, vector<32x1xf32>
    %cst_40 = arith.constant dense<0.000000e+00> : vector<2x1xf32>
    %133 = tpu.matmul %131, %132, %cst_40 {dimension_numbers = #tpu.dot_dimension_numbers<[1], [0], [0], [1], [0, 0, 1, 1], [], []>, precision = #tpu.contract_precision<fp32>} : vector<2x32xf32>, vector<32x1xf32>, vector<2x1xf32> -> vector<2x1xf32>
    %c0_41 = arith.constant 0 : index
    %c0_42 = arith.constant 0 : index
    %134 = vector.load %arg13[%c0_41, %c0_42] : memref<1x1xf32, #tpu.memory_space<vmem>>, vector<1x1xf32>
    %135 = vector.broadcast %134 : vector<1x1xf32> to vector<2x1xf32>
    %136 = arith.addf %133, %135 : vector<2x1xf32>
    %c0_43 = arith.constant 0 : index
    %c0_44 = arith.constant 0 : index
    %137 = vector.load %arg14[%c0_43, %c0_44] : memref<2x1xf32, #tpu.memory_space<vmem>>, vector<2x1xf32>
    tpu.vector_store %arg14[%c0_43, %c0_44], %136 {strides = array<i32>} : memref<2x1xf32, #tpu.memory_space<vmem>>, vector<2x1xf32>,
    return
  }
}

</mosaic_0001>

<bundles_post_ra>
// kernel: cnn_forward.1
= control target key start
LH: loop header
LB: loop body
LE: loop exit
PB: predicated region body
PF: predicated region fallthrough
CT: control target
= control target key end

     0   :  { %s6610_s18 = smov [#allocation2]   ;;  %vm257_vm0 = vcmask 1043456   ;;  %s7517_s0 = inlined_call_operand.vmem [shape: s32[16,1], index: 0, kind: input, shape index: {}]   ;;  %s7518_s1 = inlined_call_operand.vmem [shape: s32[32,1], index: 1, kind: input, shape index: {}]   ;;  %s7519_s2 = inlined_call_operand.vmem [shape: f32[20,16], index: 2, kind: input, shape index: {}]   ;;  %s7520_s3 = inlined_call_operand.vmem [shape: f32[24,16], index: 3, kind: input, shape index: {}]   ;;  %s7521_s4 = inlined_call_operand.vmem [shape: f32[32,18], index: 4, kind: input, shape index: {}]   ;;  %s7522_s5 = inlined_call_operand.vmem [shape: f32[32,1], index: 5, kind: input, shape index: {}]   ;;  %s7523_s6 = inlined_call_operand.vmem [shape: f32[9,128], index: 6, kind: input, shape index: {}]   ;;  %s7524_s7 = inlined_call_operand.vmem [shape: f32[128,32], index: 7, kind: input, shape index: {}]   ;;  %s7525_s9 = inlined_call_operand.vmem [shape: f32[1,1024], index: 9, kind: input, shape index: {}]   ;;  %s7526_s11 = inlined_call_operand.vmem [shape: f32[1,32], index: 11, kind: input, shape index: {}]   ;;  %s7527_s12 = inlined_call_operand.vmem [shape: f32[32,1], index: 12, kind: input, shape index: {}]   ;;  %s7528_s13 = inlined_call_operand.<no memory space> [shape: f32[1,1], index: 13, kind: input, shape index: {}]   ;;  %s7529_s14 = inlined_call_operand.vmem [shape: f32[2,1], index: 14, kind: output, shape index: {}]   ;;  %s7530_s8 = inlined_call_operand.hbm [shape: bf16[512,1024], index: 8, kind: input, shape index: {}]   ;;  %s7531_s10 = inlined_call_operand.vmem [shape: bf16[1024,32], index: 10, kind: input, shape index: {}]  }
   0x1   :  { %v19_v0 = vstv %s7528_s13  ;;  %s52_s17 = sshll.u32 %s7530_s8, 4  ;;  %s54_s19 = sshll.u32 %s6610_s18, 4  ;;  %v69_v1 = vld [vmem:[%s7531_s10] sm:$0xff]  ;;  %v71_v2 = vld [vmem:[%s7531_s10 + $0x8] sm:$0xff]  ;;  %v73_v3 = vld [vmem:[%s7531_s10 + $0x10] sm:$0xff]  ;;  %s53_s17 = int_to_ptr.hbm [resolvable:$true] %s52_s17  ;;  %s55_s19 = int_to_ptr.vmem [resolvable:$true] %s54_s19 }
   0x2   :  { %20 = vst [vmem:[#allocation5] sm:$0x1] %v19_v0  ;;  %57 = dma.hbm_to_vmem [thread:$0]  %s53_s17, 32768, %s55_s19, [#allocation4]  ;;  %v75_v4 = vld [vmem:[%s7531_s10 + $0x18] sm:$0xff]  ;;  %v77_v5 = vld [vmem:[%s7531_s10 + $0x20] sm:$0xff] }
   0x3   :  { %70 = vst [vmem:[#allocation3 + $0xb0] sm:$0xff] %v69_v1  ;;  %v79_v6 = vld [vmem:[%s7531_s10 + $0x28] sm:$0xff]  ;;  %v81_v7 = vld [vmem:[%s7531_s10 + $0x30] sm:$0xff]  ;;  %v83_v8 = vld [vmem:[%s7531_s10 + $0x38] sm:$0xff] }
   0x4   :  { %72 = vst [vmem:[#allocation3 + $0x1b0] sm:$0xff] %v71_v2  ;;  %v85_v9 = vld [vmem:[%s7531_s10 + $0x40] sm:$0xff]  ;;  %v87_v10 = vld [vmem:[%s7531_s10 + $0x48] sm:$0xff]  ;;  %v89_v11 = vld [vmem:[%s7531_s10 + $0x50] sm:$0xff] }
   0x5   :  { %74 = vst [vmem:[#allocation3 + $0xd8] sm:$0xff] %v73_v3  ;;  %v91_v12 = vld [vmem:[%s7531_s10 + $0x58] sm:$0xff]  ;;  %v93_v13 = vld [vmem:[%s7531_s10 + $0x60] sm:$0xff]  ;;  %v95_v14 = vld [vmem:[%s7531_s10 + $0x68] sm:$0xff]  ;;  %v6611_v3 = vmov 0  }
   0x6   :  { %76 = vst [vmem:[#allocation3 + $0x18] sm:$0xff] %v75_v4  ;;  %v97_v15 = vld [vmem:[%s7531_s10 + $0x70] sm:$0xff]  ;;  %v99_v16 = vld [vmem:[%s7531_s10 + $0x78] sm:$0xff]  ;;  %v101_v17 = vld [vmem:[%s7531_s10 + $0x80] sm:$0xff]  ;;  %6547 = vset.pattern.permute.xlu1 %v6611_v3  ;;  %6546 = vset.pattern.permute.xlu0 %v6611_v3 }
   0x7   :  { %78 = vst [vmem:[#allocation3 + $0x50] sm:$0xff] %v77_v5  ;;  %v103_v18 = vld [vmem:[%s7531_s10 + $0x88] sm:$0xff]  ;;  %v105_v19 = vld [vmem:[%s7531_s10 + $0x90] sm:$0xff]  ;;  %v107_v20 = vld [vmem:[%s7531_s10 + $0x98] sm:$0xff] }
   0x8   :  { %80 = vst [vmem:[#allocation3 + $0x168] sm:$0xff] %v79_v6  ;;  %v109_v21 = vld [vmem:[%s7531_s10 + $0xa0] sm:$0xff]  ;;  %v111_v22 = vld [vmem:[%s7531_s10 + $0xa8] sm:$0xff]  ;;  %v113_v23 = vld [vmem:[%s7531_s10 + $0xb0] sm:$0xff] }
   0x9   :  { %82 = vst [vmem:[#allocation3 + $0x130] sm:$0xff] %v81_v7  ;;  %v115_v24 = vld [vmem:[%s7531_s10 + $0xb8] sm:$0xff]  ;;  %v117_v25 = vld [vmem:[%s7531_s10 + $0xc0] sm:$0xff]  ;;  %v119_v26 = vld [vmem:[%s7531_s10 + $0xc8] sm:$0xff] }
   0xa   :  { %84 = vst [vmem:[#allocation3 + $0x48] sm:$0xff] %v83_v8  ;;  %v121_v27 = vld [vmem:[%s7531_s10 + $0xd0] sm:$0xff]  ;;  %v123_v28 = vld [vmem:[%s7531_s10 + $0xd8] sm:$0xff]  ;;  %v125_v29 = vld [vmem:[%s7531_s10 + $0xe0] sm:$0xff] }
   0xb   :  { %86 = vst [vmem:[#allocation3 + $0x180] sm:$0xff] %v85_v9  ;;  %v127_v30 = vld [vmem:[%s7531_s10 + $0xe8] sm:$0xff]  ;;  %v129_v31 = vld [vmem:[%s7531_s10 + $0xf0] sm:$0xff]  ;;  %v131_v32 = vld [vmem:[%s7531_s10 + $0xf8] sm:$0xff] }
   0xc   :  { %88 = vst [vmem:[#allocation3 + $0x110] sm:$0xff] %v87_v10  ;;  %v133_v33 = vld [vmem:[%s7531_s10 + $0x100] sm:$0xff]  ;;  %v135_v34 = vld [vmem:[%s7531_s10 + $0x108] sm:$0xff]  ;;  %v137_v35 = vld [vmem:[%s7531_s10 + $0x110] sm:$0xff] }
   0xd   :  { %90 = vst [vmem:[#allocation3 + $0x118] sm:$0xff] %v89_v11  ;;  %v139_v36 = vld [vmem:[%s7531_s10 + $0x118] sm:$0xff]  ;;  %v141_v37 = vld [vmem:[%s7531_s10 + $0x120] sm:$0xff]  ;;  %v143_v38 = vld [vmem:[%s7531_s10 + $0x128] sm:$0xff] }
   0xe   :  { %92 = vst [vmem:[#allocation3 + $0x98] sm:$0xff] %v91_v12  ;;  %v145_v39 = vld [vmem:[%s7531_s10 + $0x130] sm:$0xff]  ;;  %v147_v40 = vld [vmem:[%s7531_s10 + $0x138] sm:$0xff]  ;;  %v149_v41 = vld [vmem:[%s7531_s10 + $0x140] sm:$0xff] }
   0xf   :  { %94 = vst [vmem:[#allocation3 + $0x120] sm:$0xff] %v93_v13  ;;  %v151_v42 = vld [vmem:[%s7531_s10 + $0x148] sm:$0xff]  ;;  %v153_v43 = vld [vmem:[%s7531_s10 + $0x150] sm:$0xff]  ;;  %v155_v44 = vld [vmem:[%s7531_s10 + $0x158] sm:$0xff] }
  0x10   :  { %96 = vst [vmem:[#allocation3 + $0x150] sm:$0xff] %v95_v14  ;;  %v157_v45 = vld [vmem:[%s7531_s10 + $0x160] sm:$0xff]  ;;  %v159_v46 = vld [vmem:[%s7531_s10 + $0x168] sm:$0xff]  ;;  %v161_v47 = vld [vmem:[%s7531_s10 + $0x170] sm:$0xff] }
  0x11   :  { %98 = vst [vmem:[#allocation3 + $0x108] sm:$0xff] %v97_v15  ;;  %v163_v48 = vld [vmem:[%s7531_s10 + $0x178] sm:$0xff]  ;;  %v165_v49 = vld [vmem:[%s7531_s10 + $0x180] sm:$0xff]  ;;  %v167_v50 = vld [vmem:[%s7531_s10 + $0x188] sm:$0xff] }
  0x12   :  { %100 = vst [vmem:[#allocation3 + $0x60] sm:$0xff] %v99_v16  ;;  %v169_v51 = vld [vmem:[%s7531_s10 + $0x190] sm:$0xff]  ;;  %v171_v52 = vld [vmem:[%s7531_s10 + $0x198] sm:$0xff]  ;;  %v173_v53 = vld [vmem:[%s7531_s10 + $0x1a0] sm:$0xff] }
  0x13   :  { %102 = vst [vmem:[#allocation3 + $0xe0] sm:$0xff] %v101_v17  ;;  %v175_v54 = vld [vmem:[%s7531_s10 + $0x1a8] sm:$0xff]  ;;  %v177_v55 = vld [vmem:[%s7531_s10 + $0x1b0] sm:$0xff]  ;;  %v179_v56 = vld [vmem:[%s7531_s10 + $0x1b8] sm:$0xff] }
  0x14   :  { %104 = vst [vmem:[#allocation3 + $0x188] sm:$0xff] %v103_v18  ;;  %v181_v57 = vld [vmem:[%s7531_s10 + $0x1c0] sm:$0xff]  ;;  %v183_v58 = vld [vmem:[%s7531_s10 + $0x1c8] sm:$0xff]  ;;  %v185_v59 = vld [vmem:[%s7531_s10 + $0x1d0] sm:$0xff] }
  0x15   :  { %106 = vst [vmem:[#allocation3 + $0x138] sm:$0xff] %v105_v19  ;;  %v187_v60 = vld [vmem:[%s7531_s10 + $0x1d8] sm:$0xff]  ;;  %v189_v61 = vld [vmem:[%s7531_s10 + $0x1e0] sm:$0xff]  ;;  %v191_v62 = vld [vmem:[%s7531_s10 + $0x1e8] sm:$0xff] }
  0x16   :  { %108 = vst [vmem:[#allocation3 + $0x140] sm:$0xff] %v107_v20  ;;  %v193_v63 = vld [vmem:[%s7531_s10 + $0x1f0] sm:$0xff]  ;;  %v195_v0 = vld [vmem:[%s7531_s10 + $0x1f8] sm:$0xff]  ;;  %v219_v1 = vld [vmem:[%s7518_s1] sm:$0xff] }
  0x17   :  { %110 = vst [vmem:[#allocation3 + $0x80] sm:$0xff] %v109_v21  ;;  %v203_v2 = vld [vmem:[%s7517_s0] sm:$0xff]  ;;  %v221_v4 = vld [vmem:[%s7518_s1 + $0x10] sm:$0xff]  ;;  %224 = vperm.xlu1 %6547, %v219_v1   ;;  %v248_v6 = vld [vmem:[%s7519_s2 + $0x8] sm:$0xff] }
  0x18   :  { %112 = vst [vmem:[#allocation3 + $0x1a8] sm:$0xff] %v111_v22  ;;  %208 = vperm.xlu0 %6546, %v203_v2   ;;  %v249_v5 = vld [vmem:[%s7519_s2 + $0x10] sm:$0xf] }
  0x19   :  { %114 = vst [vmem:[#allocation3 + $0x1b8] sm:$0xff] %v113_v23 }
  0x1a   :  { %116 = vst [vmem:[#allocation3 + $0x28] sm:$0xff] %v115_v24 }
  0x1b   :  { %118 = vst [vmem:[#allocation3 + $0x1e8] sm:$0xff] %v117_v25 }
  0x1c   :  { %120 = vst [vmem:[#allocation3 + $0xf8] sm:$0xff] %v119_v26 }
  0x1d   :  { %122 = vst [vmem:[#allocation3 + $0x160] sm:$0xff] %v121_v27 }
  0x1e   :  { %124 = vst [vmem:[#allocation3 + $0x30] sm:$0xff] %v123_v28 }
  0x1f   :  { %126 = vst [vmem:[#allocation3 + $0x1e0] sm:$0xff] %v125_v29 }
  0x20   :  { %128 = vst [vmem:[#allocation3] sm:$0xff] %v127_v30 }
  0x21   :  { %130 = vst [vmem:[#allocation3 + $0xf0] sm:$0xff] %v129_v31 }
  0x22   :  { %132 = vst [vmem:[#allocation3 + $0x8] sm:$0xff] %v131_v32 }
  0x23   :  { %134 = vst [vmem:[#allocation3 + $0x148] sm:$0xff] %v133_v33 }
  0x24   :  { %136 = vst [vmem:[#allocation3 + $0x1d0] sm:$0xff] %v135_v34 }
  0x25   :  { %138 = vst [vmem:[#allocation3 + $0x100] sm:$0xff] %v137_v35 }
  0x26   :  { %140 = vst [vmem:[#allocation3 + $0xc8] sm:$0xff] %v139_v36 }
  0x27   :  { %142 = vst [vmem:[#allocation3 + $0x40] sm:$0xff] %v141_v37 }
  0x28   :  { %144 = vst [vmem:[#allocation3 + $0x1f8] sm:$0xff] %v143_v38 }
  0x29   :  { %146 = vst [vmem:[#allocation3 + $0x20] sm:$0xff] %v145_v39 }
  0x2a   :  { %148 = vst [vmem:[#allocation3 + $0x128] sm:$0xff] %v147_v40 }
  0x2b   :  { %150 = vst [vmem:[#allocation3 + $0x1a0] sm:$0xff] %v149_v41 }
  0x2c   :  { %152 = vst [vmem:[#allocation3 + $0x1f0] sm:$0xff] %v151_v42 }
  0x2d   :  { %154 = vst [vmem:[#allocation3 + $0xe8] sm:$0xff] %v153_v43 }
  0x2e   :  { %156 = vst [vmem:[#allocation3 + $0x78] sm:$0xff] %v155_v44 }
  0x2f   :  { %158 = vst [vmem:[#allocation3 + $0x70] sm:$0xff] %v157_v45 }
  0x30   :  { %160 = vst [vmem:[#allocation3 + $0x90] sm:$0xff] %v159_v46 }
  0x31   :  { %162 = vst [vmem:[#allocation3 + $0x1d8] sm:$0xff] %v161_v47 }
  0x32   :  { %164 = vst [vmem:[#allocation3 + $0xd0] sm:$0xff] %v163_v48 }
  0x33   :  { %166 = vst [vmem:[#allocation3 + $0xb8] sm:$0xff] %v165_v49 }
  0x34   :  { %168 = vst [vmem:[#allocation3 + $0x88] sm:$0xff] %v167_v50 }
  0x35   :  { %170 = vst [vmem:[#allocation3 + $0xa8] sm:$0xff] %v169_v51 }
  0x36   :  { %172 = vst [vmem:[#allocation3 + $0x1c8] sm:$0xff] %v171_v52 }
  0x37   :  { %174 = vst [vmem:[#allocation3 + $0x170] sm:$0xff] %v173_v53 }
  0x38   :  { %176 = vst [vmem:[#allocation3 + $0x178] sm:$0xff] %v175_v54 }
  0x39   :  { %178 = vst [vmem:[#allocation3 + $0x68] sm:$0xff] %v177_v55 }
  0x3a   :  { %180 = vst [vmem:[#allocation3 + $0x190] sm:$0xff] %v179_v56 }
  0x3b   :  { %182 = vst [vmem:[#allocation3 + $0x198] sm:$0xff] %v181_v57 }
  0x3c   :  { %184 = vst [vmem:[#allocation3 + $0x38] sm:$0xff] %v183_v58 }
  0x3d   :  { %186 = vst [vmem:[#allocation3 + $0xc0] sm:$0xff] %v185_v59 }
  0x3e   :  { %188 = vst [vmem:[#allocation3 + $0x1c0] sm:$0xff] %v187_v60 }
  0x3f   :  { %190 = vst [vmem:[#allocation3 + $0x158] sm:$0xff] %v189_v61 }
  0x40   :  { %192 = vst [vmem:[#allocation3 + $0x10] sm:$0xff] %v191_v62 }
  0x41   :  { %194 = vst [vmem:[#allocation3 + $0x58] sm:$0xff] %v193_v63 }
  0x42   :  { %196 = vst [vmem:[#allocation3 + $0xa0] sm:$0xff] %v195_v0 }
  0x43   :  { %202 = vsyncadd [#allocation4 + $0x1], 8192  ;;  %6548 = vset.pattern.permute.xlu2 %v6611_v3  ;;  %v259_v7 = vsel %vm257_vm0, %v249_v5, 0  ;;  %v276_v8 = vand.u32 4294901760, %v248_v6  ;;  %v220_v12 = vld [vmem:[%s7518_s1 + $0x8] sm:$0xff]  ;;  %v222_v16 = vld [vmem:[%s7518_s1 + $0x18] sm:$0xff]  ;;  %v205_v45 = vlaneseq }
  0x44   :  { %230 = vperm.xlu2 %6548, %v221_v4   ;;  %v274_v9 = vand.u32 4294901760, %v259_v7  ;;  %v204_v13 = vld [vmem:[%s7517_s0 + $0x8] sm:$0xff]  ;;  %227 = vperm.xlu1 %6547, %v220_v12   ;;  %v247_v21 = vld [vmem:[%s7519_s2] sm:$0xff]  ;;  %v466_v27 = vld [vmem:[%s7520_s3 + $0x10] sm:$0xff]  ;;  %vm250_vm1 = vcmask 162816   ;;  %vm467_vm4 = vcmask 195584  }
  0x45   :  { %v317_v10 = vsub.f32 %v248_v6, %v276_v8  ;;  %211 = vperm.xlu0 %6546, %v204_v13   ;;  %v278_v22 = vand.u32 4294901760, %v247_v21  ;;  %v493_v28 = vand.u32 4294901760, %v466_v27  ;;  %v465_v29 = vld [vmem:[%s7520_s3 + $0x8] sm:$0xff]  ;;  %v464_v32 = vld [vmem:[%s7520_s3] sm:$0xff]  ;;  %v6936_v46 = vand.u32 127, %v205_v45  ;;  %s6613_s3 = smov 48  }
  0x46   :  { %v311_v11 = vsub.f32 %v259_v7, %v274_v9  ;;  %384 = vmatpush.msra.mxu3 %v274_v9  ;;  %275 = vmatpush.msra.mxu0 %v274_v9  ;;  %v495_v30 = vand.u32 4294901760, %v465_v29  ;;  %v497_v34 = vand.u32 4294901760, %v464_v32  ;;  %v6612_v49 = vmov 0.0   ;;  %s6614_s24 = smov 32   ;;  %s6615_s25 = smov 16  }
  0x47   :  { %v318_v14 = vand.u32 4294901760, %v317_v10  ;;  %v323_v23 = vsub.f32 %v247_v21, %v278_v22  ;;  %v546_v31 = vsub.f32 %v466_v27, %v493_v28  ;;  %vm745_vm9 = vcmask 130048   ;;  %s6616_s8 = smov 80   ;;  %s6617_s13 = smov 64  }
  0x48   :  { %v312_v15 = vand.u32 4294901760, %v311_v11  ;;  %352 = vmatpush.msra.mxu2 %v311_v11  ;;  %386 = vmatpush.msra.mxu3 %v276_v8  ;;  %v552_v35 = vsub.f32 %v465_v29, %v495_v30  ;;  %v558_v38 = vsub.f32 %v464_v32, %v497_v34  ;;  %s6618_s10 = smov 112   ;;  %s6619_s26 = smov 96   ;;  %vm938_vm10 = vcmask 261120  }
  0x49   :  { %v319_v17 = vsub.f32 %v317_v10, %v318_v14  ;;  %277 = vmatpush.msra.mxu0 %v276_v8  ;;  %v324_v24 = vand.u32 4294901760, %v323_v23  ;;  %v547_v33 = vand.u32 4294901760, %v546_v31  ;;  %vm940_vm11 = vcmask 392192   ;;  %s6620_s27 = smov 113   ;;  %s6621_s28 = smov 127  }
  0x4a   :  { %v313_v18 = vsub.f32 %v311_v11, %v312_v15  ;;  %355 = vmatpush.msra.mxu2 %v317_v10  ;;  %388 = vmatpush.msra.mxu3 %v278_v22  ;;  %v553_v37 = vand.u32 4294901760, %v552_v35  ;;  %v559_v41 = vand.u32 4294901760, %v558_v38  ;;  %vm942_vm12 = vcmask 523264   ;;  %s6622_s29 = smov 15   ;;  %s6623_s30 = smov 111  }
  0x4b   :  { %v320_v20 = vand.u32 4294901760, %v319_v17  ;;  %279 = vmatpush.msra.mxu0 %v278_v22  ;;  %v325_v25 = vsub.f32 %v323_v23, %v324_v24  ;;  %v548_v36 = vsub.f32 %v546_v31, %v547_v33  ;;  %vm946_vm13 = vcmask 785408   ;;  %s6624_s17 = smov 1   ;;  %s6625_s18 = smov 17  }
  0x4c   :  { %233 = vperm.xlu2 %6548, %v222_v16   ;;  %v314_v19 = vand.u32 4294901760, %v313_v18  ;;  %358 = vmatpush.msra.mxu2 %v323_v23  ;;  %v554_v40 = vsub.f32 %v552_v35, %v553_v37  ;;  %v560_v43 = vsub.f32 %v558_v38, %v559_v41  ;;  %vm944_vm14 = vcmask 654336  }
  0x4d   :  { %418 = vmatpush.msrb.mxu0 %v312_v15  ;;  %v326_v26 = vand.u32 4294901760, %v325_v25  ;;  %v549_v39 = vand.u32 4294901760, %v548_v36  ;;  %vm948_vm15 = vcmask 916480  }
  0x4e   :  { %315 = vmatpush.msra.mxu1 %v314_v19  ;;  %494 = vmatpush.msrb.mxu2 %v493_v28  ;;  %v555_v42 = vand.u32 4294901760, %v554_v40  ;;  %v561_v44 = vand.u32 4294901760, %v560_v43 }
  0x4f   :  { %422 = vmatpush.msrb.mxu0 %v318_v14  ;;  %550 = vmatpush.msrb.mxu3 %v549_v39 }
  0x50   :  { %321 = vmatpush.msra.mxu1 %v320_v20  ;;  %496 = vmatpush.msrb.mxu2 %v495_v30 }
  0x51   :  { %426 = vmatpush.msrb.mxu0 %v324_v24  ;;  %556 = vmatpush.msrb.mxu3 %v555_v42 }
  0x52   :  { %327 = vmatpush.msra.mxu1 %v326_v26  ;;  %498 = vmatpush.msrb.mxu2 %v497_v34 }
  0x53   :  { %562 = vmatpush.msrb.mxu3 %v561_v44 }
  0x54   :  { %450 = vmatpush.msrb.mxu1 %v274_v9 }
  0x56   :  { %452 = vmatpush.msrb.mxu1 %v276_v8 }
  0x58   :  { %454 = vmatpush.msrb.mxu1 %v278_v22 }
  0x89   :  { %v225_v47 = vpop.permute.xlu1 %224 }
  0x8a   :  { %v209_v48 = vpop.permute.xlu0 %208  ;;  %vm235_vm2 = vcmp.eq.s32.totalorder %v225_v47, %v6936_v46 }
  0x8b   :  { %vm213_vm3 = vcmp.eq.s32.totalorder %v209_v48, %v6936_v46  ;;  %v6940_v50 = vsel %vm235_vm2, 1.0, %v6612_v49  ;;  %vm1243_vm2 = vcmask 146432  }
  0x8c   :  { %v4904_v51 = vsel %vm213_vm3, 1.0, %v6612_v49  ;;  %v469_v54 = vsel %vm467_vm4, %v6940_v50, 0  ;;  %vm1207_vm3 = vcmask 1041408  }
  0x8d   :  { %4910 = vmatmul.msk.f32.vlgmr.msra.gmra.mxu1 %vm250_vm1, %v4904_v51  ;;  %v252_v52 = vsel %vm250_vm1, %v4904_v51, 0  ;;  %v6946_v56 = vsub.f32 %v469_v54, %v469_v54 }
  0x8e   :  { %v281_v53 = vsub.f32 %v252_v52, %v252_v52  ;;  %637 = vmatpush.msra.mxu1 %v493_v28 }
  0x8f   :  { %v501_v2 = vand.u32 4294901760, %v6946_v56 }
  0x90   :  { %361 = vmatmul.f32.vlgmr.msra.gmra.mxu2 %v281_v53  ;;  %v282_v55 = vand.u32 4294901760, %v281_v53  ;;  %639 = vmatpush.msra.mxu1 %v495_v30 }
  0x91   :  { %683 = vmatpush.msra.mxu2 %v547_v33  ;;  %v502_v7 = vsub.f32 %v6946_v56, %v501_v2 }
  0x92   :  { %392 = vmatmul.f32.vlgmr.msra.gmra.mxu3 %v282_v55  ;;  %v283_v59 = vsub.f32 %v281_v53, %v282_v55  ;;  %641 = vmatpush.msra.mxu1 %v497_v34 }
  0x93   :  { %687 = vmatpush.msra.mxu2 %v553_v37  ;;  %723 = vmatpush.msra.mxu3 %v493_v28  ;;  %v503_v10 = vand.u32 4294901760, %v502_v7 }
  0x94   :  { %v284_v62 = vand.u32 4294901760, %v283_v59 }
  0x95   :  { %691 = vmatpush.msra.mxu2 %v559_v41  ;;  %725 = vmatpush.msra.mxu3 %v495_v30 }
  0x96   :  { %285 = vmatmul.f32.vlgmr.msra.gmra.mxu0 %v284_v62 }
  0x97   :  { %595 = vmatpush.msra.mxu0 %v546_v31  ;;  %727 = vmatpush.msra.mxu3 %v497_v34 }
  0x99   :  { %598 = vmatpush.msra.mxu0 %v552_v35 }
  0x9b   :  { %601 = vmatpush.msra.mxu0 %v558_v38 }
  0x9e   :  { %v231_v63 = vpop.permute.xlu2 %230 }
  0x9f   :  { %vm237_vm7 = vcmp.eq.s32.totalorder %v231_v63, %v6936_v46 }
  0xa0   :  { %v4908_v8 = vsel %vm237_vm7, 1.0, %v6612_v49 }
  0xa1   :  { %v475_v13 = vsel %vm467_vm4, %v4908_v8, 0 }
  0xa2   :  { %v516_v14 = vsub.f32 %v475_v13, %v475_v13 }
  0xa4   :  { %v517_v18 = vand.u32 4294901760, %v516_v14 }
  0xa6   :  { %v234_v11 = vpop.permute.xlu2 %233  ;;  %v518_v21 = vsub.f32 %v516_v14, %v517_v18 }
  0xa7   :  { %vm238_vm8 = vcmp.eq.s32.totalorder %v234_v11, %v6936_v46 }
  0xa8   :  { %v4909_v16 = vsel %vm238_vm8, 1.0, %v6612_v49  ;;  %v519_v22 = vand.u32 4294901760, %v518_v21 }
  0xa9   :  { %v478_v19 = vsel %vm467_vm4, %v4909_v16, 0 }
  0xaa   :  { %v524_v20 = vsub.f32 %v478_v19, %v478_v19 }
  0xac   :  { %v525_v23 = vand.u32 4294901760, %v524_v20 }
  0xae   :  { %v526_v24 = vsub.f32 %v524_v20, %v525_v23 }
  0xb0   :  { %v527_v25 = vand.u32 4294901760, %v526_v24 }
  0xb6   :  { %v228_v57 = vpop.permute.xlu1 %227 }
  0xb7   :  { %v212_v58 = vpop.permute.xlu0 %211  ;;  %vm236_vm5 = vcmp.eq.s32.totalorder %v228_v57, %v6936_v46 }
  0xb8   :  { %vm214_vm6 = vcmp.eq.s32.totalorder %v212_v58, %v6936_v46  ;;  %v6950_v60 = vsel %vm236_vm5, 1.0, %v6612_v49 }
  0xb9   :  { %v4905_v61 = vsel %vm214_vm6, 1.0, %v6612_v49  ;;  %v472_v3 = vsel %vm467_vm4, %v6950_v60, 0 }
  0xba   :  { %4911 = vmatmul.msk.f32.gmra.mxu1 %vm250_vm1, %v4905_v61  ;;  %v255_v0 = vsel %vm250_vm1, %v4905_v61, 0  ;;  %v508_v5 = vsub.f32 %v472_v3, %v472_v3 }
  0xbb   :  { %v289_v1 = vsub.f32 %v255_v0, %v255_v0 }
  0xbc   :  { %v509_v12 = vand.u32 4294901760, %v508_v5 }
  0xbd   :  { %366 = vmatmul.f32.gmra.mxu2 %v289_v1  ;;  %v290_v4 = vand.u32 4294901760, %v289_v1 }
  0xbe   :  { %v510_v15 = vsub.f32 %v508_v5, %v509_v12 }
  0xbf   :  { %398 = vmatmul.f32.gmra.mxu3 %v290_v4  ;;  %v291_v6 = vsub.f32 %v289_v1, %v290_v4 }
  0xc0   :  { %v511_v17 = vand.u32 4294901760, %v510_v15 }
  0xc1   :  { %v292_v9 = vand.u32 4294901760, %v291_v6 }
  0xc2   :  { %4914 = vmatmul.msk.f32.vlgmr.msrb.gmra.mxu1 %vm250_vm1, %v4904_v51 }
  0xc3   :  { %293 = vmatmul.f32.gmra.mxu0 %v292_v9 }
  0xc5   :  { %504 = vmatmul.f32.vlgmr.msrb.gmra.mxu2 %v503_v10 }
  0xc7   :  { %4916 = vmatmul.msk.f32.vlgmr.msrb.gmra.mxu3 %vm467_vm4, %v6940_v50 }
  0xca   :  { %4915 = vmatmul.msk.f32.gmra.mxu1 %vm250_vm1, %v4905_v61 }
  0xcb   :  { %4912 = vmatmul.msk.f32.vlgmr.msrb.gmra.mxu0 %vm250_vm1, %v4904_v51 }
  0xcd   :  { %512 = vmatmul.f32.gmra.mxu2 %v511_v17 }
  0xcf   :  { %4917 = vmatmul.msk.f32.gmra.mxu3 %vm467_vm4, %v6950_v60 }
  0xd2   :  { %645 = vmatmul.f32.vlgmr.msra.gmra.mxu1 %v501_v2 }
  0xd3   :  { %4913 = vmatmul.msk.f32.gmra.mxu0 %vm250_vm1, %v4905_v61  ;;  %vm1151_vm1 = vcmask 1040384  }
  0xd5   :  { %520 = vmatmul.f32.gmra.mxu2 %v519_v22 }
  0xd7   :  { %4918 = vmatmul.msk.f32.gmra.mxu3 %vm467_vm4, %v4908_v8 }
  0xda   :  { %651 = vmatmul.f32.gmra.mxu1 %v509_v12 }
  0xdb   :  { %604 = vmatmul.f32.vlgmr.msra.gmra.mxu0 %v6946_v56 }
  0xdd   :  { %528 = vmatmul.f32.gmra.mxu2 %v527_v25 }
  0xdf   :  { %4919 = vmatmul.msk.f32.gmra.mxu3 %vm467_vm4, %v4909_v16 }
  0xe2   :  { %657 = vmatmul.f32.gmra.mxu1 %v517_v18 }
  0xe3   :  { %609 = vmatmul.f32.gmra.mxu0 %v508_v5 }
  0xe5   :  { %4920 = vmatmul.msk.f32.vlgmr.msra.gmra.mxu2 %vm467_vm4, %v6940_v50 }
  0xe7   :  { %4924 = vmatmul.msk.f32.vlgmr.msra.gmra.mxu3 %vm467_vm4, %v6940_v50 }
  0xea   :  { %663 = vmatmul.f32.gmra.mxu1 %v525_v23 }
  0xeb   :  { %614 = vmatmul.f32.gmra.mxu0 %v516_v14 }
  0xed   :  { %4921 = vmatmul.msk.f32.gmra.mxu2 %vm467_vm4, %v6950_v60 }
  0xef   :  { %4925 = vmatmul.msk.f32.gmra.mxu3 %vm467_vm4, %v6950_v60 }
  0xf3   :  { %619 = vmatmul.f32.gmra.mxu0 %v524_v20 }
  0xf5   :  { %4922 = vmatmul.msk.f32.gmra.mxu2 %vm467_vm4, %v4908_v8 }
  0xf7   :  { %4926 = vmatmul.msk.f32.gmra.mxu3 %vm467_vm4, %v4908_v8 }
  0xfd   :  { %4923 = vmatmul.msk.f32.gmra.mxu2 %vm467_vm4, %v4909_v16 }
  0xff   :  { %4927 = vmatmul.msk.f32.gmra.mxu3 %vm467_vm4, %v4909_v16  ;;  %vm1210_vm4 = vcmask 1045504  }
 0x10a   :  { %v330_v26 = vpop.f32.mrf.mxu1 }
 0x113   :  { %v286_v27 = vpop.f32.mrf.mxu0  ;;  %v362_v28 = vpop.f32.mrf.mxu2 }
 0x114   :  { %v331_v41 = vadd.f32 %v330_v26, %v286_v27 }
 0x115   :  { %v393_v29 = vpop.f32.mrf.mxu3 }
 0x116   :  { %v363_v43 = vadd.f32 %v362_v28, %v331_v41 }
 0x118   :  { %v394_v47 = vadd.f32 %v393_v29, %v363_v43 }
 0x137   :  { %v334_v32 = vpop.f32.mrf.mxu1 }
 0x13f   :  { %v457_v37 = vpop.f32.mrf.mxu1 }
 0x140   :  { %v294_v30 = vpop.f32.mrf.mxu0  ;;  %v367_v31 = vpop.f32.mrf.mxu2 }
 0x141   :  { %v335_v55 = vadd.f32 %v334_v32, %v294_v30 }
 0x142   :  { %v399_v33 = vpop.f32.mrf.mxu3 }
 0x143   :  { %v368_v59 = vadd.f32 %v367_v31, %v335_v55 }
 0x145   :  { %v400_v4 = vadd.f32 %v399_v33, %v368_v59 }
 0x147   :  { %v461_v42 = vpop.f32.mrf.mxu1 }
 0x148   :  { %v429_v34 = vpop.f32.mrf.mxu0  ;;  %v505_v35 = vpop.f32.mrf.mxu2 }
 0x149   :  { %v430_v48 = vadd.f32 %v429_v34, %v394_v47 }
 0x14a   :  { %v565_v36 = vpop.f32.mrf.mxu3 }
 0x14b   :  { %v458_v51 = vadd.f32 %v457_v37, %v430_v48  ;;  %v566_v52 = vadd.f32 %v565_v36, %v505_v35 }
 0x14d   :  { %v747_v57 = vsel %vm745_vm9, %v458_v51, 0 }
 0x14e   :  { %v6986_v60 = vand.u32 4294901760, %v747_v57 }
 0x14f   :  { %v646_v49 = vpop.f32.mrf.mxu1 }
 0x150   :  { %v433_v38 = vpop.f32.mrf.mxu0  ;;  %v513_v39 = vpop.f32.mrf.mxu2  ;;  %v6989_v5 = vsub.f32 %v747_v57, %v6986_v60 }
 0x151   :  { %v434_v6 = vadd.f32 %v433_v38, %v400_v4 }
 0x152   :  { %v569_v40 = vpop.f32.mrf.mxu3  ;;  %v769_v11 = vand.u32 4294901760, %v6989_v5 }
 0x153   :  { %v570_v62 = vadd.f32 %v569_v40, %v513_v39  ;;  %v462_v14 = vadd.f32 %v461_v42, %v434_v6 }
 0x154   :  { %v770_v20 = vsub.f32 %v6989_v5, %v769_v11 }
 0x155   :  { %v951_v22 = vsel %vm745_vm9, %v462_v14, 0 }
 0x156   :  { %v771_v28 = vand.u32 4294901760, %v770_v20  ;;  %v6994_v29 = vand.u32 4294901760, %v951_v22 }
 0x157   :  { %v652_v0 = vpop.f32.mrf.mxu1 }
 0x158   :  { %v521_v44 = vpop.f32.mrf.mxu2  ;;  %v605_v45 = vpop.f32.mrf.mxu0  ;;  %v972_v38 = vsub.f32 %v951_v22, %v6994_v29 }
 0x159   :  { %v606_v54 = vadd.f32 %v605_v45, %v566_v52 }
 0x15a   :  { %v573_v46 = vpop.f32.mrf.mxu3 }
 0x15b   :  { %v647_v58 = vadd.f32 %v646_v49, %v606_v54  ;;  %v574_v12 = vadd.f32 %v573_v46, %v521_v44  ;;  %v973_v46 = vand.u32 4294901760, %v972_v38 }
 0x15d   :  { %v974_v51 = vsub.f32 %v972_v38, %v973_v46 }
 0x15f   :  { %v658_v19 = vpop.f32.mrf.mxu1  ;;  %v975_v55 = vand.u32 4294901760, %v974_v51 }
 0x160   :  { %v529_v50 = vpop.f32.mrf.mxu2  ;;  %v610_v56 = vpop.f32.mrf.mxu0 }
 0x161   :  { %v611_v2 = vadd.f32 %v610_v56, %v570_v62 }
 0x162   :  { %v577_v53 = vpop.f32.mrf.mxu3 }
 0x163   :  { %v653_v9 = vadd.f32 %v652_v0, %v611_v2  ;;  %v578_v30 = vadd.f32 %v577_v53, %v529_v50 }
 0x167   :  { %v664_v40 = vpop.f32.mrf.mxu1 }
 0x168   :  { %v694_v61 = vpop.f32.mrf.mxu2  ;;  %v615_v7 = vpop.f32.mrf.mxu0 }
 0x169   :  { %v695_v63 = vadd.f32 %v694_v61, %v647_v58  ;;  %v616_v16 = vadd.f32 %v615_v7, %v574_v12 }
 0x16a   :  { %v730_v1 = vpop.f32.mrf.mxu3 }
 0x16b   :  { %v731_v3 = vadd.f32 %v730_v1, %v695_v63  ;;  %v659_v24 = vadd.f32 %v658_v19, %v616_v16 }
 0x16d   :  { %v765_v8 = vand.u32 4294901760, %v731_v3 }
 0x16f   :  { %v797_v17 = vsub.f32 %v731_v3, %v765_v8 }
 0x170   :  { %v698_v10 = vpop.f32.mrf.mxu2  ;;  %v620_v26 = vpop.f32.mrf.mxu0 }
 0x171   :  { %v699_v13 = vadd.f32 %v698_v10, %v653_v9  ;;  %v798_v25 = vand.u32 4294901760, %v797_v17  ;;  %v621_v34 = vadd.f32 %v620_v26, %v578_v30 }
 0x172   :  { %v734_v15 = vpop.f32.mrf.mxu3 }
 0x173   :  { %v735_v18 = vadd.f32 %v734_v15, %v699_v13  ;;  %v799_v37 = vsub.f32 %v797_v17, %v798_v25  ;;  %v665_v42 = vadd.f32 %v664_v40, %v621_v34 }
 0x175   :  { %v763_v21 = vand.u32 4294901760, %v735_v18  ;;  %v800_v43 = vand.u32 4294901760, %v799_v37 }
 0x177   :  { %v791_v23 = vsub.f32 %v735_v18, %v763_v21  ;;  %764 = vmatpush.msrb.mxu0 %v763_v21 }
 0x178   :  { %v702_v27 = vpop.f32.mrf.mxu2 }
 0x179   :  { %v792_v31 = vand.u32 4294901760, %v791_v23  ;;  %v703_v32 = vadd.f32 %v702_v27, %v659_v24  ;;  %766 = vmatpush.msrb.mxu0 %v765_v8 }
 0x17a   :  { %v738_v33 = vpop.f32.mrf.mxu3  ;;  %772 = vmatmul.f32.vlgmr.msrb.gmra.mxu0 %v771_v28 }
 0x17b   :  { %v793_v35 = vsub.f32 %v791_v23, %v792_v31  ;;  %v739_v36 = vadd.f32 %v738_v33, %v703_v32  ;;  %823 = vmatpush.msra.mxu0 %v791_v23 }
 0x17d   :  { %826 = vmatpush.msra.mxu0 %v797_v17  ;;  %v794_v39 = vand.u32 4294901760, %v793_v35  ;;  %v969_v41 = vand.u32 4294901760, %v739_v36 }
 0x17f   :  { %875 = vmatpush.msrb.mxu0 %v792_v31  ;;  %795 = vmatpush.msrb.mxu1 %v794_v39  ;;  %v1001_v48 = vsub.f32 %v739_v36, %v969_v41 }
 0x180   :  { %v706_v44 = vpop.f32.mrf.mxu2 }
 0x181   :  { %879 = vmatpush.msrb.mxu0 %v798_v25  ;;  %v707_v45 = vadd.f32 %v706_v44, %v665_v42  ;;  %801 = vmatpush.msrb.mxu1 %v800_v43  ;;  %v1002_v53 = vand.u32 4294901760, %v1001_v48 }
 0x182   :  { %v742_v47 = vpop.f32.mrf.mxu3  ;;  %803 = vmatmul.f32.vlgmr.msrb.gmra.mxu1 %v6986_v60  ;;  %829 = vmatmul.f32.vlgmr.msra.gmra.mxu0 %v6989_v5 }
 0x183   :  { %v743_v49 = vadd.f32 %v742_v47, %v707_v45  ;;  %848 = vmatpush.msra.mxu1 %v763_v21  ;;  %v1003_v57 = vsub.f32 %v1001_v48, %v1002_v53 }
 0x185   :  { %v967_v50 = vand.u32 4294901760, %v743_v49  ;;  %850 = vmatpush.msra.mxu1 %v765_v8  ;;  %v1004_v59 = vand.u32 4294901760, %v1003_v57 }
 0x187   :  { %900 = vmatpush.msrb.mxu1 %v763_v21  ;;  %v995_v52 = vsub.f32 %v743_v49, %v967_v50  ;;  %968 = vmatpush.msrb.mxu2 %v967_v50 }
 0x189   :  { %902 = vmatpush.msrb.mxu1 %v765_v8  ;;  %v996_v54 = vand.u32 4294901760, %v995_v52  ;;  %970 = vmatpush.msrb.mxu2 %v969_v41 }
 0x18a   :  { %1027 = vmatpush.msra.mxu0 %v995_v52  ;;  %854 = vmatmul.f32.vlgmr.msra.gmra.mxu1 %v769_v11 }
 0x18b   :  { %881 = vmatmul.f32.vlgmr.msrb.gmra.mxu0 %v6986_v60  ;;  %v997_v56 = vsub.f32 %v995_v52, %v996_v54  ;;  %976 = vmatmul.f32.vlgmr.msrb.gmra.mxu2 %v975_v55 }
 0x18c   :  { %1052 = vmatpush.msra.mxu1 %v967_v50  ;;  %1030 = vmatpush.msra.mxu0 %v1001_v48 }
 0x18d   :  { %1079 = vmatpush.msra.mxu2 %v996_v54  ;;  %v998_v58 = vand.u32 4294901760, %v997_v56 }
 0x18e   :  { %1054 = vmatpush.msra.mxu1 %v969_v41 }
 0x18f   :  { %1083 = vmatpush.msra.mxu2 %v1002_v53  ;;  %999 = vmatpush.msrb.mxu3 %v998_v58 }
 0x191   :  { %1005 = vmatpush.msrb.mxu3 %v1004_v59 }
 0x192   :  { %904 = vmatmul.f32.vlgmr.msrb.gmra.mxu1 %v6986_v60  ;;  %1007 = vmatmul.f32.vlgmr.msrb.gmra.mxu3 %v6994_v29 }
 0x193   :  { %1033 = vmatmul.f32.vlgmr.msra.gmra.mxu0 %v972_v38  ;;  %1085 = vmatmul.f32.vlgmr.msra.gmra.mxu2 %v6994_v29 }
 0x194   :  { %1104 = vmatpush.msra.mxu3 %v967_v50 }
 0x196   :  { %1106 = vmatpush.msra.mxu3 %v969_v41 }
 0x19a   :  { %1058 = vmatmul.f32.vlgmr.msra.gmra.mxu1 %v973_v46  ;;  %1108 = vmatmul.f32.vlgmr.msra.gmra.mxu3 %v6994_v29 }
 0x1f7   :  { %v773_v61 = vpop.f32.mrf.mxu0 }
 0x1ff   :  { %v804_v62 = vpop.f32.mrf.mxu1  ;;  %v830_v63 = vpop.f32.mrf.mxu0 }
 0x200   :  { %v805_v0 = vadd.f32 %v804_v62, %v773_v61 }
 0x202   :  { %v831_v2 = vadd.f32 %v830_v63, %v805_v0  ;;  %v1219_v63 = vld [vmem:[%s7522_s5] sm:$0xff]  ;;  %v1222_v0 = vld [vmem:[%s7522_s5 + $0x18] sm:$0xff] }
 0x207   :  { %v855_v1 = vpop.f32.mrf.mxu1 }
 0x208   :  { %v856_v3 = vadd.f32 %v855_v1, %v831_v2  ;;  %v882_v4 = vpop.f32.mrf.mxu0  ;;  %v1221_v1 = vld [vmem:[%s7522_s5 + $0x10] sm:$0xff]  ;;  %v1220_v2 = vld [vmem:[%s7522_s5 + $0x8] sm:$0xff] }
 0x20a   :  { %v883_v5 = vadd.f32 %v882_v4, %v856_v3  ;;  %v1153_v4 = vld [vmem:[%s7523_s6] sm:$0xff] }
 0x20e   :  { %v977_v7 = vpop.f32.mrf.mxu2 }
 0x20f   :  { %v905_v60 = vpop.f32.mrf.mxu1 }
 0x210   :  { %v7004_v6 = vadd.f32 %v905_v60, %v883_v5  ;;  %v1034_v13 = vpop.f32.mrf.mxu0  ;;  %v1175_v5 = vperm.slane %v1153_v4, 5 }
 0x212   :  { %v917_v8 = vrot.slane %v7004_v6, 3  ;;  %v913_v9 = vrot.slane %v7004_v6, 2  ;;  %v909_v10 = vrot.slane %v7004_v6, 1  ;;  %v925_v17 = vrot.slane %v7004_v6, 5 }
 0x213   :  { %v921_v19 = vrot.slane %v7004_v6, 4  ;;  %v933_v30 = vrot.slane %v7004_v6, 7  ;;  %v929_v31 = vrot.slane %v7004_v6, 6 }
 0x214   :  { %918 = vrot.lane.b32.xlu0 %v917_v8, %s6613_s3  ;;  %914 = vrot.lane.b32.xlu1 %v913_v9, %s6614_s24  ;;  %v1179_v8 = vperm.slane %v1153_v4, 6  ;;  %v1171_v9 = vperm.slane %v1153_v4, 4 }
 0x215   :  { %910 = vrot.lane.b32.xlu2 %v909_v10, %s6615_s25  ;;  %v1008_v11 = vpop.f32.mrf.mxu3  ;;  %v1215_v10 = vld [vmem:[%s7521_s4] sm:$0xff] }
 0x216   :  { %v1009_v12 = vadd.f32 %v1008_v11, %v977_v7  ;;  %v1086_v18 = vpop.f32.mrf.mxu2 }
 0x217   :  { %v1059_v15 = vpop.f32.mrf.mxu1 }
 0x218   :  { %v1035_v14 = vadd.f32 %v1034_v13, %v1009_v12 }
 0x21a   :  { %v1060_v16 = vadd.f32 %v1059_v15, %v1035_v14 }
 0x21c   :  { %926 = vrot.lane.b32.xlu1 %v925_v17, %s6616_s8  ;;  %v1087_v20 = vadd.f32 %v1086_v18, %v1060_v16  ;;  %v1245_v17 = vsel %vm1243_vm2, %v1215_v10, 0 }
 0x21d   :  { %922 = vrot.lane.b32.xlu2 %v921_v19, %s6617_s13  ;;  %v1109_v21 = vpop.f32.mrf.mxu3 }
 0x21e   :  { %v1110_v22 = vadd.f32 %v1109_v21, %v1087_v20  ;;  %v6579_v21 = vld [vmem:[%s7523_s6 + $0x8] ss:$0 sm:$0xff] }
 0x220   :  { %v1113_v23 = vrot.slane %v1110_v22, 1  ;;  %v1117_v24 = vrot.slane %v1110_v22, 2  ;;  %v1125_v25 = vrot.slane %v1110_v22, 4  ;;  %v1121_v26 = vrot.slane %v1110_v22, 3 }
 0x221   :  { %v1129_v27 = vrot.slane %v1110_v22, 5  ;;  %v1137_v28 = vrot.slane %v1110_v22, 7  ;;  %v1133_v29 = vrot.slane %v1110_v22, 6 }
 0x222   :  { %1114 = vrot.lane.b32.xlu0 %v1113_v23, %s6615_s25  ;;  %v7059_v23 = vand.u32 4294901760, %v1245_v17 }
 0x224   :  { %1118 = vrot.lane.b32.xlu1 %v1117_v24, %s6614_s24 }
 0x225   :  { %1126 = vrot.lane.b32.xlu2 %v1125_v25, %s6617_s13  ;;  %v1161_v25 = vperm.slane %v1153_v4, 1 }
 0x22a   :  { %1122 = vrot.lane.b32.xlu0 %v1121_v26, %s6613_s3 }
 0x22c   :  { %1130 = vrot.lane.b32.xlu1 %v1129_v27, %s6616_s8  ;;  %v1216_v27 = vld [vmem:[%s7521_s4 + $0x8] sm:$0xff] }
 0x22d   :  { %1138 = vrot.lane.b32.xlu2 %v1137_v28, %s6618_s10  ;;  %v1165_v28 = vperm.slane %v1153_v4, 2 }
 0x232   :  { %1134 = vrot.lane.b32.xlu0 %v1133_v29, %s6619_s26 }
 0x234   :  { %934 = vrot.lane.b32.xlu1 %v933_v30, %s6618_s10 }
 0x23a   :  { %930 = vrot.lane.b32.xlu0 %v929_v31, %s6619_s26 }
 0x26f   :  { %v911_v33 = vpop.permute.xlu2 %910 }
 0x270   :  { %v937_v46 = vsel %vm745_vm9, %v7004_v6, %v911_v33  ;;  %v1183_v6 = vperm.slane %v1153_v4, 7 }
 0x277   :  { %v923_v37 = vpop.permute.xlu2 %922 }
 0x27f   :  { %v1127_v41 = vpop.permute.xlu2 %1126 }
 0x286   :  { %v915_v32 = vpop.permute.xlu1 %914  ;;  %v919_v34 = vpop.permute.xlu0 %918 }
 0x287   :  { %v939_v48 = vsel %vm938_vm10, %v937_v46, %v915_v32  ;;  %v1139_v52 = vpop.permute.xlu2 %1138  ;;  %v1279_v32 = vsub.f32 %v1245_v17, %v7059_v23 }
 0x288   :  { %v941_v51 = vsel %vm940_vm11, %v939_v48, %v919_v34  ;;  %v1248_v34 = vsel %vm1243_vm2, %v1216_v27, 0 }
 0x289   :  { %v943_v54 = vsel %vm942_vm12, %v941_v51, %v923_v37 }
 0x28e   :  { %v927_v35 = vpop.permute.xlu1 %926 }
 0x28f   :  { %v945_v55 = vsel %vm944_vm14, %v943_v54, %v927_v35 }
 0x294   :  { %v1115_v36 = vpop.permute.xlu0 %1114 }
 0x295   :  { %v1141_v39 = vsel %vm745_vm9, %v1110_v22, %v1115_v36 }
 0x296   :  { %v1119_v38 = vpop.permute.xlu1 %1118 }
 0x297   :  { %v1142_v42 = vsel %vm938_vm10, %v1141_v39, %v1119_v38  ;;  %v1157_v39 = vperm.slane %v1153_v4, 0 }
 0x29c   :  { %v1123_v40 = vpop.permute.xlu0 %1122 }
 0x29d   :  { %v1143_v43 = vsel %vm940_vm11, %v1142_v42, %v1123_v40  ;;  %v1169_v40 = vperm.slane %v1153_v4, 3  ;;  %v7073_v42 = vand.u32 4294901760, %v1248_v34 }
 0x29e   :  { %v1131_v44 = vpop.permute.xlu1 %1130  ;;  %v1144_v45 = vsel %vm942_vm12, %v1143_v43, %v1127_v41  ;;  %v1280_v41 = vand.u32 4294901760, %v1279_v32 }
 0x29f   :  { %v1145_v49 = vsel %vm944_vm14, %v1144_v45, %v1131_v44  ;;  %v1287_v54 = vsub.f32 %v1248_v34, %v7073_v42 }
 0x2a4   :  { %v1135_v47 = vpop.permute.xlu0 %1134 }
 0x2a5   :  { %v1146_v50 = vsel %vm946_vm13, %v1145_v49, %v1135_v47  ;;  %v1217_v47 = vld [vmem:[%s7521_s4 + $0x10] sm:$0xff] }
 0x2a6   :  { %v1147_v53 = vsel %vm948_vm15, %v1146_v50, %v1139_v52  ;;  %v935_v58 = vpop.permute.xlu1 %934 }
 0x2a7   :  { %v1149_v57 = vrot.slane %v1147_v53, 7  ;;  %v1281_v53 = vsub.f32 %v1279_v32, %v1280_v41 }
 0x2ac   :  { %v931_v56 = vpop.permute.xlu0 %930 }
 0x2ad   :  { %v947_v59 = vsel %vm946_vm13, %v945_v55, %v931_v56 }
 0x2ae   :  { %v949_v61 = vsel %vm948_vm15, %v947_v59, %v935_v58 }
 0x2af   :  { %v1152_v62 = vsel %vm1151_vm1, %v949_v61, %v1149_v57  ;;  %v1251_v57 = vsel %vm1243_vm2, %v1217_v47, 0 }
 0x2b0   :  { %1159 = vrot.lane.b32.xlu1 %v1152_v62, %s6615_s25  ;;  %1177 = vrot.lane.b32.xlu0 %v1152_v62, %s6620_s27  ;;  %v1172_v16 = vmul.f32 %v1171_v9, %v1152_v62 }
 0x2b1   :  { %1173 = vrot.lane.b32.xlu2 %v1152_v62, %s6621_s28 }
 0x2b8   :  { %1163 = vrot.lane.b32.xlu1 %v1152_v62, %s6622_s29  ;;  %1185 = vrot.lane.b32.xlu0 %v1152_v62, %s6623_s30 }
 0x2b9   :  { %1181 = vrot.lane.b32.xlu2 %v1152_v62, %s6618_s10 }
 0x2c0   :  { %1225 = vperm.xlu1 %6547, %v1219_v63   ;;  %1167 = vrot.lane.b32.xlu0 %v1152_v62, %s6624_s17 }
 0x2c1   :  { %1155 = vrot.lane.b32.xlu2 %v1152_v62, %s6625_s18 }
 0x2c8   :  { %1240 = vperm.xlu1 %6547, %v1222_v0   ;;  %1235 = vperm.xlu0 %6546, %v1221_v1   ;;  %v1282_v0 = vand.u32 4294901760, %v1281_v53  ;;  %v1288_v1 = vand.u32 4294901760, %v1287_v54 }
 0x2c9   :  { %1230 = vperm.xlu2 %6548, %v1220_v2   ;;  %v1294_v2 = vand.u32 4294901760, %v1251_v57 }
 0x30b   :  { %v1174_v3 = vpop.permute.xlu2 %1173 }
 0x30c   :  { %v1176_v60 = vmul.f32 %v1175_v5, %v1174_v3  ;;  %v1218_v5 = vld [vmem:[%s7521_s4 + $0x18] sm:$0xff] }
 0x30d   :  { %v1254_v9 = vsel %vm1243_vm2, %v1218_v5, 0 }
 0x30e   :  { %v1199_v11 = vrot.slane %v1176_v60, 6 }
 0x310   :  { %v1212_v20 = vsel %vm1207_vm3, %v1172_v16, %v1199_v11 }
 0x313   :  { %v1182_v7 = vpop.permute.xlu2 %1181 }
 0x314   :  { %v1184_v12 = vmul.f32 %v1183_v6, %v1182_v7  ;;  %v1289_v6 = vsub.f32 %v1287_v54, %v1288_v1  ;;  %v1295_v7 = vsub.f32 %v1251_v57, %v1294_v2 }
 0x316   :  { %v1205_v19 = vrot.slane %v1184_v12, 2  ;;  %v1290_v11 = vand.u32 4294901760, %v1289_v6  ;;  %v1296_v12 = vand.u32 4294901760, %v1295_v7 }
 0x31b   :  { %v1156_v43 = vpop.permute.xlu2 %1155 }
 0x31c   :  { %v1158_v51 = vmul.f32 %v1157_v39, %v1156_v43 }
 0x322   :  { %v1160_v13 = vpop.permute.xlu1 %1159  ;;  %v1178_v14 = vpop.permute.xlu0 %1177 }
 0x323   :  { %v1180_v15 = vmul.f32 %v1179_v8, %v1178_v14  ;;  %v1162_v35 = vmul.f32 %v1161_v25, %v1160_v13  ;;  %v1302_v13 = vand.u32 4294901760, %v1254_v9 }
 0x325   :  { %v1202_v18 = vrot.slane %v1180_v15, 4  ;;  %v1190_v46 = vrot.slane %v1162_v35, 6  ;;  %v1297_v15 = vsub.f32 %v1295_v7, %v1296_v12  ;;  %v1303_v16 = vsub.f32 %v1254_v9, %v1302_v13 }
 0x327   :  { %v1213_v22 = vsel %vm257_vm0, %v1212_v20, %v1202_v18  ;;  %v1208_v58 = vsel %vm1207_vm3, %v1158_v51, %v1190_v46  ;;  %v1298_v17 = vand.u32 4294901760, %v1297_v15  ;;  %v1304_v18 = vand.u32 4294901760, %v1303_v16  ;;  %v1567_v15 = vld [vmem:[%s7524_s7 + $0x78] sm:$0xff] }
 0x328   :  { %v1214_v24 = vsel %vm1210_vm4, %v1213_v22, %v1205_v19 }
 0x329   :  { %v7062_v26 = vand.u32 4294901760, %v1214_v24  ;;  %v1305_v19 = vsub.f32 %v1303_v16, %v1304_v18 }
 0x32a   :  { %v1186_v29 = vpop.permute.xlu0 %1185  ;;  %v1164_v30 = vpop.permute.xlu1 %1163 }
 0x32b   :  { %v1188_v31 = vmul.f32 %v6579_v21, %v1186_v29  ;;  %v1331_v33 = vsub.f32 %v1214_v24, %v7062_v26  ;;  %v1166_v37 = vmul.f32 %v1165_v28, %v1164_v30  ;;  %v1306_v20 = vand.u32 4294901760, %v1305_v19 }
 0x32d   :  { %v1257_v36 = vsel %vm1207_vm3, %v1188_v31, 0  ;;  %v1332_v45 = vand.u32 4294901760, %v1331_v33  ;;  %v1193_v48 = vrot.slane %v1166_v37, 4 }
 0x32e   :  { %v7071_v38 = vand.u32 4294901760, %v1257_v36 }
 0x32f   :  { %v1333_v56 = vsub.f32 %v1331_v33, %v1332_v45  ;;  %v1209_v61 = vsel %vm257_vm0, %v1208_v58, %v1193_v48 }
 0x330   :  { %v1325_v44 = vsub.f32 %v1257_v36, %v7071_v38  ;;  %1273 = vmatpush.msrb.mxu0 %v7071_v38  ;;  %1416 = vmatpush.msrb.mxu3 %v7071_v38  ;;  %v1231_v36 = vpop.permute.xlu2 %1230 }
 0x331   :  { %v1334_v4 = vand.u32 4294901760, %v1333_v56 }
 0x332   :  { %v1326_v49 = vand.u32 4294901760, %v1325_v44  ;;  %1374 = vmatpush.msrb.mxu2 %v1325_v44  ;;  %v1168_v50 = vpop.permute.xlu0 %1167  ;;  %1275 = vmatpush.msrb.mxu0 %v7062_v26  ;;  %v1226_v30 = vpop.permute.xlu1 %1225 }
 0x333   :  { %v1170_v52 = vmul.f32 %v1169_v40, %v1168_v50  ;;  %1418 = vmatpush.msrb.mxu3 %v7062_v26 }
 0x334   :  { %1377 = vmatpush.msrb.mxu2 %v1331_v33  ;;  %v1327_v55 = vsub.f32 %v1325_v44, %v1326_v49 }
 0x335   :  { %v1196_v59 = vrot.slane %v1170_v52, 2 }
 0x336   :  { %v1328_v62 = vand.u32 4294901760, %v1327_v55 }
 0x337   :  { %v1211_v63 = vsel %vm1210_vm4, %v1209_v61, %v1196_v59 }
 0x338   :  { %v1276_v3 = vand.u32 4294901760, %v1211_v63  ;;  %1329 = vmatpush.msrb.mxu1 %v1328_v62 }
 0x33a   :  { %1277 = vmatpush.msrb.mxu0 %v1276_v3  ;;  %1335 = vmatpush.msrb.mxu1 %v1334_v4  ;;  %v1337_v60 = vsub.f32 %v1211_v63, %v1276_v3  ;;  %v1236_v47 = vpop.permute.xlu0 %1235  ;;  %v1241_v58 = vpop.permute.xlu1 %1240 }
 0x33b   :  { %1420 = vmatpush.msrb.mxu3 %v1276_v3  ;;  %1283 = vmatmul.f32.vlgmr.msrb.gmra.mxu0 %v1282_v0 }
 0x33c   :  { %1462 = vmatpush.msra.mxu0 %v1326_v49  ;;  %1380 = vmatpush.msrb.mxu2 %v1337_v60  ;;  %v1338_v8 = vand.u32 4294901760, %v1337_v60 }
 0x33d   :  { %1383 = vmatmul.f32.vlgmr.msrb.gmra.mxu2 %v1279_v32  ;;  %1424 = vmatmul.f32.vlgmr.msrb.gmra.mxu3 %v1280_v41 }
 0x33e   :  { %1466 = vmatpush.msra.mxu0 %v1332_v45  ;;  %v1339_v10 = vsub.f32 %v1337_v60, %v1338_v8 }
 0x340   :  { %1470 = vmatpush.msra.mxu0 %v1338_v8  ;;  %v1340_v14 = vand.u32 4294901760, %v1339_v10 }
 0x342   :  { %1341 = vmatpush.msrb.mxu1 %v1340_v14 }
 0x343   :  { %1291 = vmatmul.f32.gmra.mxu0 %v1290_v11  ;;  %1343 = vmatmul.f32.vlgmr.msrb.gmra.mxu1 %v7059_v23 }
 0x344   :  { %1502 = vmatpush.msra.mxu1 %v7071_v38 }
 0x345   :  { %1388 = vmatmul.f32.gmra.mxu2 %v1287_v54  ;;  %1430 = vmatmul.f32.gmra.mxu3 %v1288_v1 }
 0x346   :  { %1504 = vmatpush.msra.mxu1 %v7062_v26 }
 0x348   :  { %1506 = vmatpush.msra.mxu1 %v1276_v3 }
 0x34b   :  { %1299 = vmatmul.f32.gmra.mxu0 %v1298_v17  ;;  %1347 = vmatmul.f32.gmra.mxu1 %v7073_v42  ;;  %v1565_v17 = vld [vmem:[%s7524_s7 + $0x68] sm:$0xff] }
 0x34d   :  { %1393 = vmatmul.f32.gmra.mxu2 %v1295_v7  ;;  %1436 = vmatmul.f32.gmra.mxu3 %v1296_v12 }
 0x353   :  { %1307 = vmatmul.f32.gmra.mxu0 %v1306_v20  ;;  %1351 = vmatmul.f32.gmra.mxu1 %v1294_v2  ;;  %v7136_v20 = vand.u32 4294901760, %v1565_v17 }
 0x355   :  { %1398 = vmatmul.f32.gmra.mxu2 %v1303_v16  ;;  %1442 = vmatmul.f32.gmra.mxu3 %v1304_v18  ;;  %v1566_v16 = vld [vmem:[%s7524_s7 + $0x70] sm:$0xff]  ;;  %v7132_v18 = vand.u32 4294901760, %v1567_v15 }
 0x356   :  { %v7134_v19 = vand.u32 4294901760, %v1566_v16 }
 0x357   :  { %1816 = vmatpush.msrb.mxu1 %v7132_v18  ;;  %1569 = vmatpush.msra.mxu2 %v7132_v18 }
 0x359   :  { %1818 = vmatpush.msrb.mxu1 %v7134_v19  ;;  %1571 = vmatpush.msra.mxu2 %v7134_v19 }
 0x35b   :  { %1355 = vmatmul.f32.gmra.mxu1 %v1302_v13  ;;  %1472 = vmatmul.f32.vlgmr.msra.gmra.mxu0 %v7059_v23 }
 0x35c   :  { %1820 = vmatpush.msrb.mxu1 %v7136_v20  ;;  %1573 = vmatpush.msra.mxu2 %v7136_v20 }
 0x363   :  { %1476 = vmatmul.f32.gmra.mxu0 %v7073_v42  ;;  %1508 = vmatmul.f32.vlgmr.msra.gmra.mxu1 %v7059_v23 }
 0x36b   :  { %1480 = vmatmul.f32.gmra.mxu0 %v1294_v2  ;;  %1512 = vmatmul.f32.gmra.mxu1 %v7073_v42 }
 0x373   :  { %1484 = vmatmul.f32.gmra.mxu0 %v1302_v13  ;;  %1516 = vmatmul.f32.gmra.mxu1 %v1294_v2 }
 0x37b   :  { %1520 = vmatmul.f32.gmra.mxu1 %v1302_v13 }
 0x3b8   :  { %v1284_v21 = vpop.f32.mrf.mxu0 }
 0x3b9   :  { %v1285_v31 = vadd.f32 %v1284_v21, %v1226_v30  ;;  %v1564_v21 = vld [vmem:[%s7524_s7 + $0x60] sm:$0xff]  ;;  %v7160_v30 = vsub.f32 %v1567_v15, %v7132_v18 }
 0x3bb   :  { %1748 = vmatpush.msrb.mxu0 %v7160_v30 }
 0x3c0   :  { %v1292_v22 = vpop.f32.mrf.mxu0  ;;  %v1344_v24 = vpop.f32.mrf.mxu1 }
 0x3c1   :  { %v1384_v27 = vpop.f32.mrf.mxu2  ;;  %v1425_v32 = vpop.f32.mrf.mxu3  ;;  %v1345_v33 = vadd.f32 %v1344_v24, %v1285_v31  ;;  %v1293_v38 = vadd.f32 %v1292_v22, %v1231_v36  ;;  %v1563_v22 = vld [vmem:[%s7524_s7 + $0x58] sm:$0xff]  ;;  %v1562_v24 = vld [vmem:[%s7524_s7 + $0x50] sm:$0xff]  ;;  %v7163_v31 = vsub.f32 %v1566_v16, %v7134_v19 }
 0x3c3   :  { %v1385_v35 = vadd.f32 %v1384_v27, %v1345_v33  ;;  %v7151_v27 = vand.u32 4294901760, %v1562_v24  ;;  %1751 = vmatpush.msrb.mxu0 %v7163_v31 }
 0x3c5   :  { %v1426_v39 = vadd.f32 %v1425_v32, %v1385_v35  ;;  %v7166_v32 = vsub.f32 %v1565_v17, %v7136_v20  ;;  %v7179_v35 = vsub.f32 %v1562_v24, %v7151_v27 }
 0x3c7   :  { %1754 = vmatpush.msrb.mxu0 %v7166_v32 }
 0x3c8   :  { %v1300_v25 = vpop.f32.mrf.mxu0  ;;  %v1348_v26 = vpop.f32.mrf.mxu1 }
 0x3c9   :  { %v1389_v37 = vpop.f32.mrf.mxu2  ;;  %v1349_v40 = vadd.f32 %v1348_v26, %v1293_v38  ;;  %v1431_v41 = vpop.f32.mrf.mxu3  ;;  %v1301_v48 = vadd.f32 %v1300_v25, %v1236_v47  ;;  %v7147_v25 = vand.u32 4294901760, %v1564_v21  ;;  %v7149_v26 = vand.u32 4294901760, %v1563_v22 }
 0x3ca   :  { %v1641_v38 = vand.u32 4294901760, %v7163_v31 }
 0x3cb   :  { %v1390_v45 = vadd.f32 %v1389_v37, %v1349_v40  ;;  %v1635_v37 = vand.u32 4294901760, %v7160_v30  ;;  %1822 = vmatpush.msrb.mxu1 %v7147_v25  ;;  %1575 = vmatpush.msra.mxu2 %v7147_v25 }
 0x3cd   :  { %v1432_v51 = vadd.f32 %v1431_v41, %v1390_v45  ;;  %1824 = vmatpush.msrb.mxu1 %v7149_v26  ;;  %1577 = vmatpush.msra.mxu2 %v7149_v26 }
 0x3cf   :  { %1826 = vmatpush.msrb.mxu1 %v7151_v27  ;;  %1579 = vmatpush.msra.mxu2 %v7151_v27 }
 0x3d0   :  { %v1308_v28 = vpop.f32.mrf.mxu0  ;;  %v1352_v29 = vpop.f32.mrf.mxu1 }
 0x3d1   :  { %v1394_v50 = vpop.f32.mrf.mxu2  ;;  %v1353_v52 = vadd.f32 %v1352_v29, %v1301_v48  ;;  %v1437_v54 = vpop.f32.mrf.mxu3  ;;  %v1309_v61 = vadd.f32 %v1308_v28, %v1241_v58  ;;  %v1561_v28 = vld [vmem:[%s7524_s7 + $0x48] sm:$0xff]  ;;  %v1560_v29 = vld [vmem:[%s7524_s7 + $0x40] sm:$0xff]  ;;  %v1559_v48 = vld [vmem:[%s7524_s7 + $0x38] sm:$0xff] }
 0x3d2   :  { %v7170_v33 = vand.u32 4294901760, %v1561_v28  ;;  %v7181_v36 = vand.u32 4294901760, %v1560_v29 }
 0x3d3   :  { %v1395_v56 = vadd.f32 %v1394_v50, %v1353_v52  ;;  %v1557_v50 = vld [vmem:[%s7524_s7 + $0x28] sm:$0xff] }
 0x3d4   :  { %v7208_v47 = vsub.f32 %v1560_v29, %v7181_v36  ;;  %1828 = vmatpush.msrb.mxu1 %v7170_v33  ;;  %1581 = vmatpush.msra.mxu2 %v7170_v33 }
 0x3d5   :  { %v1438_v63 = vadd.f32 %v1437_v54, %v1395_v56  ;;  %v1556_v56 = vld [vmem:[%s7524_s7 + $0x20] sm:$0xff] }
 0x3d6   :  { %1830 = vmatpush.msrb.mxu1 %v7181_v36  ;;  %1583 = vmatpush.msra.mxu2 %v7181_v36 }
 0x3d8   :  { %v1356_v34 = vpop.f32.mrf.mxu1  ;;  %v1473_v23 = vpop.f32.mrf.mxu0 }
 0x3d9   :  { %v1474_v42 = vadd.f32 %v1473_v23, %v1426_v39  ;;  %v1357_v0 = vadd.f32 %v1356_v34, %v1309_v61  ;;  %v1399_v1 = vpop.f32.mrf.mxu2  ;;  %v1443_v60 = vpop.f32.mrf.mxu3  ;;  %v7173_v34 = vsub.f32 %v1564_v21, %v7147_v25  ;;  %v7176_v23 = vsub.f32 %v1563_v22, %v7149_v26 }
 0x3da   :  { %v1647_v39 = vand.u32 4294901760, %v7166_v32 }
 0x3db   :  { %v1400_v4 = vadd.f32 %v1399_v1, %v1357_v0  ;;  %v1653_v40 = vand.u32 4294901760, %v7173_v34  ;;  %v1659_v41 = vand.u32 4294901760, %v7176_v23  ;;  %1757 = vmatpush.msrb.mxu0 %v7173_v34  ;;  %v1677_v1 = vand.u32 4294901760, %v7208_v47 }
 0x3dc   :  { %v1648_v45 = vsub.f32 %v7166_v32, %v1647_v39 }
 0x3dd   :  { %v1444_v8 = vadd.f32 %v1443_v60, %v1400_v4  ;;  %v1660_v54 = vsub.f32 %v7176_v23, %v1659_v41  ;;  %1760 = vmatpush.msrb.mxu0 %v7176_v23  ;;  %v1678_v21 = vsub.f32 %v7208_v47, %v1677_v1 }
 0x3de   :  { %v1649_v58 = vand.u32 4294901760, %v1648_v45 }
 0x3df   :  { %v1661_v15 = vand.u32 4294901760, %v1660_v54  ;;  %1763 = vmatpush.msrb.mxu0 %v7179_v35 }
 0x3e0   :  { %v1477_v43 = vpop.f32.mrf.mxu0  ;;  %v1509_v44 = vpop.f32.mrf.mxu1 }
 0x3e1   :  { %v1510_v46 = vadd.f32 %v1509_v44, %v1474_v42  ;;  %v1478_v53 = vadd.f32 %v1477_v43, %v1432_v51  ;;  %v7192_v42 = vsub.f32 %v1561_v28, %v7170_v33  ;;  %v1636_v43 = vsub.f32 %v7160_v30, %v1635_v37 }
 0x3e2   :  { %v1642_v44 = vsub.f32 %v7163_v31, %v1641_v38 }
 0x3e3   :  { %v1524_v49 = vmax.f32 %v1510_v46, 0.0  ;;  %v1665_v46 = vand.u32 4294901760, %v7179_v35  ;;  %v1637_v51 = vand.u32 4294901760, %v1636_v43  ;;  %1766 = vmatpush.msrb.mxu0 %v7192_v42 }
 0x3e4   :  { %v1643_v52 = vand.u32 4294901760, %v1642_v44 }
 0x3e5   :  { %1528 = vrot.lane.b32.xlu2 %v1524_v49, %s6621_s28  ;;  %1638 = vmatpush.msra.mxu3 %v1637_v51  ;;  %v1666_v0 = vsub.f32 %v7179_v35, %v1665_v46 }
 0x3e6   :  { %1769 = vmatpush.msrb.mxu0 %v7208_v47 }
 0x3e7   :  { %1644 = vmatpush.msra.mxu3 %v1643_v52  ;;  %v1667_v17 = vand.u32 4294901760, %v1666_v0 }
 0x3e8   :  { %v1513_v55 = vpop.f32.mrf.mxu1  ;;  %v1481_v59 = vpop.f32.mrf.mxu0 }
 0x3e9   :  { %v7101_v57 = vadd.f32 %v1513_v55, %v1478_v53  ;;  %v1482_v2 = vadd.f32 %v1481_v59, %v1438_v63  ;;  %v1654_v53 = vsub.f32 %v7173_v34, %v1653_v40  ;;  %v1671_v55 = vand.u32 4294901760, %v7192_v42  ;;  %1650 = vmatpush.msra.mxu3 %v1649_v58 }
 0x3ea   :  { %v7233_v59 = vand.u32 4294901760, %v1559_v48  ;;  %v7237_v63 = vand.u32 4294901760, %v1557_v50 }
 0x3eb   :  { %v1525_v62 = vmax.f32 %v7101_v57, 0.0  ;;  %v1655_v4 = vand.u32 4294901760, %v1654_v53 }
 0x3ec   :  { %v7250_v60 = vsub.f32 %v1559_v48, %v7233_v59  ;;  %1832 = vmatpush.msrb.mxu1 %v7233_v59  ;;  %1585 = vmatpush.msra.mxu2 %v7233_v59 }
 0x3ed   :  { %1530 = vrot.lane.b32.xlu0 %v1525_v62, %s6621_s28  ;;  %1656 = vmatpush.msra.mxu3 %v1655_v4 }
 0x3ee   :  { %1772 = vmatpush.msrb.mxu0 %v7250_v60 }
 0x3ef   :  { %1662 = vmatpush.msra.mxu3 %v1661_v15 }
 0x3f0   :  { %v1517_v3 = vpop.f32.mrf.mxu1  ;;  %v1485_v7 = vpop.f32.mrf.mxu0 }
 0x3f1   :  { %v7107_v5 = vadd.f32 %v1517_v3, %v1482_v2  ;;  %v1486_v9 = vadd.f32 %v1485_v7, %v1444_v8  ;;  %v1555_v2 = vld [vmem:[%s7524_s7 + $0x18] sm:$0xff]  ;;  %v7255_v8 = vand.u32 4294901760, %v1556_v56  ;;  %1668 = vmatpush.msra.mxu3 %v1667_v17 }
 0x3f2   :  { %v7274_v16 = vand.u32 4294901760, %v1555_v2 }
 0x3f3   :  { %v1526_v6 = vmax.f32 %v7107_v5, 0.0  ;;  %v7285_v24 = vsub.f32 %v1556_v56, %v7255_v8  ;;  %v1553_v5 = vld [vmem:[%s7524_s7 + $0x8] sm:$0xff] }
 0x3f4   :  { %v7297_v45 = vsub.f32 %v1555_v2, %v7274_v16 }
 0x3f5   :  { %1532 = vrot.lane.b32.xlu1 %v1526_v6, %s6621_s28  ;;  %v1701_v51 = vand.u32 4294901760, %v7285_v24 }
 0x3f6   :  { %v1707_v58 = vand.u32 4294901760, %v7297_v45 }
 0x3f8   :  { %v1521_v10 = vpop.f32.mrf.mxu1 }
 0x3f9   :  { %v7113_v11 = vadd.f32 %v1521_v10, %v1486_v9  ;;  %v1672_v10 = vsub.f32 %v7192_v42, %v1671_v55 }
 0x3fb   :  { %v1527_v12 = vmax.f32 %v7113_v11, 0.0  ;;  %v1683_v11 = vand.u32 4294901760, %v7250_v60  ;;  %v1673_v29 = vand.u32 4294901760, %v1672_v10 }
 0x3fd   :  { %1534 = vrot.lane.b32.xlu2 %v1527_v12, %s6621_s28  ;;  %v1684_v43 = vsub.f32 %v7250_v60, %v1683_v11  ;;  %1674 = vmatpush.msra.mxu3 %v1673_v29  ;;  %v1552_v29 = vld [vmem:[%s7524_s7] sm:$0xff] }
 0x3ff   :  { %v1685_v54 = vand.u32 4294901760, %v1684_v43 }
 0x43f   :  { %v1529_v13 = vpop.permute.xlu2 %1528 }
 0x440   :  { %v7119_v14 = vmax.f32 %v1524_v49, %v1529_v13  ;;  %v1558_v49 = vld [vmem:[%s7524_s7 + $0x30] sm:$0xff] }
 0x441   :  { %v7235_v61 = vand.u32 4294901760, %v1558_v49  ;;  %v1554_v13 = vld [vmem:[%s7524_s7 + $0x10] sm:$0xff] }
 0x442   :  { %1540 = vrot.lane.b32.xlu0 %v7119_v14, %s6618_s10  ;;  %v7287_v28 = vand.u32 4294901760, %v1554_v13 }
 0x443   :  { %v7253_v7 = vsub.f32 %v1558_v49, %v7235_v61  ;;  %v1679_v49 = vand.u32 4294901760, %v1678_v21  ;;  %1834 = vmatpush.msrb.mxu1 %v7235_v61  ;;  %1587 = vmatpush.msra.mxu2 %v7235_v61 }
 0x444   :  { %v7307_v52 = vsub.f32 %v1554_v13, %v7287_v28 }
 0x445   :  { %v1689_v22 = vand.u32 4294901760, %v7253_v7  ;;  %1775 = vmatpush.msrb.mxu0 %v7253_v7  ;;  %1836 = vmatpush.msrb.mxu1 %v7237_v63 }
 0x446   :  { %1680 = vmatpush.msra.mxu3 %v1679_v49  ;;  %v1713_v0 = vand.u32 4294901760, %v7307_v52  ;;  %1589 = vmatpush.msra.mxu2 %v7237_v63 }
 0x447   :  { %1838 = vmatpush.msrb.mxu1 %v7255_v8 }
 0x448   :  { %1686 = vmatpush.msra.mxu3 %v1685_v54  ;;  %v1714_v13 = vsub.f32 %v7307_v52, %v1713_v0  ;;  %1591 = vmatpush.msra.mxu2 %v7255_v8 }
 0x449   :  { %1840 = vmatpush.msrb.mxu1 %v7274_v16 }
 0x44a   :  { %1593 = vmatpush.msra.mxu2 %v7274_v16  ;;  %v1715_v21 = vand.u32 4294901760, %v1714_v13 }
 0x44b   :  { %1842 = vmatpush.msrb.mxu1 %v7287_v28 }
 0x44c   :  { %1595 = vmatpush.msra.mxu2 %v7287_v28 }
 0x457   :  { %v1535_v3 = vpop.permute.xlu2 %1534 }
 0x458   :  { %v7259_v9 = vmax.f32 %v1527_v12, %v1535_v3  ;;  %v7272_v12 = vsub.f32 %v1557_v50, %v7237_v63  ;;  %v1690_v50 = vsub.f32 %v7253_v7, %v1689_v22  ;;  %v1708_v3 = vsub.f32 %v7297_v45, %v1707_v58 }
 0x45a   :  { %1546 = vrot.lane.b32.xlu0 %v7259_v9, %s6618_s10  ;;  %v1695_v44 = vand.u32 4294901760, %v7272_v12  ;;  %v1691_v57 = vand.u32 4294901760, %v1690_v50  ;;  %1778 = vmatpush.msrb.mxu0 %v7272_v12  ;;  %v1709_v17 = vand.u32 4294901760, %v1708_v3 }
 0x45c   :  { %v1696_v56 = vsub.f32 %v7272_v12, %v1695_v44  ;;  %1781 = vmatpush.msrb.mxu0 %v7285_v24  ;;  %1692 = vmatpush.msra.mxu3 %v1691_v57 }
 0x45e   :  { %v1697_v2 = vand.u32 4294901760, %v1696_v56  ;;  %1784 = vmatpush.msrb.mxu0 %v7297_v45 }
 0x45f   :  { %v1531_v48 = vpop.permute.xlu0 %1530 }
 0x460   :  { %v7311_v53 = vmax.f32 %v1525_v62, %v1531_v48  ;;  %v1702_v62 = vsub.f32 %v7285_v24, %v1701_v51  ;;  %1698 = vmatpush.msra.mxu3 %v1697_v2  ;;  %1787 = vmatpush.msrb.mxu0 %v7307_v52  ;;  %v1598_v48 = vand.u32 4294901760, %v1552_v29 }
 0x462   :  { %1542 = vrot.lane.b32.xlu1 %v7311_v53, %s6618_s10  ;;  %v1703_v10 = vand.u32 4294901760, %v1702_v62  ;;  %v1724_v50 = vsub.f32 %v1552_v29, %v1598_v48 }
 0x464   :  { %1704 = vmatpush.msra.mxu3 %v1703_v10  ;;  %v1725_v56 = vand.u32 4294901760, %v1724_v50 }
 0x466   :  { %1710 = vmatpush.msra.mxu3 %v1709_v17  ;;  %v1726_v62 = vsub.f32 %v1724_v50, %v1725_v56 }
 0x467   :  { %v1533_v4 = vpop.permute.xlu1 %1532 }
 0x468   :  { %v7342_v15 = vmax.f32 %v1526_v6, %v1533_v4  ;;  %1716 = vmatpush.msra.mxu3 %v1715_v21  ;;  %v1596_v6 = vand.u32 4294901760, %v1553_v5  ;;  %v1727_v2 = vand.u32 4294901760, %v1726_v62 }
 0x46a   :  { %1544 = vrot.lane.b32.xlu2 %v7342_v15, %s6618_s10  ;;  %v1718_v43 = vsub.f32 %v1553_v5, %v1596_v6  ;;  %1844 = vmatpush.msrb.mxu1 %v1596_v6 }
 0x46b   :  { %1597 = vmatpush.msra.mxu2 %v1596_v6 }
 0x46c   :  { %v1719_v49 = vand.u32 4294901760, %v1718_v43  ;;  %1790 = vmatpush.msrb.mxu0 %v1718_v43  ;;  %1846 = vmatpush.msrb.mxu1 %v1598_v48 }
 0x46d   :  { %1599 = vmatpush.msra.mxu2 %v1598_v48 }
 0x46e   :  { %v1720_v54 = vsub.f32 %v1718_v43, %v1719_v49  ;;  %1793 = vmatpush.msrb.mxu0 %v1724_v50 }
 0x46f   :  { %1875 = vmatpush.msrb.mxu2 %v1635_v37 }
 0x470   :  { %v1721_v57 = vand.u32 4294901760, %v1720_v54 }
 0x471   :  { %1879 = vmatpush.msrb.mxu2 %v1641_v38 }
 0x472   :  { %1722 = vmatpush.msra.mxu3 %v1721_v57 }
 0x473   :  { %1883 = vmatpush.msrb.mxu2 %v1647_v39 }
 0x474   :  { %1728 = vmatpush.msra.mxu3 %v1727_v2 }
 0x475   :  { %1887 = vmatpush.msrb.mxu2 %v1653_v40 }
 0x476   :  { %1954 = vmatpush.msrb.mxu3 %v7132_v18 }
 0x477   :  { %1891 = vmatpush.msrb.mxu2 %v1659_v41 }
 0x478   :  { %1956 = vmatpush.msrb.mxu3 %v7134_v19 }
 0x479   :  { %1895 = vmatpush.msrb.mxu2 %v1665_v46 }
 0x47a   :  { %1958 = vmatpush.msrb.mxu3 %v7136_v20 }
 0x47b   :  { %1899 = vmatpush.msrb.mxu2 %v1671_v55 }
 0x47c   :  { %1960 = vmatpush.msrb.mxu3 %v7147_v25 }
 0x47d   :  { %1903 = vmatpush.msrb.mxu2 %v1677_v1 }
 0x47e   :  { %1962 = vmatpush.msrb.mxu3 %v7149_v26 }
 0x47f   :  { %1907 = vmatpush.msrb.mxu2 %v1683_v11 }
 0x480   :  { %1964 = vmatpush.msrb.mxu3 %v7151_v27 }
 0x481   :  { %1911 = vmatpush.msrb.mxu2 %v1689_v22 }
 0x482   :  { %1966 = vmatpush.msrb.mxu3 %v7170_v33 }
 0x483   :  { %1915 = vmatpush.msrb.mxu2 %v1695_v44 }
 0x484   :  { %1968 = vmatpush.msrb.mxu3 %v7181_v36 }
 0x485   :  { %1919 = vmatpush.msrb.mxu2 %v1701_v51 }
 0x486   :  { %1970 = vmatpush.msrb.mxu3 %v7233_v59 }
 0x487   :  { %1923 = vmatpush.msrb.mxu2 %v1707_v58 }
 0x488   :  { %1972 = vmatpush.msrb.mxu3 %v7235_v61 }
 0x489   :  { %1927 = vmatpush.msrb.mxu2 %v1713_v0 }
 0x48a   :  { %1974 = vmatpush.msrb.mxu3 %v7237_v63 }
 0x48b   :  { %1931 = vmatpush.msrb.mxu2 %v1719_v49 }
 0x48c   :  { %1976 = vmatpush.msrb.mxu3 %v7255_v8 }
 0x48d   :  { %1935 = vmatpush.msrb.mxu2 %v1725_v56 }
 0x48e   :  { %1978 = vmatpush.msrb.mxu3 %v7274_v16 }
 0x490   :  { %1980 = vmatpush.msrb.mxu3 %v7287_v28 }
 0x492   :  { %1982 = vmatpush.msrb.mxu3 %v1596_v6 }
 0x494   :  { %1984 = vmatpush.msrb.mxu3 %v1598_v48 }
 0x4b4   :  { %v1541_v18 = vpop.permute.xlu0 %1540 }
 0x4b5   :  { %v1548_v19 = vmax.f32 %v7119_v14, %v1541_v18 }
 0x4b7   :  { %v1600_v20 = vand.u32 4294901760, %v1548_v19 }
 0x4b9   :  { %v1601_v25 = vsub.f32 %v1548_v19, %v1600_v20  ;;  %1730 = vmatmul.f32.vlgmr.msra.gmra.mxu3 %v1600_v20 }
 0x4bb   :  { %v1602_v26 = vand.u32 4294901760, %v1601_v25  ;;  %1796 = vmatmul.f32.vlgmr.msrb.gmra.mxu0 %v1601_v25 }
 0x4bd   :  { %v1603_v27 = vsub.f32 %v1601_v25, %v1602_v26  ;;  %1850 = vmatmul.f32.vlgmr.msrb.gmra.mxu1 %v1602_v26 }
 0x4bf   :  { %v1604_v30 = vand.u32 4294901760, %v1603_v27 }
 0x4c1   :  { %1605 = vmatmul.f32.vlgmr.msra.gmra.mxu2 %v1604_v30 }
 0x4c4   :  { %v1545_v31 = vpop.permute.xlu2 %1544 }
 0x4c5   :  { %v1550_v32 = vmax.f32 %v7342_v15, %v1545_v31 }
 0x4c7   :  { %v1616_v14 = vand.u32 4294901760, %v1550_v32 }
 0x4c9   :  { %v1617_v37 = vsub.f32 %v1550_v32, %v1616_v14 }
 0x4cb   :  { %v1618_v46 = vand.u32 4294901760, %v1617_v37 }
 0x4cc   :  { %v1547_v35 = vpop.permute.xlu0 %1546 }
 0x4cd   :  { %v1551_v38 = vmax.f32 %v7259_v9, %v1547_v35  ;;  %v1619_v55 = vsub.f32 %v1617_v37, %v1618_v46 }
 0x4cf   :  { %v1624_v41 = vand.u32 4294901760, %v1551_v38  ;;  %v1620_v59 = vand.u32 4294901760, %v1619_v55 }
 0x4d1   :  { %v1625_v47 = vsub.f32 %v1551_v38, %v1624_v41 }
 0x4d3   :  { %v1626_v61 = vand.u32 4294901760, %v1625_v47 }
 0x4d4   :  { %v1543_v33 = vpop.permute.xlu1 %1542 }
 0x4d5   :  { %v1549_v34 = vmax.f32 %v7311_v53, %v1543_v33  ;;  %v1627_v63 = vsub.f32 %v1625_v47, %v1626_v61 }
 0x4d7   :  { %v1608_v23 = vand.u32 4294901760, %v1549_v34  ;;  %v1628_v1 = vand.u32 4294901760, %v1627_v63 }
 0x4d9   :  { %v1609_v36 = vsub.f32 %v1549_v34, %v1608_v23  ;;  %1734 = vmatmul.f32.gmra.mxu3 %v1608_v23 }
 0x4db   :  { %1801 = vmatmul.f32.gmra.mxu0 %v1609_v36  ;;  %v1610_v39 = vand.u32 4294901760, %v1609_v36 }
 0x4dd   :  { %1856 = vmatmul.f32.gmra.mxu1 %v1610_v39  ;;  %v1611_v40 = vsub.f32 %v1609_v36, %v1610_v39 }
 0x4df   :  { %v1612_v42 = vand.u32 4294901760, %v1611_v40 }
 0x4e1   :  { %1613 = vmatmul.f32.gmra.mxu2 %v1612_v42  ;;  %1738 = vmatmul.f32.gmra.mxu3 %v1616_v14 }
 0x4e3   :  { %1806 = vmatmul.f32.gmra.mxu0 %v1617_v37 }
 0x4e5   :  { %1862 = vmatmul.f32.gmra.mxu1 %v1618_v46 }
 0x4e9   :  { %1621 = vmatmul.f32.gmra.mxu2 %v1620_v59  ;;  %1742 = vmatmul.f32.gmra.mxu3 %v1624_v41 }
 0x4eb   :  { %1811 = vmatmul.f32.gmra.mxu0 %v1625_v47 }
 0x4ed   :  { %1868 = vmatmul.f32.gmra.mxu1 %v1626_v61 }
 0x4f1   :  { %1629 = vmatmul.f32.gmra.mxu2 %v1628_v1  ;;  %1986 = vmatmul.f32.vlgmr.msrb.gmra.mxu3 %v1600_v20 }
 0x4f9   :  { %1937 = vmatmul.f32.vlgmr.msrb.gmra.mxu2 %v1600_v20  ;;  %1990 = vmatmul.f32.gmra.mxu3 %v1608_v23 }
 0x501   :  { %1941 = vmatmul.f32.gmra.mxu2 %v1608_v23  ;;  %1994 = vmatmul.f32.gmra.mxu3 %v1616_v14 }
 0x509   :  { %1945 = vmatmul.f32.gmra.mxu2 %v1616_v14  ;;  %1998 = vmatmul.f32.gmra.mxu3 %v1624_v41 }
 0x511   :  { %1949 = vmatmul.f32.gmra.mxu2 %v1624_v41 }
 0x538   :  { %v1797_v22 = vpop.f32.mrf.mxu0 }
 0x53a   :  { %v1851_v28 = vpop.f32.mrf.mxu1 }
 0x53c   :  { %v1731_v60 = vpop.f32.mrf.mxu3 }
 0x544   :  { %v1606_v7 = vpop.f32.mrf.mxu2 }
 0x545   :  { %v1732_v44 = vadd.f32 %v1731_v60, %v1606_v7 }
 0x547   :  { %v1798_v52 = vadd.f32 %v1797_v22, %v1732_v44 }
 0x549   :  { %v1852_v4 = vadd.f32 %v1851_v28, %v1798_v52 }
 0x558   :  { %v1802_v51 = vpop.f32.mrf.mxu0 }
 0x55a   :  { %v1857_v0 = vpop.f32.mrf.mxu1 }
 0x55c   :  { %v1735_v8 = vpop.f32.mrf.mxu3 }
 0x560   :  { %v1807_v17 = vpop.f32.mrf.mxu0 }
 0x562   :  { %v1863_v48 = vpop.f32.mrf.mxu1 }
 0x564   :  { %v1614_v9 = vpop.f32.mrf.mxu2  ;;  %v1739_v11 = vpop.f32.mrf.mxu3 }
 0x565   :  { %v1736_v53 = vadd.f32 %v1735_v8, %v1614_v9 }
 0x567   :  { %v1803_v3 = vadd.f32 %v1802_v51, %v1736_v53 }
 0x568   :  { %v1812_v25 = vpop.f32.mrf.mxu0 }
 0x569   :  { %v1858_v15 = vadd.f32 %v1857_v0, %v1803_v3 }
 0x56a   :  { %v1869_v31 = vpop.f32.mrf.mxu1 }
 0x56c   :  { %v1622_v12 = vpop.f32.mrf.mxu2  ;;  %v1743_v16 = vpop.f32.mrf.mxu3 }
 0x56d   :  { %v1740_v29 = vadd.f32 %v1739_v11, %v1622_v12 }
 0x56f   :  { %v1808_v57 = vadd.f32 %v1807_v17, %v1740_v29 }
 0x571   :  { %v1864_v26 = vadd.f32 %v1863_v48, %v1808_v57 }
 0x574   :  { %v1630_v24 = vpop.f32.mrf.mxu2  ;;  %v1987_v45 = vpop.f32.mrf.mxu3 }
 0x575   :  { %v1744_v62 = vadd.f32 %v1743_v16, %v1630_v24 }
 0x577   :  { %v1813_v27 = vadd.f32 %v1812_v25, %v1744_v62 }
 0x579   :  { %v1870_v32 = vadd.f32 %v1869_v31, %v1813_v27 }
 0x57c   :  { %v1938_v58 = vpop.f32.mrf.mxu2  ;;  %v1991_v13 = vpop.f32.mrf.mxu3 }
 0x57d   :  { %v1939_v10 = vadd.f32 %v1938_v58, %v1852_v4 }
 0x57f   :  { %v1988_v5 = vadd.f32 %v1987_v45, %v1939_v10 }
 0x581   :  { %v2007_v49 = vrot.slane %v1988_v5, 4  ;;  %v2003_v54 = vrot.slane %v1988_v5, 2  ;;  %v2011_v59 = vrot.slane %v1988_v5, 6 }
 0x584   :  { %v1942_v21 = vpop.f32.mrf.mxu2  ;;  %v1995_v19 = vpop.f32.mrf.mxu3 }
 0x585   :  { %v1943_v6 = vadd.f32 %v1942_v21, %v1858_v15 }
 0x587   :  { %v1992_v43 = vadd.f32 %v1991_v13, %v1943_v6 }
 0x589   :  { %v2020_v50 = vrot.slane %v1992_v43, 4  ;;  %v2016_v56 = vrot.slane %v1992_v43, 2  ;;  %v2024_v55 = vrot.slane %v1992_v43, 6 }
 0x58b   :  { %v6554_v2 = vpack.i.bf16 %v2020_v50, %v2007_v49  ;;  %v6549_v18 = vpack.i.bf16 %v2016_v56, %v2003_v54  ;;  %v6569_v61 = vpack.i.bf16 %v2024_v55, %v2011_v59 }
 0x58c   :  { %v1946_v20 = vpop.f32.mrf.mxu2  ;;  %v1999_v23 = vpop.f32.mrf.mxu3 }
 0x58d   :  { %6555 = vrot.lane.b32.xlu0 %v6554_v2, %s6617_s13  ;;  %6550 = vrot.lane.b32.xlu1 %v6549_v18, %s6614_s24  ;;  %v1947_v30 = vadd.f32 %v1946_v20, %v1864_v26 }
 0x58f   :  { %v1996_v33 = vadd.f32 %v1995_v19, %v1947_v30 }
 0x591   :  { %v2037_v36 = vrot.slane %v1996_v33, 6  ;;  %v2033_v37 = vrot.slane %v1996_v33, 4  ;;  %v2029_v40 = vrot.slane %v1996_v33, 2 }
 0x594   :  { %v1950_v34 = vpop.f32.mrf.mxu2 }
 0x595   :  { %v1951_v14 = vadd.f32 %v1950_v34, %v1870_v32 }
 0x597   :  { %v2000_v35 = vadd.f32 %v1999_v23, %v1951_v14 }
 0x599   :  { %v2050_v38 = vrot.slane %v2000_v35, 6  ;;  %v2046_v39 = vrot.slane %v2000_v35, 4  ;;  %v2042_v41 = vrot.slane %v2000_v35, 2 }
 0x59b   :  { %v6574_v42 = vpack.i.bf16 %v2050_v38, %v2037_v36  ;;  %v6564_v46 = vpack.i.bf16 %v2046_v39, %v2033_v37  ;;  %v6559_v47 = vpack.i.bf16 %v2042_v41, %v2029_v40 }
 0x59d   :  { %6575 = vrot.lane.b32.xlu0 %v6574_v42, %s6619_s26  ;;  %6565 = vrot.lane.b32.xlu1 %v6564_v46, %s6617_s13 }
 0x59e   :  { %6560 = vrot.lane.b32.xlu2 %v6559_v47, %s6614_s24 }
 0x5a6   :  { %6570 = vrot.lane.b32.xlu2 %v6569_v61, %s6619_s26 }
 0x5f8   :  { %v6561_v63 = vpop.permute.xlu2 %6560 }
 0x5f9   :  { %v6563_v0 = vunpack.i.h.bf16 %v6561_v63  ;;  %v6562_v3 = vunpack.i.l.bf16 %v6561_v63 }
 0x5fb   :  { %v2060_v6 = vsel %vm938_vm10, %v1996_v33, %v6562_v3 }
 0x5ff   :  { %v6556_v1 = vpop.permute.xlu0 %6555  ;;  %v6551_v60 = vpop.permute.xlu1 %6550 }
 0x600   :  { %v6558_v7 = vunpack.i.h.bf16 %v6556_v1  ;;  %v6557_v8 = vunpack.i.l.bf16 %v6556_v1  ;;  %v6553_v9 = vunpack.i.h.bf16 %v6551_v60  ;;  %v6552_v11 = vunpack.i.l.bf16 %v6551_v60  ;;  %v6571_v12 = vpop.permute.xlu2 %6570 }
 0x601   :  { %v6573_v24 = vunpack.i.h.bf16 %v6571_v12  ;;  %v6572_v28 = vunpack.i.l.bf16 %v6571_v12 }
 0x602   :  { %v2057_v16 = vsel %vm938_vm10, %v1992_v43, %v6553_v9  ;;  %v2054_v22 = vsel %vm938_vm10, %v1988_v5, %v6552_v11  ;;  %v2063_v5 = vsel %vm938_vm10, %v2000_v35, %v6563_v0 }
 0x603   :  { %v2055_v44 = vsel %vm942_vm12, %v2054_v22, %v6557_v8  ;;  %v2058_v45 = vsel %vm942_vm12, %v2057_v16, %v6558_v7 }
 0x604   :  { %v2059_v51 = vsel %vm946_vm13, %v2058_v45, %v6573_v24  ;;  %v2056_v52 = vsel %vm946_vm13, %v2055_v44, %v6572_v28 }
 0x605   :  { %v7415_v53 = vpack.c.bf16 %v2059_v51, %v2059_v51  ;;  %v7417_v58 = vpack.c.bf16 %v2056_v52, %v2056_v52 }
 0x60f   :  { %v6576_v4 = vpop.permute.xlu0 %6575  ;;  %v6566_v10 = vpop.permute.xlu1 %6565 }
 0x610   :  { %v6578_v13 = vunpack.i.h.bf16 %v6576_v4  ;;  %v6577_v15 = vunpack.i.l.bf16 %v6576_v4  ;;  %v6568_v17 = vunpack.i.h.bf16 %v6566_v10  ;;  %v6567_v21 = vunpack.i.l.bf16 %v6566_v10 }
 0x612   :  { %v2061_v29 = vsel %vm942_vm12, %v2060_v6, %v6567_v21  ;;  %v2064_v43 = vsel %vm942_vm12, %v2063_v5, %v6568_v17 }
 0x613   :  { %v2062_v48 = vsel %vm946_vm13, %v2061_v29, %v6577_v15  ;;  %v2065_v49 = vsel %vm946_vm13, %v2064_v43, %v6578_v13 }
 0x614   :  { %v7425_v50 = vpack.c.bf16 %v2062_v48, %v2062_v48  ;;  %v7427_v54 = vpack.c.bf16 %v2065_v49, %v2065_v49 }
 0x615   :  { %6606 = dma.done.wait [#allocation4], 32768 }
 0x616   :  { %6607 = vsyncadd [#allocation4], 4294934528  ;;  %v5154_v56 = vld [vmem:[#allocation2 + $0x1c0] sm:$0xf] }
 0x617   :  { %v6270_v57 = vld [vmem:[#allocation2 + $0x1dc] sm:$0xf0] }
 0x618   :  { %v5410_v62 = vld [vmem:[#allocation2 + $0x3c0] sm:$0xf]  ;;  %v5155_v2 = vor.u32 %v6270_v57, %v5154_v56 }
 0x619   :  { %v6334_v18 = vld [vmem:[#allocation2 + $0x3dc] sm:$0xf0] }
 0x61a   :  { %v5666_v19 = vld [vmem:[#allocation2 + $0x5c0] sm:$0xf]  ;;  %v5411_v25 = vor.u32 %v6334_v18, %v5410_v62  ;;  %3628 = vmatpush.bf16.msra.mxu0 %v5155_v2 }
 0x61b   :  { %v6398_v20 = vld [vmem:[#allocation2 + $0x5dc] sm:$0xf0] }
 0x61c   :  { %v5667_v26 = vor.u32 %v6398_v20, %v5666_v19  ;;  %v5922_v27 = vld [vmem:[#allocation2 + $0x7c0] sm:$0xf]  ;;  %3641 = vmatpush.bf16.msra.mxu1 %v5411_v25 }
 0x61d   :  { %v6462_v30 = vld [vmem:[#allocation2 + $0x7dc] sm:$0xf0] }
 0x61e   :  { %v5122_v31 = vld [vmem:[#allocation2 + $0x180] sm:$0xf]  ;;  %v5923_v32 = vor.u32 %v6462_v30, %v5922_v27  ;;  %3654 = vmatpush.bf16.msra.mxu2 %v5667_v26 }
 0x61f   :  { %v6262_v33 = vld [vmem:[#allocation2 + $0x19c] sm:$0xf0] }
 0x620   :  { %v5378_v34 = vld [vmem:[#allocation2 + $0x380] sm:$0xf]  ;;  %v5123_v23 = vor.u32 %v6262_v33, %v5122_v31  ;;  %3667 = vmatpush.bf16.msra.mxu3 %v5923_v32 }
 0x621   :  { %v6326_v14 = vld [vmem:[#allocation2 + $0x39c] sm:$0xf0] }
 0x622   :  { %v5379_v35 = vor.u32 %v6326_v14, %v5378_v34  ;;  %v5634_v36 = vld [vmem:[#allocation2 + $0x580] sm:$0xf]  ;;  %3629 = vmatpush.bf16.msra.mxu0 %v5123_v23 }
 0x623   :  { %v6390_v37 = vld [vmem:[#allocation2 + $0x59c] sm:$0xf0] }
 0x624   :  { %v5890_v38 = vld [vmem:[#allocation2 + $0x780] sm:$0xf]  ;;  %v5635_v39 = vor.u32 %v6390_v37, %v5634_v36  ;;  %3642 = vmatpush.bf16.msra.mxu1 %v5379_v35 }
 0x625   :  { %v6454_v40 = vld [vmem:[#allocation2 + $0x79c] sm:$0xf0] }
 0x626   :  { %v5090_v41 = vld [vmem:[#allocation2 + $0x140] sm:$0xf]  ;;  %v5891_v46 = vor.u32 %v6454_v40, %v5890_v38  ;;  %3655 = vmatpush.bf16.msra.mxu2 %v5635_v39 }
 0x627   :  { %v6254_v42 = vld [vmem:[#allocation2 + $0x15c] sm:$0xf0] }
 0x628   :  { %v5346_v47 = vld [vmem:[#allocation2 + $0x340] sm:$0xf]  ;;  %v5091_v61 = vor.u32 %v6254_v42, %v5090_v41  ;;  %3668 = vmatpush.bf16.msra.mxu3 %v5891_v46 }
 0x629   :  { %v6318_v55 = vld [vmem:[#allocation2 + $0x35c] sm:$0xf0] }
 0x62a   :  { %v5602_v59 = vld [vmem:[#allocation2 + $0x540] sm:$0xf]  ;;  %v5347_v7 = vor.u32 %v6318_v55, %v5346_v47  ;;  %3630 = vmatpush.bf16.msra.mxu0 %v5091_v61 }
 0x62b   :  { %v6382_v63 = vld [vmem:[#allocation2 + $0x55c] sm:$0xf0] }
 0x62c   :  { %v5858_v1 = vld [vmem:[#allocation2 + $0x740] sm:$0xf]  ;;  %v5603_v8 = vor.u32 %v6382_v63, %v5602_v59  ;;  %3643 = vmatpush.bf16.msra.mxu1 %v5347_v7  ;;  %v5156_v7 = vld [vmem:[#allocation2 + $0x1e0] sm:$0xf0] }
 0x62d   :  { %v6446_v60 = vld [vmem:[#allocation2 + $0x75c] sm:$0xf0] }
 0x62e   :  { %v5058_v9 = vld [vmem:[#allocation2 + $0x100] sm:$0xf]  ;;  %v5859_v16 = vor.u32 %v6446_v60, %v5858_v1  ;;  %3656 = vmatpush.bf16.msra.mxu2 %v5603_v8  ;;  %v6266_v60 = vld [vmem:[#allocation2 + $0x1c4] sm:$0xf] }
 0x62f   :  { %v6246_v11 = vld [vmem:[#allocation2 + $0x11c] sm:$0xf0]  ;;  %v6330_v8 = vld [vmem:[#allocation2 + $0x3c4] sm:$0xf] }
 0x630   :  { %v5314_v12 = vld [vmem:[#allocation2 + $0x300] sm:$0xf]  ;;  %v5059_v51 = vor.u32 %v6246_v11, %v5058_v9  ;;  %3669 = vmatpush.bf16.msra.mxu3 %v5859_v16  ;;  %v5412_v11 = vld [vmem:[#allocation2 + $0x3e0] sm:$0xf0] }
 0x631   :  { %v6310_v22 = vld [vmem:[#allocation2 + $0x31c] sm:$0xf0]  ;;  %v5668_v16 = vld [vmem:[#allocation2 + $0x5e0] sm:$0xf0] }
 0x632   :  { %v5570_v24 = vld [vmem:[#allocation2 + $0x500] sm:$0xf]  ;;  %v5315_v52 = vor.u32 %v6310_v22, %v5314_v12  ;;  %3631 = vmatpush.bf16.msra.mxu0 %v5059_v51  ;;  %v6394_v12 = vld [vmem:[#allocation2 + $0x5c4] sm:$0xf]  ;;  %v5159_v51 = vor.u32 %v6266_v60, %v5156_v7 }
 0x633   :  { %v6374_v28 = vld [vmem:[#allocation2 + $0x51c] sm:$0xf0] }
 0x634   :  { %v5826_v44 = vld [vmem:[#allocation2 + $0x700] sm:$0xf]  ;;  %v5571_v0 = vor.u32 %v6374_v28, %v5570_v24  ;;  %3644 = vmatpush.bf16.msra.mxu1 %v5315_v52  ;;  %v6458_v28 = vld [vmem:[#allocation2 + $0x7c4] sm:$0xf]  ;;  %v5415_v52 = vor.u32 %v6330_v8, %v5412_v11 }
 0x635   :  { %v6438_v45 = vld [vmem:[#allocation2 + $0x71c] sm:$0xf0]  ;;  %v4996_v11 = vld [vmem:[#allocation2 + $0xa0] sm:$0xf0] }
 0x636   :  { %v5026_v3 = vld [vmem:[#allocation2 + $0xc0] sm:$0xf]  ;;  %v5827_v13 = vor.u32 %v6438_v45, %v5826_v44  ;;  %3657 = vmatpush.bf16.msra.mxu2 %v5571_v0  ;;  %v5924_v44 = vld [vmem:[#allocation2 + $0x7e0] sm:$0xf0]  ;;  %v5671_v0 = vor.u32 %v6394_v12, %v5668_v16 }
 0x637   :  { %v6238_v4 = vld [vmem:[#allocation2 + $0xdc] sm:$0xf0]  ;;  %v6290_v12 = vld [vmem:[#allocation2 + $0x284] sm:$0xf] }
 0x638   :  { %v5282_v10 = vld [vmem:[#allocation2 + $0x2c0] sm:$0xf]  ;;  %v5027_v29 = vor.u32 %v6238_v4, %v5026_v3  ;;  %3670 = vmatpush.bf16.msra.mxu3 %v5827_v13  ;;  %v6258_v3 = vld [vmem:[#allocation2 + $0x184] sm:$0xf]  ;;  %v5927_v13 = vor.u32 %v6458_v28, %v5924_v44 }
 0x639   :  { %v6302_v15 = vld [vmem:[#allocation2 + $0x2dc] sm:$0xf0]  ;;  %v5124_v4 = vld [vmem:[#allocation2 + $0x1a0] sm:$0xf0] }
 0x63a   :  { %v5538_v17 = vld [vmem:[#allocation2 + $0x4c0] sm:$0xf]  ;;  %v5283_v43 = vor.u32 %v6302_v15, %v5282_v10  ;;  %3632 = vmatpush.bf16.msra.mxu0 %v5027_v29  ;;  %v6322_v10 = vld [vmem:[#allocation2 + $0x384] sm:$0xf]  ;;  %v5127_v29 = vor.u32 %v6258_v3, %v5124_v4 }
 0x63b   :  { %v6366_v21 = vld [vmem:[#allocation2 + $0x4dc] sm:$0xf0]  ;;  %v5380_v15 = vld [vmem:[#allocation2 + $0x3a0] sm:$0xf0] }
 0x63c   :  { %v5794_v5 = vld [vmem:[#allocation2 + $0x6c0] sm:$0xf]  ;;  %v5539_v48 = vor.u32 %v6366_v21, %v5538_v17  ;;  %3645 = vmatpush.bf16.msra.mxu1 %v5283_v43  ;;  %v6386_v17 = vld [vmem:[#allocation2 + $0x584] sm:$0xf]  ;;  %v5383_v43 = vor.u32 %v6322_v10, %v5380_v15 }
 0x63d   :  { %v6430_v6 = vld [vmem:[#allocation2 + $0x6dc] sm:$0xf0]  ;;  %v5636_v21 = vld [vmem:[#allocation2 + $0x5a0] sm:$0xf0] }
 0x63e   :  { %v4994_v49 = vld [vmem:[#allocation2 + $0x80] sm:$0xf]  ;;  %v5795_v62 = vor.u32 %v6430_v6, %v5794_v5  ;;  %3658 = vmatpush.bf16.msra.mxu2 %v5539_v48  ;;  %v6450_v5 = vld [vmem:[#allocation2 + $0x784] sm:$0xf]  ;;  %v5639_v48 = vor.u32 %v6386_v17, %v5636_v21 }
 0x63f   :  { %v6230_v56 = vld [vmem:[#allocation2 + $0x9c] sm:$0xf0]  ;;  %v5892_v6 = vld [vmem:[#allocation2 + $0x7a0] sm:$0xf0] }
 0x640   :  { %v5250_v57 = vld [vmem:[#allocation2 + $0x280] sm:$0xf]  ;;  %v4995_v26 = vor.u32 %v6230_v56, %v4994_v49  ;;  %3671 = vmatpush.bf16.msra.mxu3 %v5795_v62  ;;  %v6250_v49 = vld [vmem:[#allocation2 + $0x144] sm:$0xf]  ;;  %v5895_v62 = vor.u32 %v6450_v5, %v5892_v6 }
 0x641   :  { %v6294_v2 = vld [vmem:[#allocation2 + $0x29c] sm:$0xf0]  ;;  %v5092_v56 = vld [vmem:[#allocation2 + $0x160] sm:$0xf0] }
 0x642   :  { %v5506_v18 = vld [vmem:[#allocation2 + $0x480] sm:$0xf]  ;;  %v5251_v27 = vor.u32 %v6294_v2, %v5250_v57  ;;  %3633 = vmatpush.bf16.msra.mxu0 %v4995_v26  ;;  %v6314_v57 = vld [vmem:[#allocation2 + $0x344] sm:$0xf]  ;;  %v5095_v26 = vor.u32 %v6250_v49, %v5092_v56 }
 0x643   :  { %v6358_v19 = vld [vmem:[#allocation2 + $0x49c] sm:$0xf0]  ;;  %v5348_v2 = vld [vmem:[#allocation2 + $0x360] sm:$0xf0] }
 0x644   :  { %v5762_v20 = vld [vmem:[#allocation2 + $0x680] sm:$0xf]  ;;  %v5507_v30 = vor.u32 %v6358_v19, %v5506_v18  ;;  %3646 = vmatpush.bf16.msra.mxu1 %v5251_v27  ;;  %v6378_v18 = vld [vmem:[#allocation2 + $0x544] sm:$0xf]  ;;  %v5351_v27 = vor.u32 %v6314_v57, %v5348_v2 }
 0x645   :  { %v6422_v25 = vld [vmem:[#allocation2 + $0x69c] sm:$0xf0]  ;;  %v5604_v19 = vld [vmem:[#allocation2 + $0x560] sm:$0xf0] }
 0x646   :  { %v4962_v31 = vld [vmem:[#allocation2 + $0x40] sm:$0xf]  ;;  %v5763_v34 = vor.u32 %v6422_v25, %v5762_v20  ;;  %3659 = vmatpush.bf16.msra.mxu2 %v5507_v30  ;;  %v6442_v20 = vld [vmem:[#allocation2 + $0x744] sm:$0xf]  ;;  %v5607_v30 = vor.u32 %v6378_v18, %v5604_v19 }
 0x647   :  { %v6222_v32 = vld [vmem:[#allocation2 + $0x5c] sm:$0xf0]  ;;  %v5860_v25 = vld [vmem:[#allocation2 + $0x760] sm:$0xf0] }
 0x648   :  { %v5218_v33 = vld [vmem:[#allocation2 + $0x240] sm:$0xf]  ;;  %v4963_v38 = vor.u32 %v6222_v32, %v4962_v31  ;;  %3672 = vmatpush.bf16.msra.mxu3 %v5763_v34  ;;  %v6242_v31 = vld [vmem:[#allocation2 + $0x104] sm:$0xf]  ;;  %v5863_v34 = vor.u32 %v6442_v20, %v5860_v25 }
 0x649   :  { %v6286_v14 = vld [vmem:[#allocation2 + $0x25c] sm:$0xf0]  ;;  %v5060_v32 = vld [vmem:[#allocation2 + $0x120] sm:$0xf0] }
 0x64a   :  { %v5474_v23 = vld [vmem:[#allocation2 + $0x440] sm:$0xf]  ;;  %v5219_v41 = vor.u32 %v6286_v14, %v5218_v33  ;;  %3634 = vmatpush.bf16.msra.mxu0 %v4963_v38  ;;  %v6306_v33 = vld [vmem:[#allocation2 + $0x304] sm:$0xf]  ;;  %v5063_v38 = vor.u32 %v6242_v31, %v5060_v32  ;;  %v6335_v32 = vld [vmem:[#allocation2 + $0x3e4] sm:$0xf0] }
 0x64b   :  { %v6350_v35 = vld [vmem:[#allocation2 + $0x45c] sm:$0xf0]  ;;  %v5316_v14 = vld [vmem:[#allocation2 + $0x320] sm:$0xf0] }
 0x64c   :  { %v5730_v36 = vld [vmem:[#allocation2 + $0x640] sm:$0xf]  ;;  %v5475_v42 = vor.u32 %v6350_v35, %v5474_v23  ;;  %3647 = vmatpush.bf16.msra.mxu1 %v5219_v41  ;;  %v6370_v23 = vld [vmem:[#allocation2 + $0x504] sm:$0xf] }
 0x64d   :  { %v6414_v37 = vld [vmem:[#allocation2 + $0x65c] sm:$0xf0]  ;;  %v5572_v35 = vld [vmem:[#allocation2 + $0x520] sm:$0xf0] }
 0x64e   :  { %v4930_v39 = vld [vmem:[#allocation2] sm:$0xf]  ;;  %v5731_v59 = vor.u32 %v6414_v37, %v5730_v36  ;;  %3660 = vmatpush.bf16.msra.mxu2 %v5475_v42  ;;  %v6434_v36 = vld [vmem:[#allocation2 + $0x704] sm:$0xf] }
 0x64f   :  { %v6214_v40 = vld [vmem:[#allocation2 + $0x1c] sm:$0xf0]  ;;  %v5828_v37 = vld [vmem:[#allocation2 + $0x720] sm:$0xf0] }
 0x650   :  { %v5186_v46 = vld [vmem:[#allocation2 + $0x200] sm:$0xf]  ;;  %v4931_v9 = vor.u32 %v6214_v40, %v4930_v39  ;;  %3673 = vmatpush.bf16.msra.mxu3 %v5731_v59  ;;  %v5319_v39 = vor.u32 %v6306_v33, %v5316_v14  ;;  %v5575_v40 = vor.u32 %v6370_v23, %v5572_v35  ;;  %v6234_v41 = vld [vmem:[#allocation2 + $0xc4] sm:$0xf]  ;;  %v5674_v33 = vld [vmem:[#allocation2 + $0x5c8] sm:$0xf] }
 0x651   :  { %v6278_v47 = vld [vmem:[#allocation2 + $0x21c] sm:$0xf0]  ;;  %v5028_v42 = vld [vmem:[#allocation2 + $0xe0] sm:$0xf0]  ;;  %v5930_v35 = vld [vmem:[#allocation2 + $0x7c8] sm:$0xf] }
 0x652   :  { %v5442_v55 = vld [vmem:[#allocation2 + $0x400] sm:$0xf]  ;;  %v5187_v22 = vor.u32 %v6278_v47, %v5186_v46  ;;  %3635 = vmatpush.bf16.msra.mxu0 %v4931_v9  ;;  %v6298_v46 = vld [vmem:[#allocation2 + $0x2c4] sm:$0xf]  ;;  %v5831_v47 = vor.u32 %v6434_v36, %v5828_v37  ;;  %v5031_v60 = vor.u32 %v6234_v41, %v5028_v42  ;;  %v6463_v36 = vld [vmem:[#allocation2 + $0x7e4] sm:$0xf0] }
 0x653   :  { %v6342_v61 = vld [vmem:[#allocation2 + $0x41c] sm:$0xf0]  ;;  %v6362_v59 = vld [vmem:[#allocation2 + $0x4c4] sm:$0xf]  ;;  %v5130_v41 = vld [vmem:[#allocation2 + $0x188] sm:$0xf] }
 0x654   :  { %v5698_v63 = vld [vmem:[#allocation2 + $0x600] sm:$0xf]  ;;  %v5443_v24 = vor.u32 %v6342_v61, %v5442_v55  ;;  %3648 = vmatpush.bf16.msra.mxu1 %v5187_v22  ;;  %v5284_v55 = vld [vmem:[#allocation2 + $0x2e0] sm:$0xf0]  ;;  %v6263_v42 = vld [vmem:[#allocation2 + $0x1a4] sm:$0xf0] }
 0x655   :  { %v6406_v1 = vld [vmem:[#allocation2 + $0x61c] sm:$0xf0]  ;;  %3636 = vmatmul.bf16.vlgmr.msra.gmra.mxu0 %v7417_v58  ;;  %v5540_v61 = vld [vmem:[#allocation2 + $0x4e0] sm:$0xf0]  ;;  %v5287_v7 = vor.u32 %v6298_v46, %v5284_v55  ;;  %v5386_v46 = vld [vmem:[#allocation2 + $0x388] sm:$0xf] }
 0x656   :  { %v5699_v45 = vor.u32 %v6406_v1, %v5698_v63  ;;  %3661 = vmatpush.bf16.msra.mxu2 %v5443_v24  ;;  %3680 = vmatpush.bf16.msrb.mxu0 %v5159_v51  ;;  %v6426_v63 = vld [vmem:[#allocation2 + $0x6c4] sm:$0xf]  ;;  %v5543_v8 = vor.u32 %v6362_v59, %v5540_v61  ;;  %v6327_v55 = vld [vmem:[#allocation2 + $0x3a4] sm:$0xf0] }
 0x657   :  { %3649 = vmatmul.bf16.vlgmr.msra.gmra.mxu1 %v7415_v53  ;;  %v5796_v1 = vld [vmem:[#allocation2 + $0x6e0] sm:$0xf0]  ;;  %v5642_v59 = vld [vmem:[#allocation2 + $0x588] sm:$0xf] }
 0x658   :  { %3674 = vmatpush.bf16.msra.mxu3 %v5699_v45  ;;  %3693 = vmatpush.bf16.msrb.mxu1 %v5415_v52  ;;  %v6226_v9 = vld [vmem:[#allocation2 + $0x84] sm:$0xf]  ;;  %v5799_v16 = vor.u32 %v6426_v63, %v5796_v1  ;;  %v6391_v61 = vld [vmem:[#allocation2 + $0x5a4] sm:$0xf0] }
 0x659   :  { %3662 = vmatmul.bf16.vlgmr.msra.gmra.mxu2 %v7425_v50  ;;  %v5252_v22 = vld [vmem:[#allocation2 + $0x2a0] sm:$0xf0]  ;;  %v4999_v51 = vor.u32 %v6226_v9, %v4996_v11  ;;  %v5898_v63 = vld [vmem:[#allocation2 + $0x788] sm:$0xf] }
 0x65a   :  { %3706 = vmatpush.bf16.msrb.mxu2 %v5671_v0  ;;  %3681 = vmatpush.bf16.msrb.mxu0 %v5127_v29  ;;  %v6354_v24 = vld [vmem:[#allocation2 + $0x484] sm:$0xf]  ;;  %v5255_v52 = vor.u32 %v6290_v12, %v5252_v22  ;;  %v6455_v1 = vld [vmem:[#allocation2 + $0x7a4] sm:$0xf0] }
 0x65b   :  { %3675 = vmatmul.bf16.vlgmr.msra.gmra.mxu3 %v7427_v54  ;;  %v5508_v28 = vld [vmem:[#allocation2 + $0x4a0] sm:$0xf0]  ;;  %v5098_v9 = vld [vmem:[#allocation2 + $0x148] sm:$0xf] }
 0x65c   :  { %3719 = vmatpush.bf16.msrb.mxu3 %v5927_v13  ;;  %3694 = vmatpush.bf16.msrb.mxu1 %v5383_v43  ;;  %v6418_v44 = vld [vmem:[#allocation2 + $0x684] sm:$0xf]  ;;  %v5511_v0 = vor.u32 %v6354_v24, %v5508_v28  ;;  %v6255_v11 = vld [vmem:[#allocation2 + $0x164] sm:$0xf0] }
 0x65d   :  { %v5764_v45 = vld [vmem:[#allocation2 + $0x6a0] sm:$0xf0]  ;;  %v5354_v12 = vld [vmem:[#allocation2 + $0x348] sm:$0xf] }
 0x65e   :  { %3707 = vmatpush.bf16.msrb.mxu2 %v5639_v48  ;;  %3682 = vmatpush.bf16.msrb.mxu0 %v5095_v26  ;;  %v6218_v3 = vld [vmem:[#allocation2 + $0x44] sm:$0xf]  ;;  %v5767_v13 = vor.u32 %v6418_v44, %v5764_v45  ;;  %v5162_v26 = vld [vmem:[#allocation2 + $0x1c8] sm:$0xf] }
 0x65f   :  { %v4964_v4 = vld [vmem:[#allocation2 + $0x60] sm:$0xf0]  ;;  %v6319_v22 = vld [vmem:[#allocation2 + $0x364] sm:$0xf0] }
 0x660   :  { %3720 = vmatpush.bf16.msrb.mxu3 %v5895_v62  ;;  %3695 = vmatpush.bf16.msrb.mxu1 %v5351_v27  ;;  %v6282_v10 = vld [vmem:[#allocation2 + $0x244] sm:$0xf]  ;;  %v4967_v29 = vor.u32 %v6218_v3, %v4964_v4  ;;  %v6271_v27 = vld [vmem:[#allocation2 + $0x1e4] sm:$0xf0] }
 0x661   :  { %v5220_v15 = vld [vmem:[#allocation2 + $0x260] sm:$0xf0]  ;;  %v5610_v24 = vld [vmem:[#allocation2 + $0x548] sm:$0xf] }
 0x662   :  { %3708 = vmatpush.bf16.msrb.mxu2 %v5607_v30  ;;  %3683 = vmatpush.bf16.msrb.mxu0 %v5063_v38  ;;  %v6346_v17 = vld [vmem:[#allocation2 + $0x444] sm:$0xf]  ;;  %v5223_v49 = vor.u32 %v6282_v10, %v5220_v15  ;;  %v5418_v30 = vld [vmem:[#allocation2 + $0x3c8] sm:$0xf]  ;;  %v5163_v38 = vor.u32 %v6271_v27, %v5162_v26 }
 0x663   :  { %v5476_v21 = vld [vmem:[#allocation2 + $0x460] sm:$0xf0]  ;;  %v6383_v28 = vld [vmem:[#allocation2 + $0x564] sm:$0xf0] }
 0x664   :  { %3721 = vmatpush.bf16.msrb.mxu3 %v5863_v34  ;;  %3696 = vmatpush.bf16.msrb.mxu1 %v5319_v39  ;;  %v6410_v5 = vld [vmem:[#allocation2 + $0x644] sm:$0xf]  ;;  %v5479_v56 = vor.u32 %v6346_v17, %v5476_v21  ;;  %v6399_v34 = vld [vmem:[#allocation2 + $0x5e4] sm:$0xf0]  ;;  %v5419_v39 = vor.u32 %v6335_v32, %v5418_v30 }
 0x665   :  { %v5732_v6 = vld [vmem:[#allocation2 + $0x660] sm:$0xf0]  ;;  %v5866_v44 = vld [vmem:[#allocation2 + $0x748] sm:$0xf] }
 0x666   :  { %3709 = vmatpush.bf16.msrb.mxu2 %v5575_v40  ;;  %3684 = vmatpush.bf16.msrb.mxu0 %v5031_v60  ;;  %v6210_v43 = vld [vmem:[#allocation2 + $0x4] sm:$0xf]  ;;  %v5735_v18 = vor.u32 %v6410_v5, %v5732_v6  ;;  %v5675_v40 = vor.u32 %v6399_v34, %v5674_v33  ;;  %v5131_v60 = vor.u32 %v6263_v42, %v5130_v41  ;;  %v6447_v45 = vld [vmem:[#allocation2 + $0x764] sm:$0xf0] }
 0x667   :  { %v4932_v48 = vld [vmem:[#allocation2 + $0x20] sm:$0xf0]  ;;  %v5066_v3 = vld [vmem:[#allocation2 + $0x108] sm:$0xf] }
 0x668   :  { %3722 = vmatpush.bf16.msrb.mxu3 %v5831_v47  ;;  %3697 = vmatpush.bf16.msrb.mxu1 %v5287_v7  ;;  %v6274_v57 = vld [vmem:[#allocation2 + $0x204] sm:$0xf]  ;;  %v4935_v31 = vor.u32 %v6210_v43, %v4932_v48  ;;  %v5931_v47 = vor.u32 %v6463_v36, %v5930_v35  ;;  %v5387_v7 = vor.u32 %v6327_v55, %v5386_v46  ;;  %v6247_v4 = vld [vmem:[#allocation2 + $0x124] sm:$0xf0] }
 0x669   :  { %v5188_v62 = vld [vmem:[#allocation2 + $0x220] sm:$0xf0]  ;;  %v5322_v10 = vld [vmem:[#allocation2 + $0x308] sm:$0xf] }
 0x66a   :  { %3710 = vmatpush.bf16.msrb.mxu2 %v5543_v8  ;;  %3685 = vmatpush.bf16.msrb.mxu0 %v4999_v51  ;;  %v6338_v2 = vld [vmem:[#allocation2 + $0x404] sm:$0xf]  ;;  %v5191_v14 = vor.u32 %v6274_v57, %v5188_v62  ;;  %v5643_v8 = vor.u32 %v6391_v61, %v5642_v59  ;;  %v5099_v51 = vor.u32 %v6255_v11, %v5098_v9  ;;  %v6311_v15 = vld [vmem:[#allocation2 + $0x324] sm:$0xf0] }
 0x66b   :  { %v5444_v19 = vld [vmem:[#allocation2 + $0x420] sm:$0xf0]  ;;  %v5578_v17 = vld [vmem:[#allocation2 + $0x508] sm:$0xf]  ;;  %v5323_v43 = vor.u32 %v6311_v15, %v5322_v10  ;;  %v6395_v10 = vld [vmem:[#allocation2 + $0x5cc] sm:$0xf] }
 0x66c   :  { %3723 = vmatpush.bf16.msrb.mxu3 %v5799_v16  ;;  %3698 = vmatpush.bf16.msrb.mxu1 %v5255_v52  ;;  %v6402_v20 = vld [vmem:[#allocation2 + $0x604] sm:$0xf]  ;;  %v5447_v23 = vor.u32 %v6338_v2, %v5444_v19  ;;  %v5899_v16 = vor.u32 %v6455_v1, %v5898_v63  ;;  %v5355_v52 = vor.u32 %v6319_v22, %v5354_v12  ;;  %v6375_v21 = vld [vmem:[#allocation2 + $0x524] sm:$0xf0] }
 0x66d   :  { %v5700_v25 = vld [vmem:[#allocation2 + $0x620] sm:$0xf0]  ;;  %v5834_v5 = vld [vmem:[#allocation2 + $0x708] sm:$0xf]  ;;  %v5579_v48 = vor.u32 %v6375_v21, %v5578_v17  ;;  %v6459_v21 = vld [vmem:[#allocation2 + $0x7cc] sm:$0xf] }
 0x66e   :  { %3711 = vmatpush.bf16.msrb.mxu2 %v5511_v0  ;;  %3686 = vmatpush.bf16.msrb.mxu0 %v4967_v29  ;;  %v5703_v37 = vor.u32 %v6402_v20, %v5700_v25  ;;  %v5611_v0 = vor.u32 %v6383_v28, %v5610_v24  ;;  %v6439_v6 = vld [vmem:[#allocation2 + $0x724] sm:$0xf0]  ;;  %v5067_v29 = vor.u32 %v6247_v4, %v5066_v3  ;;  %v5420_v4 = vld [vmem:[#allocation2 + $0x3e8] sm:$0xf0] }
 0x66f   :  { %v5290_v57 = vld [vmem:[#allocation2 + $0x2c8] sm:$0xf]  ;;  %v5835_v62 = vor.u32 %v6439_v6, %v5834_v5  ;;  %v5932_v5 = vld [vmem:[#allocation2 + $0x7e8] sm:$0xf0] }
 0x670   :  { %3724 = vmatpush.bf16.msrb.mxu3 %v5767_v13  ;;  %3699 = vmatpush.bf16.msrb.mxu1 %v5223_v49  ;;  %v5867_v13 = vor.u32 %v6447_v45, %v5866_v44  ;;  %v5034_v49 = vld [vmem:[#allocation2 + $0xc8] sm:$0xf] }
 0x671   :  { %v6303_v2 = vld [vmem:[#allocation2 + $0x2e4] sm:$0xf0] }
 0x672   :  { %3712 = vmatpush.bf16.msrb.mxu2 %v5479_v56  ;;  %3687 = vmatpush.bf16.msrb.mxu0 %v4935_v31  ;;  %v6239_v56 = vld [vmem:[#allocation2 + $0xe4] sm:$0xf0]  ;;  %v5291_v27 = vor.u32 %v6303_v2, %v5290_v57  ;;  %v6323_v57 = vld [vmem:[#allocation2 + $0x38c] sm:$0xf] }
 0x673   :  { %v6367_v19 = vld [vmem:[#allocation2 + $0x4e4] sm:$0xf0]  ;;  %v5035_v26 = vor.u32 %v6239_v56, %v5034_v49  ;;  %v6259_v49 = vld [vmem:[#allocation2 + $0x18c] sm:$0xf] }
 0x674   :  { %3725 = vmatpush.bf16.msrb.mxu3 %v5735_v18  ;;  %3700 = vmatpush.bf16.msrb.mxu1 %v5191_v14  ;;  %v5546_v18 = vld [vmem:[#allocation2 + $0x4c8] sm:$0xf]  ;;  %v5132_v56 = vld [vmem:[#allocation2 + $0x1a8] sm:$0xf0] }
 0x675   :  { %3688 = vmatmul.bf16.vlgmr.msrb.gmra.mxu0 %v7417_v58  ;;  %v5802_v20 = vld [vmem:[#allocation2 + $0x6c8] sm:$0xf]  ;;  %v5547_v30 = vor.u32 %v6367_v19, %v5546_v18  ;;  %v5388_v2 = vld [vmem:[#allocation2 + $0x3a8] sm:$0xf0] }
 0x676   :  { %3713 = vmatpush.bf16.msrb.mxu2 %v5447_v23  ;;  %3732 = vmatpush.bf16.msra.mxu0 %v5163_v38  ;;  %v6431_v25 = vld [vmem:[#allocation2 + $0x6e4] sm:$0xf0]  ;;  %v6387_v18 = vld [vmem:[#allocation2 + $0x58c] sm:$0xf] }
 0x677   :  { %3701 = vmatmul.bf16.vlgmr.msrb.gmra.mxu1 %v7415_v53  ;;  %v5002_v31 = vld [vmem:[#allocation2 + $0x88] sm:$0xf]  ;;  %v5803_v34 = vor.u32 %v6431_v25, %v5802_v20  ;;  %v5644_v19 = vld [vmem:[#allocation2 + $0x5a8] sm:$0xf0] }
 0x678   :  { %3726 = vmatpush.bf16.msrb.mxu3 %v5703_v37  ;;  %3745 = vmatpush.bf16.msra.mxu1 %v5419_v39  ;;  %v6231_v32 = vld [vmem:[#allocation2 + $0xa4] sm:$0xf0]  ;;  %v6451_v20 = vld [vmem:[#allocation2 + $0x78c] sm:$0xf] }
 0x679   :  { %3714 = vmatmul.bf16.vlgmr.msrb.gmra.mxu2 %v7425_v50  ;;  %v5258_v33 = vld [vmem:[#allocation2 + $0x288] sm:$0xf]  ;;  %v5003_v38 = vor.u32 %v6231_v32, %v5002_v31  ;;  %v5900_v25 = vld [vmem:[#allocation2 + $0x7a8] sm:$0xf0] }
 0x67a   :  { %3758 = vmatpush.bf16.msra.mxu2 %v5675_v40  ;;  %3733 = vmatpush.bf16.msra.mxu0 %v5131_v60  ;;  %v6295_v14 = vld [vmem:[#allocation2 + $0x2a4] sm:$0xf0]  ;;  %v6251_v31 = vld [vmem:[#allocation2 + $0x14c] sm:$0xf] }
 0x67b   :  { %3727 = vmatmul.bf16.vlgmr.msrb.gmra.mxu3 %v7427_v54  ;;  %v5514_v23 = vld [vmem:[#allocation2 + $0x488] sm:$0xf]  ;;  %v5259_v39 = vor.u32 %v6295_v14, %v5258_v33  ;;  %v5100_v32 = vld [vmem:[#allocation2 + $0x168] sm:$0xf0] }
 0x67c   :  { %3771 = vmatpush.bf16.msra.mxu3 %v5931_v47  ;;  %3746 = vmatpush.bf16.msra.mxu1 %v5387_v7  ;;  %v6359_v35 = vld [vmem:[#allocation2 + $0x4a4] sm:$0xf0]  ;;  %v6315_v33 = vld [vmem:[#allocation2 + $0x34c] sm:$0xf] }
 0x67d   :  { %v5770_v36 = vld [vmem:[#allocation2 + $0x688] sm:$0xf]  ;;  %v5515_v40 = vor.u32 %v6359_v35, %v5514_v23  ;;  %v5356_v14 = vld [vmem:[#allocation2 + $0x368] sm:$0xf0] }
 0x67e   :  { %3759 = vmatpush.bf16.msra.mxu2 %v5643_v8  ;;  %3734 = vmatpush.bf16.msra.mxu0 %v5099_v51  ;;  %v6423_v37 = vld [vmem:[#allocation2 + $0x6a4] sm:$0xf0]  ;;  %v6267_v51 = vld [vmem:[#allocation2 + $0x1cc] sm:$0xf] }
 0x67f   :  { %v4970_v41 = vld [vmem:[#allocation2 + $0x48] sm:$0xf]  ;;  %v5771_v47 = vor.u32 %v6423_v37, %v5770_v36  ;;  %v6379_v23 = vld [vmem:[#allocation2 + $0x54c] sm:$0xf] }
 0x680   :  { %3772 = vmatpush.bf16.msra.mxu3 %v5899_v16  ;;  %3747 = vmatpush.bf16.msra.mxu1 %v5355_v52  ;;  %v6223_v42 = vld [vmem:[#allocation2 + $0x64] sm:$0xf0]  ;;  %v5164_v52 = vld [vmem:[#allocation2 + $0x1e8] sm:$0xf0] }
 0x681   :  { %v5226_v46 = vld [vmem:[#allocation2 + $0x248] sm:$0xf]  ;;  %v4971_v60 = vor.u32 %v6223_v42, %v4970_v41  ;;  %v5612_v35 = vld [vmem:[#allocation2 + $0x568] sm:$0xf0] }
 0x682   :  { %3760 = vmatpush.bf16.msra.mxu2 %v5611_v0  ;;  %3735 = vmatpush.bf16.msra.mxu0 %v5067_v29  ;;  %v6287_v55 = vld [vmem:[#allocation2 + $0x264] sm:$0xf0]  ;;  %v6331_v0 = vld [vmem:[#allocation2 + $0x3cc] sm:$0xf]  ;;  %v5167_v29 = vor.u32 %v6267_v51, %v5164_v52 }
 0x683   :  { %v5482_v59 = vld [vmem:[#allocation2 + $0x448] sm:$0xf]  ;;  %v5227_v9 = vor.u32 %v6287_v55, %v5226_v46  ;;  %v6443_v36 = vld [vmem:[#allocation2 + $0x74c] sm:$0xf] }
 0x684   :  { %3773 = vmatpush.bf16.msra.mxu3 %v5867_v13  ;;  %3748 = vmatpush.bf16.msra.mxu1 %v5323_v43  ;;  %v6351_v61 = vld [vmem:[#allocation2 + $0x464] sm:$0xf0]  ;;  %v5676_v13 = vld [vmem:[#allocation2 + $0x5e8] sm:$0xf0]  ;;  %v5423_v43 = vor.u32 %v6331_v0, %v5420_v4 }
 0x685   :  { %v5738_v63 = vld [vmem:[#allocation2 + $0x648] sm:$0xf]  ;;  %v5483_v11 = vor.u32 %v6351_v61, %v5482_v59  ;;  %v5868_v37 = vld [vmem:[#allocation2 + $0x768] sm:$0xf0] }
 0x686   :  { %3761 = vmatpush.bf16.msra.mxu2 %v5579_v48  ;;  %3736 = vmatpush.bf16.msra.mxu0 %v5035_v26  ;;  %v6415_v1 = vld [vmem:[#allocation2 + $0x664] sm:$0xf0]  ;;  %v5679_v48 = vor.u32 %v6395_v10, %v5676_v13  ;;  %v5135_v26 = vor.u32 %v6259_v49, %v5132_v56  ;;  %v6243_v41 = vld [vmem:[#allocation2 + $0x10c] sm:$0xf] }
 0x687   :  { %v4938_v7 = vld [vmem:[#allocation2 + $0x8] sm:$0xf]  ;;  %v5739_v24 = vor.u32 %v6415_v1, %v5738_v63  ;;  %v5068_v42 = vld [vmem:[#allocation2 + $0x128] sm:$0xf0] }
 0x688   :  { %3774 = vmatpush.bf16.msra.mxu3 %v5835_v62  ;;  %3749 = vmatpush.bf16.msra.mxu1 %v5291_v27  ;;  %v6215_v8 = vld [vmem:[#allocation2 + $0x24] sm:$0xf0]  ;;  %v5935_v62 = vor.u32 %v6459_v21, %v5932_v5  ;;  %v5391_v27 = vor.u32 %v6323_v57, %v5388_v2  ;;  %v6307_v46 = vld [vmem:[#allocation2 + $0x30c] sm:$0xf] }
 0x689   :  { %v5194_v12 = vld [vmem:[#allocation2 + $0x208] sm:$0xf]  ;;  %v4939_v3 = vor.u32 %v6215_v8, %v4938_v7  ;;  %v5324_v55 = vld [vmem:[#allocation2 + $0x328] sm:$0xf0] }
 0x68a   :  { %3762 = vmatpush.bf16.msra.mxu2 %v5547_v30  ;;  %3737 = vmatpush.bf16.msra.mxu0 %v5003_v38  ;;  %v6279_v16 = vld [vmem:[#allocation2 + $0x224] sm:$0xf0]  ;;  %v5647_v30 = vor.u32 %v6387_v18, %v5644_v19  ;;  %v5103_v38 = vor.u32 %v6251_v31, %v5100_v32  ;;  %v6371_v59 = vld [vmem:[#allocation2 + $0x50c] sm:$0xf]  ;;  %v5327_v7 = vor.u32 %v6307_v46, %v5324_v55  ;;  %v5682_v46 = vld [vmem:[#allocation2 + $0x5d0] sm:$0xf] }
 0x68b   :  { %v5450_v22 = vld [vmem:[#allocation2 + $0x408] sm:$0xf]  ;;  %v5195_v15 = vor.u32 %v6279_v16, %v5194_v12  ;;  %v5580_v61 = vld [vmem:[#allocation2 + $0x528] sm:$0xf0] }
 0x68c   :  { %3775 = vmatpush.bf16.msra.mxu3 %v5803_v34  ;;  %3750 = vmatpush.bf16.msra.mxu1 %v5259_v39  ;;  %v6343_v28 = vld [vmem:[#allocation2 + $0x424] sm:$0xf0]  ;;  %v5903_v34 = vor.u32 %v6451_v20, %v5900_v25  ;;  %v5359_v39 = vor.u32 %v6315_v33, %v5356_v14  ;;  %v6435_v63 = vld [vmem:[#allocation2 + $0x70c] sm:$0xf]  ;;  %v5583_v8 = vor.u32 %v6371_v59, %v5580_v61  ;;  %v5938_v61 = vld [vmem:[#allocation2 + $0x7d0] sm:$0xf] }
 0x68d   :  { %v5706_v44 = vld [vmem:[#allocation2 + $0x608] sm:$0xf]  ;;  %v5451_v17 = vor.u32 %v6343_v28, %v5450_v22  ;;  %v5836_v1 = vld [vmem:[#allocation2 + $0x728] sm:$0xf0] }
 0x68e   :  { %3763 = vmatpush.bf16.msra.mxu2 %v5515_v40  ;;  %v6407_v45 = vld [vmem:[#allocation2 + $0x624] sm:$0xf0]  ;;  %3738 = vmatpush.bf16.msra.mxu0 %v4971_v60  ;;  %v5615_v40 = vor.u32 %v6379_v23, %v5612_v35  ;;  %v5071_v60 = vor.u32 %v6243_v41, %v5068_v42  ;;  %v6299_v12 = vld [vmem:[#allocation2 + $0x2cc] sm:$0xf]  ;;  %v5839_v16 = vor.u32 %v6435_v63, %v5836_v1  ;;  %v6336_v42 = vld [vmem:[#allocation2 + $0x3ec] sm:$0xf0] }
 0x68f   :  { %v5707_v6 = vor.u32 %v6407_v45, %v5706_v44  ;;  %v5292_v22 = vld [vmem:[#allocation2 + $0x2e8] sm:$0xf0]  ;;  %v6464_v63 = vld [vmem:[#allocation2 + $0x7ec] sm:$0xf0] }
 0x690   :  { %3776 = vmatpush.bf16.msra.mxu3 %v5771_v47  ;;  %3751 = vmatpush.bf16.msra.mxu1 %v5227_v9  ;;  %v5871_v47 = vor.u32 %v6443_v36, %v5868_v37  ;;  %v6235_v9 = vld [vmem:[#allocation2 + $0xcc] sm:$0xf]  ;;  %v5295_v52 = vor.u32 %v6299_v12, %v5292_v22  ;;  %v5394_v12 = vld [vmem:[#allocation2 + $0x390] sm:$0xf] }
 0x691   :  { %v5548_v28 = vld [vmem:[#allocation2 + $0x4e8] sm:$0xf0]  ;;  %v6328_v22 = vld [vmem:[#allocation2 + $0x3ac] sm:$0xf0] }
 0x692   :  { %3764 = vmatpush.bf16.msra.mxu2 %v5483_v11  ;;  %3739 = vmatpush.bf16.msra.mxu0 %v4939_v3  ;;  %v5036_v11 = vld [vmem:[#allocation2 + $0xe8] sm:$0xf0] }
 0x693   :  { %v6427_v44 = vld [vmem:[#allocation2 + $0x6cc] sm:$0xf]  ;;  %v5039_v51 = vor.u32 %v6235_v9, %v5036_v11  ;;  %v5138_v9 = vld [vmem:[#allocation2 + $0x190] sm:$0xf] }
 0x694   :  { %3777 = vmatpush.bf16.msra.mxu3 %v5739_v24  ;;  %3752 = vmatpush.bf16.msra.mxu1 %v5195_v15  ;;  %v6363_v24 = vld [vmem:[#allocation2 + $0x4cc] sm:$0xf]  ;;  %v6264_v11 = vld [vmem:[#allocation2 + $0x1ac] sm:$0xf0] }
 0x695   :  { %3740 = vmatmul.bf16.vlgmr.msra.gmra.mxu0 %v7417_v58  ;;  %v5804_v45 = vld [vmem:[#allocation2 + $0x6e8] sm:$0xf0]  ;;  %v5551_v0 = vor.u32 %v6363_v24, %v5548_v28  ;;  %v5650_v24 = vld [vmem:[#allocation2 + $0x590] sm:$0xf] }
 0x696   :  { %3765 = vmatpush.bf16.msra.mxu2 %v5451_v17  ;;  %3784 = vmatpush.bf16.msrb.mxu0 %v5167_v29  ;;  %v6227_v3 = vld [vmem:[#allocation2 + $0x8c] sm:$0xf]  ;;  %v5807_v13 = vor.u32 %v6427_v44, %v5804_v45  ;;  %v6392_v28 = vld [vmem:[#allocation2 + $0x5ac] sm:$0xf0] }
 0x697   :  { %3753 = vmatmul.bf16.vlgmr.msra.gmra.mxu1 %v7415_v53  ;;  %v5004_v4 = vld [vmem:[#allocation2 + $0xa8] sm:$0xf0]  ;;  %v5906_v44 = vld [vmem:[#allocation2 + $0x790] sm:$0xf] }
 0x698   :  { %3778 = vmatpush.bf16.msra.mxu3 %v5707_v6  ;;  %3797 = vmatpush.bf16.msrb.mxu1 %v5423_v43  ;;  %v6291_v10 = vld [vmem:[#allocation2 + $0x28c] sm:$0xf]  ;;  %v5007_v29 = vor.u32 %v6227_v3, %v5004_v4  ;;  %v6456_v45 = vld [vmem:[#allocation2 + $0x7ac] sm:$0xf0] }
 0x699   :  { %3766 = vmatmul.bf16.vlgmr.msra.gmra.mxu2 %v7425_v50  ;;  %v5260_v15 = vld [vmem:[#allocation2 + $0x2a8] sm:$0xf0]  ;;  %v5106_v3 = vld [vmem:[#allocation2 + $0x150] sm:$0xf] }
 0x69a   :  { %3810 = vmatpush.bf16.msrb.mxu2 %v5679_v48  ;;  %3785 = vmatpush.bf16.msrb.mxu0 %v5135_v26  ;;  %v6355_v17 = vld [vmem:[#allocation2 + $0x48c] sm:$0xf]  ;;  %v5263_v43 = vor.u32 %v6291_v10, %v5260_v15  ;;  %v6256_v4 = vld [vmem:[#allocation2 + $0x16c] sm:$0xf0] }
 0x69b   :  { %3779 = vmatmul.bf16.vlgmr.msra.gmra.mxu3 %v7427_v54  ;;  %v5516_v21 = vld [vmem:[#allocation2 + $0x4a8] sm:$0xf0]  ;;  %v5362_v10 = vld [vmem:[#allocation2 + $0x350] sm:$0xf] }
 0x69c   :  { %3823 = vmatpush.bf16.msrb.mxu3 %v5935_v62  ;;  %3798 = vmatpush.bf16.msrb.mxu1 %v5391_v27  ;;  %v6419_v5 = vld [vmem:[#allocation2 + $0x68c] sm:$0xf]  ;;  %v5519_v48 = vor.u32 %v6355_v17, %v5516_v21  ;;  %v6320_v15 = vld [vmem:[#allocation2 + $0x36c] sm:$0xf0] }
 0x69d   :  { %v5772_v6 = vld [vmem:[#allocation2 + $0x6a8] sm:$0xf0]  ;;  %v5618_v17 = vld [vmem:[#allocation2 + $0x550] sm:$0xf] }
 0x69e   :  { %3811 = vmatpush.bf16.msrb.mxu2 %v5647_v30  ;;  %3786 = vmatpush.bf16.msrb.mxu0 %v5103_v38  ;;  %v6219_v49 = vld [vmem:[#allocation2 + $0x4c] sm:$0xf]  ;;  %v5775_v62 = vor.u32 %v6419_v5, %v5772_v6  ;;  %v5170_v38 = vld [vmem:[#allocation2 + $0x1d0] sm:$0xf] }
 0x69f   :  { %v4972_v56 = vld [vmem:[#allocation2 + $0x68] sm:$0xf0]  ;;  %v6384_v21 = vld [vmem:[#allocation2 + $0x56c] sm:$0xf0] }
 0x6a0   :  { %3824 = vmatpush.bf16.msrb.mxu3 %v5903_v34  ;;  %3799 = vmatpush.bf16.msrb.mxu1 %v5359_v39  ;;  %v6283_v57 = vld [vmem:[#allocation2 + $0x24c] sm:$0xf]  ;;  %v4975_v26 = vor.u32 %v6219_v49, %v4972_v56  ;;  %v6272_v39 = vld [vmem:[#allocation2 + $0x1ec] sm:$0xf0] }
 0x6a1   :  { %v5228_v2 = vld [vmem:[#allocation2 + $0x268] sm:$0xf0]  ;;  %v5874_v5 = vld [vmem:[#allocation2 + $0x750] sm:$0xf] }
 0x6a2   :  { %3812 = vmatpush.bf16.msrb.mxu2 %v5615_v40  ;;  %3787 = vmatpush.bf16.msrb.mxu0 %v5071_v60  ;;  %v6347_v18 = vld [vmem:[#allocation2 + $0x44c] sm:$0xf]  ;;  %v5231_v31 = vor.u32 %v6283_v57, %v5228_v2  ;;  %v5426_v40 = vld [vmem:[#allocation2 + $0x3d0] sm:$0xf]  ;;  %v5171_v60 = vor.u32 %v6272_v39, %v5170_v38 }
 0x6a3   :  { %v5484_v19 = vld [vmem:[#allocation2 + $0x468] sm:$0xf0]  ;;  %v6448_v6 = vld [vmem:[#allocation2 + $0x76c] sm:$0xf0] }
 0x6a4   :  { %3825 = vmatpush.bf16.msrb.mxu3 %v5871_v47  ;;  %3800 = vmatpush.bf16.msrb.mxu1 %v5327_v7  ;;  %v6411_v20 = vld [vmem:[#allocation2 + $0x64c] sm:$0xf]  ;;  %v5487_v32 = vor.u32 %v6347_v18, %v5484_v19  ;;  %v6400_v47 = vld [vmem:[#allocation2 + $0x5ec] sm:$0xf0]  ;;  %v5427_v7 = vor.u32 %v6336_v42, %v5426_v40 }
 0x6a5   :  { %v5740_v25 = vld [vmem:[#allocation2 + $0x668] sm:$0xf0]  ;;  %v5074_v49 = vld [vmem:[#allocation2 + $0x110] sm:$0xf] }
 0x6a6   :  { %3813 = vmatpush.bf16.msrb.mxu2 %v5583_v8  ;;  %3788 = vmatpush.bf16.msrb.mxu0 %v5039_v51  ;;  %v6211_v27 = vld [vmem:[#allocation2 + $0xc] sm:$0xf]  ;;  %v5743_v23 = vor.u32 %v6411_v20, %v5740_v25  ;;  %v5683_v8 = vor.u32 %v6400_v47, %v5682_v46  ;;  %v5139_v51 = vor.u32 %v6264_v11, %v5138_v9  ;;  %v6248_v56 = vld [vmem:[#allocation2 + $0x12c] sm:$0xf0] }
 0x6a7   :  { %v4940_v30 = vld [vmem:[#allocation2 + $0x28] sm:$0xf0]  ;;  %v5330_v57 = vld [vmem:[#allocation2 + $0x310] sm:$0xf] }
 0x6a8   :  { %3826 = vmatpush.bf16.msrb.mxu3 %v5839_v16  ;;  %3801 = vmatpush.bf16.msrb.mxu1 %v5295_v52  ;;  %v6275_v33 = vld [vmem:[#allocation2 + $0x20c] sm:$0xf]  ;;  %v4943_v41 = vor.u32 %v6211_v27, %v4940_v30  ;;  %v5939_v16 = vor.u32 %v6464_v63, %v5938_v61  ;;  %v5395_v52 = vor.u32 %v6328_v22, %v5394_v12  ;;  %v6312_v2 = vld [vmem:[#allocation2 + $0x32c] sm:$0xf0] }
 0x6a9   :  { %v5196_v34 = vld [vmem:[#allocation2 + $0x228] sm:$0xf0]  ;;  %v5586_v18 = vld [vmem:[#allocation2 + $0x510] sm:$0xf]  ;;  %v5331_v27 = vor.u32 %v6312_v2, %v5330_v57  ;;  %v6396_v57 = vld [vmem:[#allocation2 + $0x5d4] sm:$0xf] }
 0x6aa   :  { %3814 = vmatpush.bf16.msrb.mxu2 %v5551_v0  ;;  %3789 = vmatpush.bf16.msrb.mxu0 %v5007_v29  ;;  %v6339_v14 = vld [vmem:[#allocation2 + $0x40c] sm:$0xf]  ;;  %v5199_v55 = vor.u32 %v6275_v33, %v5196_v34  ;;  %v5651_v0 = vor.u32 %v6392_v28, %v5650_v24  ;;  %v5107_v29 = vor.u32 %v6256_v4, %v5106_v3  ;;  %v6376_v19 = vld [vmem:[#allocation2 + $0x52c] sm:$0xf0] }
 0x6ab   :  { %v5452_v35 = vld [vmem:[#allocation2 + $0x428] sm:$0xf0]  ;;  %v5842_v20 = vld [vmem:[#allocation2 + $0x710] sm:$0xf]  ;;  %v5587_v30 = vor.u32 %v6376_v19, %v5586_v18  ;;  %v6460_v19 = vld [vmem:[#allocation2 + $0x7d4] sm:$0xf] }
 0x6ac   :  { %3827 = vmatpush.bf16.msrb.mxu3 %v5807_v13  ;;  %3802 = vmatpush.bf16.msrb.mxu1 %v5263_v43  ;;  %v6403_v36 = vld [vmem:[#allocation2 + $0x60c] sm:$0xf]  ;;  %v5455_v59 = vor.u32 %v6339_v14, %v5452_v35  ;;  %v5907_v13 = vor.u32 %v6456_v45, %v5906_v44  ;;  %v5363_v43 = vor.u32 %v6320_v15, %v5362_v10  ;;  %v6440_v25 = vld [vmem:[#allocation2 + $0x72c] sm:$0xf0] }
 0x6ad   :  { %v5708_v37 = vld [vmem:[#allocation2 + $0x628] sm:$0xf0]  ;;  %v5298_v33 = vld [vmem:[#allocation2 + $0x2d0] sm:$0xf]  ;;  %v5843_v34 = vor.u32 %v6440_v25, %v5842_v20  ;;  %v5940_v20 = vld [vmem:[#allocation2 + $0x7f0] sm:$0xf0] }
 0x6ae   :  { %3815 = vmatpush.bf16.msrb.mxu2 %v5519_v48  ;;  %3790 = vmatpush.bf16.msrb.mxu0 %v4975_v26  ;;  %v5711_v1 = vor.u32 %v6403_v36, %v5708_v37  ;;  %v5619_v48 = vor.u32 %v6384_v21, %v5618_v17  ;;  %v5075_v26 = vor.u32 %v6248_v56, %v5074_v49  ;;  %v6304_v14 = vld [vmem:[#allocation2 + $0x2ec] sm:$0xf0]  ;;  %v5428_v56 = vld [vmem:[#allocation2 + $0x3f0] sm:$0xf0] }
 0x6af   :  { %v6368_v35 = vld [vmem:[#allocation2 + $0x4ec] sm:$0xf0]  ;;  %v5299_v39 = vor.u32 %v6304_v14, %v5298_v33  ;;  %v6324_v33 = vld [vmem:[#allocation2 + $0x394] sm:$0xf] }
 0x6b0   :  { %3828 = vmatpush.bf16.msrb.mxu3 %v5775_v62  ;;  %3803 = vmatpush.bf16.msrb.mxu1 %v5231_v31  ;;  %v5875_v62 = vor.u32 %v6448_v6, %v5874_v5  ;;  %v5042_v31 = vld [vmem:[#allocation2 + $0xd0] sm:$0xf]  ;;  %v5396_v14 = vld [vmem:[#allocation2 + $0x3b0] sm:$0xf0] }
 0x6b1   :  { %v5810_v36 = vld [vmem:[#allocation2 + $0x6d0] sm:$0xf] }
 0x6b2   :  { %3816 = vmatpush.bf16.msrb.mxu2 %v5487_v32  ;;  %3791 = vmatpush.bf16.msrb.mxu0 %v4943_v41  ;;  %v6240_v32 = vld [vmem:[#allocation2 + $0xec] sm:$0xf0] }
 0x6b3   :  { %v6432_v37 = vld [vmem:[#allocation2 + $0x6ec] sm:$0xf0]  ;;  %v5043_v38 = vor.u32 %v6240_v32, %v5042_v31  ;;  %v6260_v31 = vld [vmem:[#allocation2 + $0x194] sm:$0xf] }
 0x6b4   :  { %3829 = vmatpush.bf16.msrb.mxu3 %v5743_v23  ;;  %3804 = vmatpush.bf16.msrb.mxu1 %v5199_v55  ;;  %v5554_v23 = vld [vmem:[#allocation2 + $0x4d0] sm:$0xf]  ;;  %v5811_v47 = vor.u32 %v6432_v37, %v5810_v36  ;;  %v5140_v32 = vld [vmem:[#allocation2 + $0x1b0] sm:$0xf0] }
 0x6b5   :  { %3792 = vmatmul.bf16.vlgmr.msrb.gmra.mxu0 %v7417_v58  ;;  %v5555_v40 = vor.u32 %v6368_v35, %v5554_v23  ;;  %v5010_v41 = vld [vmem:[#allocation2 + $0x90] sm:$0xf]  ;;  %v6388_v23 = vld [vmem:[#allocation2 + $0x594] sm:$0xf] }
 0x6b6   :  { %3817 = vmatpush.bf16.msrb.mxu2 %v5455_v59  ;;  %3836 = vmatpush.bf16.msra.mxu0 %v5171_v60  ;;  %v6232_v42 = vld [vmem:[#allocation2 + $0xac] sm:$0xf0]  ;;  %v5652_v35 = vld [vmem:[#allocation2 + $0x5b0] sm:$0xf0] }
 0x6b7   :  { %3805 = vmatmul.bf16.vlgmr.msrb.gmra.mxu1 %v7415_v53  ;;  %v5266_v46 = vld [vmem:[#allocation2 + $0x290] sm:$0xf]  ;;  %v5011_v60 = vor.u32 %v6232_v42, %v5010_v41  ;;  %v6452_v36 = vld [vmem:[#allocation2 + $0x794] sm:$0xf]  ;;  %v5655_v41 = vor.u32 %v6388_v23, %v5652_v35 }
 0x6b8   :  { %3830 = vmatpush.bf16.msrb.mxu3 %v5711_v1  ;;  %3849 = vmatpush.bf16.msra.mxu1 %v5427_v7  ;;  %v6296_v55 = vld [vmem:[#allocation2 + $0x2ac] sm:$0xf0]  ;;  %v5908_v37 = vld [vmem:[#allocation2 + $0x7b0] sm:$0xf0] }
 0x6b9   :  { %3818 = vmatmul.bf16.vlgmr.msrb.gmra.mxu2 %v7425_v50  ;;  %v5522_v59 = vld [vmem:[#allocation2 + $0x490] sm:$0xf]  ;;  %v5267_v7 = vor.u32 %v6296_v55, %v5266_v46  ;;  %v5108_v42 = vld [vmem:[#allocation2 + $0x170] sm:$0xf0]  ;;  %v5911_v55 = vor.u32 %v6452_v36, %v5908_v37 }
 0x6ba   :  { %3862 = vmatpush.bf16.msra.mxu2 %v5683_v8  ;;  %3837 = vmatpush.bf16.msra.mxu0 %v5139_v51  ;;  %v6360_v61 = vld [vmem:[#allocation2 + $0x4ac] sm:$0xf0]  ;;  %v6316_v46 = vld [vmem:[#allocation2 + $0x354] sm:$0xf] }
 0x6bb   :  { %3831 = vmatmul.bf16.vlgmr.msrb.gmra.mxu3 %v7427_v54  ;;  %v5778_v63 = vld [vmem:[#allocation2 + $0x690] sm:$0xf]  ;;  %v5523_v8 = vor.u32 %v6360_v61, %v5522_v59  ;;  %v6380_v59 = vld [vmem:[#allocation2 + $0x554] sm:$0xf] }
 0x6bc   :  { %3875 = vmatpush.bf16.msra.mxu3 %v5939_v16  ;;  %3850 = vmatpush.bf16.msra.mxu1 %v5395_v52  ;;  %v6424_v1 = vld [vmem:[#allocation2 + $0x6ac] sm:$0xf0]  ;;  %v5620_v61 = vld [vmem:[#allocation2 + $0x570] sm:$0xf0] }
 0x6bd   :  { %v4978_v9 = vld [vmem:[#allocation2 + $0x50] sm:$0xf]  ;;  %v5779_v16 = vor.u32 %v6424_v1, %v5778_v63  ;;  %v7449_v63 = vld [vmem:[%s7525_s9] sm:$0xff]  ;;  %v6444_v1 = vld [vmem:[#allocation2 + $0x754] sm:$0xf] }
 0x6be   :  { %3863 = vmatpush.bf16.msra.mxu2 %v5651_v0  ;;  %3838 = vmatpush.bf16.msra.mxu0 %v5107_v29  ;;  %v6224_v11 = vld [vmem:[#allocation2 + $0x6c] sm:$0xf0]  ;;  %v6268_v29 = vld [vmem:[#allocation2 + $0x1d4] sm:$0xf] }
 0x6bf   :  { %v5234_v12 = vld [vmem:[#allocation2 + $0x250] sm:$0xf]  ;;  %v4979_v51 = vor.u32 %v6224_v11, %v4978_v9  ;;  %v5623_v11 = vor.u32 %v6380_v59, %v5620_v61  ;;  %v5780_v23 = vld [vmem:[#allocation2 + $0x6b0] sm:$0xf0] }
 0x6c0   :  { %3876 = vmatpush.bf16.msra.mxu3 %v5907_v13  ;;  %3851 = vmatpush.bf16.msra.mxu1 %v5363_v43  ;;  %v6288_v22 = vld [vmem:[#allocation2 + $0x26c] sm:$0xf0]  ;;  %v5172_v43 = vld [vmem:[#allocation2 + $0x1f0] sm:$0xf0] }
 0x6c1   :  { %v5490_v24 = vld [vmem:[#allocation2 + $0x450] sm:$0xf]  ;;  %v5235_v3 = vor.u32 %v6288_v22, %v5234_v12  ;;  %v5076_v12 = vld [vmem:[#allocation2 + $0x130] sm:$0xf0]  ;;  %v2332_v22 = vperm.slane %v7449_v63, 0 }
 0x6c2   :  { %3864 = vmatpush.bf16.msra.mxu2 %v5619_v48  ;;  %3839 = vmatpush.bf16.msra.mxu0 %v5075_v26  ;;  %v6352_v28 = vld [vmem:[#allocation2 + $0x46c] sm:$0xf0]  ;;  %v6332_v48 = vld [vmem:[#allocation2 + $0x3d4] sm:$0xf]  ;;  %v5175_v26 = vor.u32 %v6268_v29, %v5172_v43 }
 0x6c3   :  { %v5746_v44 = vld [vmem:[#allocation2 + $0x650] sm:$0xf]  ;;  %v5491_v4 = vor.u32 %v6352_v28, %v5490_v24  ;;  %v5332_v28 = vld [vmem:[#allocation2 + $0x330] sm:$0xf0] }
 0x6c4   :  { %3877 = vmatpush.bf16.msra.mxu3 %v5875_v62  ;;  %3852 = vmatpush.bf16.msra.mxu1 %v5331_v27  ;;  %v6416_v45 = vld [vmem:[#allocation2 + $0x66c] sm:$0xf0]  ;;  %v5684_v62 = vld [vmem:[#allocation2 + $0x5f0] sm:$0xf0]  ;;  %v5431_v27 = vor.u32 %v6332_v48, %v5428_v56 }
 0x6c5   :  { %v4946_v52 = vld [vmem:[#allocation2 + $0x10] sm:$0xf]  ;;  %v5747_v17 = vor.u32 %v6416_v45, %v5746_v44  ;;  %v6372_v44 = vld [vmem:[#allocation2 + $0x514] sm:$0xf] }
 0x6c6   :  { %3865 = vmatpush.bf16.msra.mxu2 %v5587_v30  ;;  %3840 = vmatpush.bf16.msra.mxu0 %v5043_v38  ;;  %v6216_v0 = vld [vmem:[#allocation2 + $0x2c] sm:$0xf0]  ;;  %v5687_v30 = vor.u32 %v6396_v57, %v5684_v62  ;;  %v5143_v38 = vor.u32 %v6260_v31, %v5140_v32  ;;  %v5588_v45 = vld [vmem:[#allocation2 + $0x530] sm:$0xf0] }
 0x6c7   :  { %v5202_v10 = vld [vmem:[#allocation2 + $0x210] sm:$0xf]  ;;  %v4947_v49 = vor.u32 %v6216_v0, %v4946_v52  ;;  %v5844_v52 = vld [vmem:[#allocation2 + $0x730] sm:$0xf0] }
 0x6c8   :  { %3878 = vmatpush.bf16.msra.mxu3 %v5843_v34  ;;  %3853 = vmatpush.bf16.msra.mxu1 %v5299_v39  ;;  %v6280_v13 = vld [vmem:[#allocation2 + $0x22c] sm:$0xf0]  ;;  %v5943_v34 = vor.u32 %v6460_v19, %v5940_v20  ;;  %v6252_v39 = vld [vmem:[#allocation2 + $0x154] sm:$0xf] }
 0x6c9   :  { %v5458_v15 = vld [vmem:[#allocation2 + $0x410] sm:$0xf]  ;;  %v5203_v2 = vor.u32 %v6280_v13, %v5202_v10  ;;  %v5591_v10 = vor.u32 %v6372_v44, %v5588_v45  ;;  %v6236_v13 = vld [vmem:[#allocation2 + $0xd4] sm:$0xf] }
 0x6ca   :  { %3866 = vmatpush.bf16.msra.mxu2 %v5555_v40  ;;  %3841 = vmatpush.bf16.msra.mxu0 %v5011_v60  ;;  %v6344_v21 = vld [vmem:[#allocation2 + $0x42c] sm:$0xf0]  ;;  %v5399_v40 = vor.u32 %v6324_v33, %v5396_v14  ;;  %v5876_v60 = vld [vmem:[#allocation2 + $0x770] sm:$0xf0] }
 0x6cb   :  { %v5714_v5 = vld [vmem:[#allocation2 + $0x610] sm:$0xf]  ;;  %v5459_v18 = vor.u32 %v6344_v21, %v5458_v15  ;;  %v5879_v24 = vor.u32 %v6444_v1, %v5876_v60  ;;  %v5044_v15 = vld [vmem:[#allocation2 + $0xf0] sm:$0xf0] }
 0x6cc   :  { %3879 = vmatpush.bf16.msra.mxu3 %v5811_v47  ;;  %3854 = vmatpush.bf16.msra.mxu1 %v5267_v7  ;;  %v6408_v6 = vld [vmem:[#allocation2 + $0x62c] sm:$0xf0]  ;;  %v5364_v47 = vld [vmem:[#allocation2 + $0x370] sm:$0xf0]  ;;  %v5111_v7 = vor.u32 %v6252_v39, %v5108_v42  ;;  %v5047_v62 = vor.u32 %v6236_v13, %v5044_v15  ;;  %v6273_v13 = vld [vmem:[#allocation2 + $0x1f4] sm:$0xf0] }
 0x6cd   :  { %v5715_v25 = vor.u32 %v6408_v6, %v5714_v5  ;;  %v5367_v9 = vor.u32 %v6316_v46, %v5364_v47  ;;  %v5300_v29 = vld [vmem:[#allocation2 + $0x2f0] sm:$0xf0]  ;;  %v5434_v15 = vld [vmem:[#allocation2 + $0x3d8] sm:$0xf] }
 0x6ce   :  { %3867 = vmatpush.bf16.msra.mxu2 %v5523_v8  ;;  %3842 = vmatpush.bf16.msra.mxu0 %v4979_v51  ;;  %v6244_v8 = vld [vmem:[#allocation2 + $0x114] sm:$0xf] }
 0x6cf   :  { %v6436_v51 = vld [vmem:[#allocation2 + $0x714] sm:$0xf]  ;;  %v5079_v0 = vor.u32 %v6244_v8, %v5076_v12 }
 0x6d0   :  { %3880 = vmatpush.bf16.msra.mxu3 %v5779_v16  ;;  %3855 = vmatpush.bf16.msra.mxu1 %v5235_v3  ;;  %v6308_v16 = vld [vmem:[#allocation2 + $0x314] sm:$0xf]  ;;  %v5847_v6 = vor.u32 %v6436_v51, %v5844_v52 }
 0x6d1   :  { %v6364_v43 = vld [vmem:[#allocation2 + $0x4d4] sm:$0xf] }
 0x6d2   :  { %3868 = vmatpush.bf16.msra.mxu2 %v5491_v4  ;;  %3843 = vmatpush.bf16.msra.mxu0 %v4947_v49  ;;  %v3637_v3 = vpop.f32.mrf.mxu0  ;;  %v5335_v4 = vor.u32 %v6308_v16, %v5332_v28  ;;  %v5556_v48 = vld [vmem:[#allocation2 + $0x4f0] sm:$0xf0] }
 0x6d3   :  { %v3638_v21 = vadd.f32 %v3637_v3, %v2332_v22  ;;  %v6428_v49 = vld [vmem:[#allocation2 + $0x6d4] sm:$0xf] }
 0x6d4   :  { %3881 = vmatpush.bf16.msra.mxu3 %v5747_v17  ;;  %3856 = vmatpush.bf16.msra.mxu1 %v5203_v2  ;;  %v6300_v17 = vld [vmem:[#allocation2 + $0x2d4] sm:$0xf]  ;;  %v3650_v5 = vpop.f32.mrf.mxu1 }
 0x6d5   :  { %3844 = vmatmul.bf16.vlgmr.msra.gmra.mxu0 %v7417_v58  ;;  %v5812_v56 = vld [vmem:[#allocation2 + $0x6f0] sm:$0xf0]  ;;  %v3651_v57 = vadd.f32 %v3650_v5, %v3638_v21  ;;  %v5303_v2 = vor.u32 %v6300_v17, %v5300_v29  ;;  %v6337_v21 = vld [vmem:[#allocation2 + $0x3f4] sm:$0xf0] }
 0x6d6   :  { %3869 = vmatpush.bf16.msra.mxu2 %v5459_v18  ;;  %3888 = vmatpush.bf16.msrb.mxu0 %v5175_v26  ;;  %v5559_v18 = vor.u32 %v6364_v43, %v5556_v48  ;;  %v6228_v19 = vld [vmem:[#allocation2 + $0x94] sm:$0xf]  ;;  %v5690_v5 = vld [vmem:[#allocation2 + $0x5d8] sm:$0xf] }
 0x6d7   :  { %3857 = vmatmul.bf16.vlgmr.msra.gmra.mxu1 %v7415_v53  ;;  %v5012_v20 = vld [vmem:[#allocation2 + $0xb0] sm:$0xf0]  ;;  %v5946_v48 = vld [vmem:[#allocation2 + $0x7d8] sm:$0xf] }
 0x6d8   :  { %3882 = vmatpush.bf16.msra.mxu3 %v5715_v25  ;;  %3901 = vmatpush.bf16.msrb.mxu1 %v5431_v27  ;;  %v6292_v25 = vld [vmem:[#allocation2 + $0x294] sm:$0xf]  ;;  %v5815_v27 = vor.u32 %v6428_v49, %v5812_v56  ;;  %v5015_v35 = vor.u32 %v6228_v19, %v5012_v20  ;;  %v6465_v49 = vld [vmem:[#allocation2 + $0x7f4] sm:$0xf0] }
 0x6d9   :  { %3870 = vmatmul.bf16.vlgmr.msra.gmra.mxu2 %v7425_v50  ;;  %v6356_v31 = vld [vmem:[#allocation2 + $0x494] sm:$0xf]  ;;  %v6265_v19 = vld [vmem:[#allocation2 + $0x1b4] sm:$0xf0] }
 0x6da   :  { %3914 = vmatpush.bf16.msrb.mxu2 %v5687_v30  ;;  %3889 = vmatpush.bf16.msrb.mxu0 %v5143_v38  ;;  %v5268_v30 = vld [vmem:[#allocation2 + $0x2b0] sm:$0xf0]  ;;  %v3639_v38 = vpop.f32.mrf.mxu0  ;;  %v5402_v20 = vld [vmem:[#allocation2 + $0x398] sm:$0xf] }
 0x6db   :  { %3883 = vmatmul.bf16.vlgmr.msra.gmra.mxu3 %v7427_v54  ;;  %v5524_v32 = vld [vmem:[#allocation2 + $0x4b0] sm:$0xf0]  ;;  %v5271_v39 = vor.u32 %v6292_v25, %v5268_v30  ;;  %v5947_v25 = vor.u32 %v6465_v49, %v5946_v48  ;;  %v6393_v30 = vld [vmem:[#allocation2 + $0x5b4] sm:$0xf0] }
 0x6dc   :  { %3927 = vmatpush.bf16.msrb.mxu3 %v5943_v34  ;;  %3902 = vmatpush.bf16.msrb.mxu1 %v5399_v40  ;;  %v3663_v26 = vpop.f32.mrf.mxu2  ;;  %v6420_v14 = vld [vmem:[#allocation2 + $0x694] sm:$0xf]  ;;  %v5527_v40 = vor.u32 %v6356_v31, %v5524_v32  ;;  %v3652_v47 = vpop.f32.mrf.mxu1  ;;  %v5914_v31 = vld [vmem:[#allocation2 + $0x798] sm:$0xf] }
 0x6dd   :  { %v3664_v33 = vadd.f32 %v3663_v26, %v3651_v57  ;;  %v6220_v36 = vld [vmem:[#allocation2 + $0x54] sm:$0xf]  ;;  %v6329_v26 = vld [vmem:[#allocation2 + $0x3b4] sm:$0xf0] }
 0x6de   :  { %3915 = vmatpush.bf16.msrb.mxu2 %v5655_v41  ;;  %3890 = vmatpush.bf16.msrb.mxu0 %v5111_v7  ;;  %v3676_v34 = vpop.f32.mrf.mxu3  ;;  %v4980_v41 = vld [vmem:[#allocation2 + $0x70] sm:$0xf0]  ;;  %v6457_v32 = vld [vmem:[#allocation2 + $0x7b4] sm:$0xf0] }
 0x6df   :  { %v3677_v37 = vadd.f32 %v3676_v34, %v3664_v33  ;;  %v6284_v42 = vld [vmem:[#allocation2 + $0x254] sm:$0xf]  ;;  %v4983_v8 = vor.u32 %v6220_v36, %v4980_v41  ;;  %v5403_v34 = vor.u32 %v6329_v26, %v5402_v20  ;;  %v5370_v36 = vld [vmem:[#allocation2 + $0x358] sm:$0xf] }
 0x6e0   :  { %3928 = vmatpush.bf16.msrb.mxu3 %v5911_v55  ;;  %3903 = vmatpush.bf16.msrb.mxu1 %v5367_v9  ;;  %v5236_v46 = vld [vmem:[#allocation2 + $0x270] sm:$0xf0]  ;;  %v5783_v55 = vor.u32 %v6420_v14, %v5780_v23  ;;  %v5114_v23 = vld [vmem:[#allocation2 + $0x158] sm:$0xf] }
 0x6e1   :  { %v6348_v59 = vld [vmem:[#allocation2 + $0x454] sm:$0xf]  ;;  %v4044_v1 = vmax.f32 %v3677_v37, 0.0  ;;  %v5239_v16 = vor.u32 %v6284_v42, %v5236_v46  ;;  %v5915_v37 = vor.u32 %v6457_v32, %v5914_v31  ;;  %v6321_v38 = vld [vmem:[#allocation2 + $0x374] sm:$0xf0] }
 0x6e2   :  { %3916 = vmatpush.bf16.msrb.mxu2 %v5623_v11  ;;  %3891 = vmatpush.bf16.msrb.mxu0 %v5079_v0  ;;  %v5492_v61 = vld [vmem:[#allocation2 + $0x470] sm:$0xf0]  ;;  %v5882_v41 = vld [vmem:[#allocation2 + $0x758] sm:$0xf] }
 0x6e3   :  { %v6412_v60 = vld [vmem:[#allocation2 + $0x654] sm:$0xf]  ;;  %v7455_v12 = vpack.c.bf16 %v4044_v1, %v4044_v1  ;;  %v5495_v22 = vor.u32 %v6348_v59, %v5492_v61  ;;  %v6449_v42 = vld [vmem:[#allocation2 + $0x774] sm:$0xf0] }
 0x6e4   :  { %3929 = vmatpush.bf16.msrb.mxu3 %v5879_v24  ;;  %3904 = vmatpush.bf16.msrb.mxu1 %v5335_v4  ;;  %v5748_v7 = vld [vmem:[#allocation2 + $0x670] sm:$0xf0]  ;;  %v3665_v45 = vpop.f32.mrf.mxu2  ;;  %v5082_v47 = vld [vmem:[#allocation2 + $0x118] sm:$0xf] }
 0x6e5   :  { %v6212_v9 = vld [vmem:[#allocation2 + $0x14] sm:$0xf]  ;;  %v5751_v51 = vor.u32 %v6412_v60, %v5748_v7  ;;  %v6249_v61 = vld [vmem:[#allocation2 + $0x134] sm:$0xf0]  ;;  %v2333_v60 = vperm.slane %v7449_v63, 1  ;;  %v5883_v7 = vor.u32 %v6449_v42, %v5882_v41 }
 0x6e6   :  { %3917 = vmatpush.bf16.msrb.mxu2 %v5591_v10  ;;  %3892 = vmatpush.bf16.msrb.mxu0 %v5047_v62  ;;  %v4948_v11 = vld [vmem:[#allocation2 + $0x30] sm:$0xf0]  ;;  %v3678_v4 = vpop.f32.mrf.mxu3  ;;  %v5178_v10 = vld [vmem:[#allocation2 + $0x1d8] sm:$0xf]  ;;  %v5435_v62 = vor.u32 %v6337_v21, %v5434_v15 }
 0x6e7   :  { %v6276_v24 = vld [vmem:[#allocation2 + $0x214] sm:$0xf]  ;;  %v4951_v17 = vor.u32 %v6212_v9, %v4948_v11  ;;  %v5179_v57 = vor.u32 %v6273_v13, %v5178_v10  ;;  %v5338_v1 = vld [vmem:[#allocation2 + $0x318] sm:$0xf] }
 0x6e8   :  { %3930 = vmatpush.bf16.msrb.mxu3 %v5847_v6  ;;  %3905 = vmatpush.bf16.msrb.mxu1 %v5303_v2  ;;  %v5204_v28 = vld [vmem:[#allocation2 + $0x230] sm:$0xf0]  ;;  %v6401_v6 = vld [vmem:[#allocation2 + $0x5f4] sm:$0xf0] }
 0x6e9   :  { %v6340_v44 = vld [vmem:[#allocation2 + $0x414] sm:$0xf]  ;;  %v5207_v29 = vor.u32 %v6276_v24, %v5204_v28  ;;  %v5691_v2 = vor.u32 %v6401_v6, %v5690_v5  ;;  %v5594_v9 = vld [vmem:[#allocation2 + $0x518] sm:$0xf]  ;;  %v5083_v24 = vor.u32 %v6249_v61, %v5082_v47 }
 0x6ea   :  { %3918 = vmatpush.bf16.msrb.mxu2 %v5559_v18  ;;  %3893 = vmatpush.bf16.msrb.mxu0 %v5015_v35  ;;  %v5460_v52 = vld [vmem:[#allocation2 + $0x430] sm:$0xf0]  ;;  %v5146_v18 = vld [vmem:[#allocation2 + $0x198] sm:$0xf] }
 0x6eb   :  { %v6404_v0 = vld [vmem:[#allocation2 + $0x614] sm:$0xf]  ;;  %v5463_v43 = vor.u32 %v6340_v44, %v5460_v52  ;;  %v5147_v33 = vor.u32 %v6265_v19, %v5146_v18  ;;  %v6257_v35 = vld [vmem:[#allocation2 + $0x174] sm:$0xf0] }
 0x6ec   :  { %3931 = vmatpush.bf16.msrb.mxu3 %v5815_v27  ;;  %3906 = vmatpush.bf16.msrb.mxu1 %v5271_v39  ;;  %v5716_v3 = vld [vmem:[#allocation2 + $0x630] sm:$0xf0]  ;;  %v5658_v27 = vld [vmem:[#allocation2 + $0x598] sm:$0xf]  ;;  %v5115_v46 = vor.u32 %v6257_v35, %v5114_v23 }
 0x6ed   :  { %v5719_v56 = vor.u32 %v6404_v0, %v5716_v3  ;;  %v5659_v14 = vor.u32 %v6393_v30, %v5658_v27  ;;  %v5626_v39 = vld [vmem:[#allocation2 + $0x558] sm:$0xf] }
 0x6ee   :  { %3919 = vmatpush.bf16.msrb.mxu2 %v5527_v40  ;;  %3894 = vmatpush.bf16.msrb.mxu0 %v4983_v8  ;;  %v6385_v40 = vld [vmem:[#allocation2 + $0x574] sm:$0xf0] }
 0x6ef   :  { %v5627_v59 = vor.u32 %v6385_v40, %v5626_v39  ;;  %v6313_v8 = vld [vmem:[#allocation2 + $0x334] sm:$0xf0] }
 0x6f0   :  { %3932 = vmatpush.bf16.msrb.mxu3 %v5783_v55  ;;  %3907 = vmatpush.bf16.msrb.mxu1 %v5239_v16  ;;  %v5371_v55 = vor.u32 %v6321_v38, %v5370_v36  ;;  %v6377_v11 = vld [vmem:[#allocation2 + $0x534] sm:$0xf0]  ;;  %v5339_v44 = vor.u32 %v6313_v8, %v5338_v1 }
 0x6f1   :  { %v5850_v16 = vld [vmem:[#allocation2 + $0x718] sm:$0xf]  ;;  %v5595_v45 = vor.u32 %v6377_v11, %v5594_v9 }
 0x6f2   :  { %3920 = vmatpush.bf16.msrb.mxu2 %v5495_v22  ;;  %3895 = vmatpush.bf16.msrb.mxu0 %v4951_v17  ;;  %v6441_v22 = vld [vmem:[#allocation2 + $0x734] sm:$0xf0]  ;;  %v3689_v28 = vpop.f32.mrf.mxu0 }
 0x6f3   :  { %v6241_v52 = vld [vmem:[#allocation2 + $0xf4] sm:$0xf0]  ;;  %v3690_v3 = vadd.f32 %v3689_v28, %v2333_v60  ;;  %v5851_v10 = vor.u32 %v6441_v22, %v5850_v16 }
 0x6f4   :  { %3933 = vmatpush.bf16.msrb.mxu3 %v5751_v51  ;;  %3908 = vmatpush.bf16.msrb.mxu1 %v5207_v29  ;;  %v5050_v51 = vld [vmem:[#allocation2 + $0xd8] sm:$0xf]  ;;  %v3702_v4 = vpop.f32.mrf.mxu1 }
 0x6f5   :  { %3896 = vmatmul.bf16.vlgmr.msrb.gmra.mxu0 %v7417_v58  ;;  %v5306_v0 = vld [vmem:[#allocation2 + $0x2d8] sm:$0xf]  ;;  %v3703_v6 = vadd.f32 %v3702_v4, %v3690_v3  ;;  %v5051_v29 = vor.u32 %v6241_v52, %v5050_v51  ;;  %v6269_v51 = vld [vmem:[#allocation2 + $0x1dc] sm:$0xf] }
 0x6f6   :  { %3921 = vmatpush.bf16.msrb.mxu2 %v5463_v43  ;;  %3940 = vmatpush.bf16.msra.mxu0 %v5179_v57  ;;  %v6305_v13 = vld [vmem:[#allocation2 + $0x2f4] sm:$0xf0]  ;;  %v5180_v52 = vld [vmem:[#allocation2 + $0x1f8] sm:$0xf0] }
 0x6f7   :  { %3909 = vmatmul.bf16.vlgmr.msrb.gmra.mxu1 %v7415_v53  ;;  %v5562_v15 = vld [vmem:[#allocation2 + $0x4d8] sm:$0xf]  ;;  %v5307_v43 = vor.u32 %v6305_v13, %v5306_v0  ;;  %v6333_v0 = vld [vmem:[#allocation2 + $0x3dc] sm:$0xf] }
 0x6f8   :  { %3934 = vmatpush.bf16.msrb.mxu3 %v5719_v56  ;;  %3953 = vmatpush.bf16.msra.mxu1 %v5435_v62  ;;  %v6369_v17 = vld [vmem:[#allocation2 + $0x4f4] sm:$0xf0]  ;;  %v5436_v4 = vld [vmem:[#allocation2 + $0x3f8] sm:$0xf0] }
 0x6f9   :  { %3922 = vmatmul.bf16.vlgmr.msrb.gmra.mxu2 %v7425_v50  ;;  %v5818_v21 = vld [vmem:[#allocation2 + $0x6d8] sm:$0xf]  ;;  %v5563_v48 = vor.u32 %v6369_v17, %v5562_v15  ;;  %v5692_v13 = vld [vmem:[#allocation2 + $0x5f8] sm:$0xf0] }
 0x6fa   :  { %3966 = vmatpush.bf16.msra.mxu2 %v5691_v2  ;;  %3941 = vmatpush.bf16.msra.mxu0 %v5147_v33  ;;  %v6433_v5 = vld [vmem:[#allocation2 + $0x6f4] sm:$0xf0] }
 0x6fb   :  { %3935 = vmatmul.bf16.vlgmr.msrb.gmra.mxu3 %v7427_v54  ;;  %v5018_v49 = vld [vmem:[#allocation2 + $0x98] sm:$0xf]  ;;  %v5819_v2 = vor.u32 %v6433_v5, %v5818_v21  ;;  %v6461_v21 = vld [vmem:[#allocation2 + $0x7dc] sm:$0xf] }
 0x6fc   :  { %3979 = vmatpush.bf16.msra.mxu3 %v5947_v25  ;;  %3954 = vmatpush.bf16.msra.mxu1 %v5403_v34  ;;  %v6233_v56 = vld [vmem:[#allocation2 + $0xb4] sm:$0xf0]  ;;  %v3715_v62 = vpop.f32.mrf.mxu2  ;;  %v3691_v34 = vpop.f32.mrf.mxu0  ;;  %v5948_v5 = vld [vmem:[#allocation2 + $0x7f8] sm:$0xf0] }
 0x6fd   :  { %v5274_v57 = vld [vmem:[#allocation2 + $0x298] sm:$0xf]  ;;  %v3716_v25 = vadd.f32 %v3715_v62, %v3703_v6  ;;  %v5019_v31 = vor.u32 %v6233_v56, %v5018_v49  ;;  %v3704_v38 = vpop.f32.mrf.mxu1  ;;  %v6261_v49 = vld [vmem:[#allocation2 + $0x19c] sm:$0xf]  ;;  %v5951_v62 = vor.u32 %v6461_v21, %v5948_v5 }
 0x6fe   :  { %3967 = vmatpush.bf16.msra.mxu2 %v5659_v14  ;;  %3942 = vmatpush.bf16.msra.mxu0 %v5115_v46  ;;  %v6297_v18 = vld [vmem:[#allocation2 + $0x2b4] sm:$0xf0]  ;;  %v3728_v26 = vpop.f32.mrf.mxu3  ;;  %v5148_v56 = vld [vmem:[#allocation2 + $0x1b8] sm:$0xf0] }
 0x6ff   :  { %v5530_v19 = vld [vmem:[#allocation2 + $0x498] sm:$0xf]  ;;  %v3729_v33 = vadd.f32 %v3728_v26, %v3716_v25  ;;  %v5275_v14 = vor.u32 %v6297_v18, %v5274_v57  ;;  %v6325_v57 = vld [vmem:[#allocation2 + $0x39c] sm:$0xf]  ;;  %v5151_v26 = vor.u32 %v6261_v49, %v5148_v56 }
 0x700   :  { %3980 = vmatpush.bf16.msra.mxu3 %v5915_v37  ;;  %3955 = vmatpush.bf16.msra.mxu1 %v5371_v55  ;;  %v6361_v20 = vld [vmem:[#allocation2 + $0x4b4] sm:$0xf0]  ;;  %v6389_v18 = vld [vmem:[#allocation2 + $0x59c] sm:$0xf] }
 0x701   :  { %v5786_v27 = vld [vmem:[#allocation2 + $0x698] sm:$0xf]  ;;  %v5531_v23 = vor.u32 %v6361_v20, %v5530_v19  ;;  %v4045_v42 = vmax.f32 %v3729_v33, 0.0  ;;  %v5660_v19 = vld [vmem:[#allocation2 + $0x5b8] sm:$0xf0] }
 0x702   :  { %3968 = vmatpush.bf16.msra.mxu2 %v5627_v59  ;;  %3943 = vmatpush.bf16.msra.mxu0 %v5083_v24  ;;  %v6425_v30 = vld [vmem:[#allocation2 + $0x6b4] sm:$0xf0]  ;;  %v6453_v20 = vld [vmem:[#allocation2 + $0x79c] sm:$0xf] }
 0x703   :  { %v4986_v32 = vld [vmem:[#allocation2 + $0x58] sm:$0xf]  ;;  %v5787_v39 = vor.u32 %v6425_v30, %v5786_v27  ;;  %v7462_v1 = vpack.c.bf16 %v4045_v42, %v4045_v42  ;;  %v5916_v25 = vld [vmem:[#allocation2 + $0x7b8] sm:$0xf0]  ;;  %v5663_v30 = vor.u32 %v6389_v18, %v5660_v19 }
 0x704   :  { %3981 = vmatpush.bf16.msra.mxu3 %v5883_v7  ;;  %3956 = vmatpush.bf16.msra.mxu1 %v5339_v44  ;;  %v6225_v35 = vld [vmem:[#allocation2 + $0x74] sm:$0xf0]  ;;  %v3717_v16 = vpop.f32.mrf.mxu2  ;;  %v6317_v33 = vld [vmem:[#allocation2 + $0x35c] sm:$0xf]  ;;  %v5919_v34 = vor.u32 %v6453_v20, %v5916_v25 }
 0x705   :  { %v5242_v36 = vld [vmem:[#allocation2 + $0x258] sm:$0xf]  ;;  %v4987_v55 = vor.u32 %v6225_v35, %v4986_v32  ;;  %v5116_v32 = vld [vmem:[#allocation2 + $0x178] sm:$0xf0] }
 0x706   :  { %3969 = vmatpush.bf16.msra.mxu2 %v5595_v45  ;;  %3944 = vmatpush.bf16.msra.mxu0 %v5051_v29  ;;  %v6289_v37 = vld [vmem:[#allocation2 + $0x274] sm:$0xf0]  ;;  %v3730_v45 = vpop.f32.mrf.mxu3  ;;  %v5183_v29 = vor.u32 %v6269_v51, %v5180_v52  ;;  %v5628_v35 = vld [vmem:[#allocation2 + $0x578] sm:$0xf0] }
 0x707   :  { %v5498_v40 = vld [vmem:[#allocation2 + $0x458] sm:$0xf]  ;;  %v5243_v60 = vor.u32 %v6289_v37, %v5242_v36  ;;  %v6445_v36 = vld [vmem:[#allocation2 + $0x75c] sm:$0xf] }
 0x708   :  { %3982 = vmatpush.bf16.msra.mxu3 %v5851_v10  ;;  %3957 = vmatpush.bf16.msra.mxu1 %v5307_v43  ;;  %v6353_v41 = vld [vmem:[#allocation2 + $0x474] sm:$0xf0]  ;;  %v6397_v10 = vld [vmem:[#allocation2 + $0x5dc] sm:$0xf]  ;;  %v5439_v43 = vor.u32 %v6333_v0, %v5436_v4 }
 0x709   :  { %v5754_v46 = vld [vmem:[#allocation2 + $0x658] sm:$0xf]  ;;  %v5499_v7 = vor.u32 %v6353_v41, %v5498_v40  ;;  %v5884_v37 = vld [vmem:[#allocation2 + $0x778] sm:$0xf0] }
 0x70a   :  { %3970 = vmatpush.bf16.msra.mxu2 %v5563_v48  ;;  %v6417_v47 = vld [vmem:[#allocation2 + $0x674] sm:$0xf0]  ;;  %3945 = vmatpush.bf16.msra.mxu0 %v5019_v31  ;;  %v5695_v48 = vor.u32 %v6397_v10, %v5692_v13  ;;  %v6253_v31 = vld [vmem:[#allocation2 + $0x15c] sm:$0xf] }
 0x70b   :  { %v4954_v59 = vld [vmem:[#allocation2 + $0x18] sm:$0xf]  ;;  %v5755_v22 = vor.u32 %v6417_v47, %v5754_v46  ;;  %v5119_v38 = vor.u32 %v6253_v31, %v5116_v32  ;;  %v5084_v42 = vld [vmem:[#allocation2 + $0x138] sm:$0xf0]  ;;  %v2334_v47 = vperm.slane %v7449_v63, 2 }
 0x70c   :  { %3983 = vmatpush.bf16.msra.mxu3 %v5819_v2  ;;  %v6217_v61 = vld [vmem:[#allocation2 + $0x34] sm:$0xf0]  ;;  %3958 = vmatpush.bf16.msra.mxu1 %v5275_v14  ;;  %v5404_v2 = vld [vmem:[#allocation2 + $0x3b8] sm:$0xf0] }
 0x70d   :  { %v5210_v8 = vld [vmem:[#allocation2 + $0x218] sm:$0xf]  ;;  %v4955_v3 = vor.u32 %v6217_v61, %v4954_v59  ;;  %v5407_v27 = vor.u32 %v6325_v57, %v5404_v2  ;;  %v5372_v14 = vld [vmem:[#allocation2 + $0x378] sm:$0xf0] }
 0x70e   :  { %3971 = vmatpush.bf16.msra.mxu2 %v5531_v23  ;;  %v6281_v9 = vld [vmem:[#allocation2 + $0x234] sm:$0xf0]  ;;  %3946 = vmatpush.bf16.msra.mxu0 %v4987_v55  ;;  %v6381_v23 = vld [vmem:[#allocation2 + $0x55c] sm:$0xf]  ;;  %v5375_v40 = vor.u32 %v6317_v33, %v5372_v14  ;;  %v5887_v55 = vor.u32 %v6445_v36, %v5884_v37 }
 0x70f   :  { %v5466_v11 = vld [vmem:[#allocation2 + $0x418] sm:$0xf]  ;;  %v5211_v15 = vor.u32 %v6281_v9, %v5210_v8  ;;  %v5631_v41 = vor.u32 %v6381_v23, %v5628_v35  ;;  %v6309_v46 = vld [vmem:[#allocation2 + $0x31c] sm:$0xf] }
 0x710   :  { %3984 = vmatpush.bf16.msra.mxu3 %v5787_v39  ;;  %v6345_v24 = vld [vmem:[#allocation2 + $0x434] sm:$0xf0]  ;;  %3959 = vmatpush.bf16.msra.mxu1 %v5243_v60  ;;  %v6245_v39 = vld [vmem:[#allocation2 + $0x11c] sm:$0xf] }
 0x711   :  { %v5722_v28 = vld [vmem:[#allocation2 + $0x618] sm:$0xf]  ;;  %v5467_v17 = vor.u32 %v6345_v24, %v5466_v11  ;;  %v5340_v59 = vld [vmem:[#allocation2 + $0x338] sm:$0xf0]  ;;  %v5087_v9 = vor.u32 %v6245_v39, %v5084_v42 }
 0x712   :  { %v6409_v44 = vld [vmem:[#allocation2 + $0x634] sm:$0xf0]  ;;  %3972 = vmatpush.bf16.msra.mxu2 %v5499_v7  ;;  %3947 = vmatpush.bf16.msra.mxu0 %v4955_v3  ;;  %v6373_v61 = vld [vmem:[#allocation2 + $0x51c] sm:$0xf]  ;;  %v3741_v11 = vpop.f32.mrf.mxu0  ;;  %v5343_v16 = vor.u32 %v6309_v46, %v5340_v59 }
 0x713   :  { %v5723_v6 = vor.u32 %v6409_v44, %v5722_v28  ;;  %v5596_v60 = vld [vmem:[#allocation2 + $0x538] sm:$0xf0]  ;;  %v3742_v45 = vadd.f32 %v3741_v11, %v2334_v47 }
 0x714   :  { %3985 = vmatpush.bf16.msra.mxu3 %v5755_v22  ;;  %3960 = vmatpush.bf16.msra.mxu1 %v5211_v15  ;;  %v6437_v7 = vld [vmem:[#allocation2 + $0x71c] sm:$0xf]  ;;  %v5599_v22 = vor.u32 %v6373_v61, %v5596_v60  ;;  %v3754_v51 = vpop.f32.mrf.mxu1 }
 0x715   :  { %3948 = vmatmul.bf16.vlgmr.msra.gmra.mxu0 %v7417_v58  ;;  %v5852_v8 = vld [vmem:[#allocation2 + $0x738] sm:$0xf0]  ;;  %v3755_v15 = vadd.f32 %v3754_v51, %v3742_v45 }
 0x716   :  { %3973 = vmatpush.bf16.msra.mxu2 %v5467_v17  ;;  %3992 = vmatpush.bf16.msrb.mxu0 %v5183_v29  ;;  %v6237_v24 = vld [vmem:[#allocation2 + $0xdc] sm:$0xf]  ;;  %v5855_v52 = vor.u32 %v6437_v7, %v5852_v8 }
 0x717   :  { %3961 = vmatmul.bf16.vlgmr.msra.gmra.mxu1 %v7415_v53  ;;  %v5052_v28 = vld [vmem:[#allocation2 + $0xf8] sm:$0xf0] }
 0x718   :  { %3986 = vmatpush.bf16.msra.mxu3 %v5723_v6  ;;  %4005 = vmatpush.bf16.msrb.mxu1 %v5439_v43  ;;  %v6301_v44 = vld [vmem:[#allocation2 + $0x2dc] sm:$0xf]  ;;  %v5055_v17 = vor.u32 %v6237_v24, %v5052_v28 }
 0x719   :  { %3974 = vmatmul.bf16.vlgmr.msra.gmra.mxu2 %v7425_v50  ;;  %v5308_v0 = vld [vmem:[#allocation2 + $0x2f8] sm:$0xf0] }
 0x71a   :  { %4018 = vmatpush.bf16.msrb.mxu2 %v5695_v48  ;;  %3993 = vmatpush.bf16.msrb.mxu0 %v5151_v26  ;;  %v6365_v3 = vld [vmem:[#allocation2 + $0x4dc] sm:$0xf]  ;;  %v5311_v21 = vor.u32 %v6301_v44, %v5308_v0 }
 0x71b   :  { %3987 = vmatmul.bf16.vlgmr.msra.gmra.mxu3 %v7427_v54  ;;  %v5564_v4 = vld [vmem:[#allocation2 + $0x4f8] sm:$0xf0] }
 0x71c   :  { %4031 = vmatpush.bf16.msrb.mxu3 %v5951_v62  ;;  %4006 = vmatpush.bf16.msrb.mxu1 %v5407_v27  ;;  %v6429_v10 = vld [vmem:[#allocation2 + $0x6dc] sm:$0xf]  ;;  %v5567_v5 = vor.u32 %v6365_v3, %v5564_v4  ;;  %v3767_v48 = vpop.f32.mrf.mxu2  ;;  %v3756_v23 = vpop.f32.mrf.mxu1 }
 0x71d   :  { %v5820_v13 = vld [vmem:[#allocation2 + $0x6f8] sm:$0xf0]  ;;  %v3768_v2 = vadd.f32 %v3767_v48, %v3755_v15 }
 0x71e   :  { %4019 = vmatpush.bf16.msrb.mxu2 %v5663_v30  ;;  %3994 = vmatpush.bf16.msrb.mxu0 %v5119_v38  ;;  %v6229_v6 = vld [vmem:[#allocation2 + $0x9c] sm:$0xf]  ;;  %v5823_v49 = vor.u32 %v6429_v10, %v5820_v13  ;;  %v3780_v18 = vpop.f32.mrf.mxu3  ;;  %v3743_v30 = vpop.f32.mrf.mxu0 }
 0x71f   :  { %v5020_v29 = vld [vmem:[#allocation2 + $0xb8] sm:$0xf0]  ;;  %v3781_v27 = vadd.f32 %v3780_v18, %v3768_v2 }
 0x720   :  { %4032 = vmatpush.bf16.msrb.mxu3 %v5919_v34  ;;  %4007 = vmatpush.bf16.msrb.mxu1 %v5375_v40  ;;  %v6293_v43 = vld [vmem:[#allocation2 + $0x29c] sm:$0xf]  ;;  %v5023_v25 = vor.u32 %v6229_v6, %v5020_v29 }
 0x721   :  { %v5276_v56 = vld [vmem:[#allocation2 + $0x2b8] sm:$0xf0]  ;;  %v4046_v38 = vmax.f32 %v3781_v27, 0.0 }
 0x722   :  { %4020 = vmatpush.bf16.msrb.mxu2 %v5631_v41  ;;  %3995 = vmatpush.bf16.msrb.mxu0 %v5087_v9  ;;  %v6357_v57 = vld [vmem:[#allocation2 + $0x49c] sm:$0xf]  ;;  %v5279_v31 = vor.u32 %v6293_v43, %v5276_v56 }
 0x723   :  { %v5532_v62 = vld [vmem:[#allocation2 + $0x4b8] sm:$0xf0]  ;;  %v7469_v42 = vpack.c.bf16 %v4046_v38, %v4046_v38 }
 0x724   :  { %4033 = vmatpush.bf16.msrb.mxu3 %v5887_v55  ;;  %4008 = vmatpush.bf16.msrb.mxu1 %v5343_v16  ;;  %v6421_v19 = vld [vmem:[#allocation2 + $0x69c] sm:$0xf]  ;;  %v5535_v32 = vor.u32 %v6357_v57, %v5532_v62  ;;  %v3769_v60 = vpop.f32.mrf.mxu2 }
 0x725   :  { %v5788_v20 = vld [vmem:[#allocation2 + $0x6b8] sm:$0xf0] }
 0x726   :  { %4021 = vmatpush.bf16.msrb.mxu2 %v5599_v22  ;;  %3996 = vmatpush.bf16.msrb.mxu0 %v5055_v17  ;;  %v6221_v26 = vld [vmem:[#allocation2 + $0x5c] sm:$0xf]  ;;  %v5791_v35 = vor.u32 %v6421_v19, %v5788_v20  ;;  %v3782_v16 = vpop.f32.mrf.mxu3 }
 0x727   :  { %v4988_v33 = vld [vmem:[#allocation2 + $0x78] sm:$0xf0] }
 0x728   :  { %4034 = vmatpush.bf16.msrb.mxu3 %v5855_v52  ;;  %4009 = vmatpush.bf16.msrb.mxu1 %v5311_v21  ;;  %v6285_v34 = vld [vmem:[#allocation2 + $0x25c] sm:$0xf]  ;;  %v4991_v41 = vor.u32 %v6221_v26, %v4988_v33  ;;  %v2335_v52 = vperm.slane %v7449_v63, 3 }
 0x729   :  { %v5244_v14 = vld [vmem:[#allocation2 + $0x278] sm:$0xf0] }
 0x72a   :  { %4022 = vmatpush.bf16.msrb.mxu2 %v5567_v5  ;;  %v6349_v36 = vld [vmem:[#allocation2 + $0x45c] sm:$0xf]  ;;  %3997 = vmatpush.bf16.msrb.mxu0 %v5023_v25  ;;  %v5247_v46 = vor.u32 %v6285_v34, %v5244_v14 }
 0x72b   :  { %v5500_v37 = vld [vmem:[#allocation2 + $0x478] sm:$0xf0] }
 0x72c   :  { %4035 = vmatpush.bf16.msrb.mxu3 %v5823_v49  ;;  %v6413_v39 = vld [vmem:[#allocation2 + $0x65c] sm:$0xf]  ;;  %4010 = vmatpush.bf16.msrb.mxu1 %v5279_v31  ;;  %v5503_v47 = vor.u32 %v6349_v36, %v5500_v37  ;;  %v2337_v31 = vperm.slane %v7449_v63, 5 }
 0x72d   :  { %v5756_v40 = vld [vmem:[#allocation2 + $0x678] sm:$0xf0] }
 0x72e   :  { %4023 = vmatpush.bf16.msrb.mxu2 %v5535_v32  ;;  %v6213_v55 = vld [vmem:[#allocation2 + $0x1c] sm:$0xf]  ;;  %v5759_v7 = vor.u32 %v6413_v39, %v5756_v40  ;;  %3998 = vmatpush.bf16.msrb.mxu0 %v4991_v41 }
 0x72f   :  { %v4956_v59 = vld [vmem:[#allocation2 + $0x38] sm:$0xf0] }
 0x730   :  { %v6277_v61 = vld [vmem:[#allocation2 + $0x21c] sm:$0xf]  ;;  %4036 = vmatpush.bf16.msrb.mxu3 %v5791_v35  ;;  %v4959_v28 = vor.u32 %v6213_v55, %v4956_v59  ;;  %4011 = vmatpush.bf16.msrb.mxu1 %v5247_v46  ;;  %v2338_v55 = vperm.slane %v7449_v63, 6 }
 0x731   :  { %v5212_v8 = vld [vmem:[#allocation2 + $0x238] sm:$0xf0] }
 0x732   :  { %v6341_v9 = vld [vmem:[#allocation2 + $0x41c] sm:$0xf]  ;;  %4024 = vmatpush.bf16.msrb.mxu2 %v5503_v47  ;;  %v5215_v44 = vor.u32 %v6277_v61, %v5212_v8  ;;  %3999 = vmatpush.bf16.msrb.mxu0 %v4959_v28  ;;  %v3793_v0 = vpop.f32.mrf.mxu0 }
 0x733   :  { %v5468_v11 = vld [vmem:[#allocation2 + $0x438] sm:$0xf0]  ;;  %v3794_v3 = vadd.f32 %v3793_v0, %v2335_v52  ;;  %v2339_v52 = vperm.slane %v7449_v63, 7 }
 0x734   :  { %v6405_v22 = vld [vmem:[#allocation2 + $0x61c] sm:$0xf]  ;;  %v5471_v45 = vor.u32 %v6341_v9, %v5468_v11  ;;  %4037 = vmatpush.bf16.msrb.mxu3 %v5759_v7  ;;  %4012 = vmatpush.bf16.msrb.mxu1 %v5215_v44  ;;  %v3806_v4 = vpop.f32.mrf.mxu1 }
 0x735   :  { %v5724_v24 = vld [vmem:[#allocation2 + $0x638] sm:$0xf0]  ;;  %4000 = vmatmul.bf16.vlgmr.msrb.gmra.mxu0 %v7417_v58  ;;  %v3807_v10 = vadd.f32 %v3806_v4, %v3794_v3 }
 0x736   :  { %v5727_v51 = vor.u32 %v6405_v22, %v5724_v24  ;;  %4025 = vmatpush.bf16.msrb.mxu2 %v5471_v45 }
 0x737   :  { %4013 = vmatmul.bf16.vlgmr.msrb.gmra.mxu1 %v7415_v53 }
 0x738   :  { %4038 = vmatpush.bf16.msrb.mxu3 %v5727_v51 }
 0x739   :  { %4026 = vmatmul.bf16.vlgmr.msrb.gmra.mxu2 %v7425_v50  ;;  %v2336_v50 = vperm.slane %v7449_v63, 4 }
 0x73a   :  { %v3795_v5 = vpop.f32.mrf.mxu0 }
 0x73b   :  { %4039 = vmatmul.bf16.vlgmr.msrb.gmra.mxu3 %v7427_v54 }
 0x73c   :  { %v3819_v13 = vpop.f32.mrf.mxu2  ;;  %v3808_v6 = vpop.f32.mrf.mxu1 }
 0x73d   :  { %v3820_v15 = vadd.f32 %v3819_v13, %v3807_v10 }
 0x73e   :  { %v3832_v17 = vpop.f32.mrf.mxu3 }
 0x73f   :  { %v3833_v21 = vadd.f32 %v3832_v17, %v3820_v15 }
 0x741   :  { %v4047_v29 = vmax.f32 %v3833_v21, 0.0 }
 0x743   :  { %v7476_v58 = vpack.c.bf16 %v4047_v29, %v4047_v29 }
 0x744   :  { %v3821_v53 = vpop.f32.mrf.mxu2 }
 0x746   :  { %v3834_v43 = vpop.f32.mrf.mxu3 }
 0x752   :  { %v3845_v54 = vpop.f32.mrf.mxu0 }
 0x753   :  { %v3846_v48 = vadd.f32 %v3845_v54, %v2336_v50 }
 0x754   :  { %v3858_v49 = vpop.f32.mrf.mxu1 }
 0x755   :  { %v3859_v56 = vadd.f32 %v3858_v49, %v3846_v48 }
 0x75a   :  { %v3847_v19 = vpop.f32.mrf.mxu0 }
 0x75c   :  { %v3871_v57 = vpop.f32.mrf.mxu2  ;;  %v3860_v20 = vpop.f32.mrf.mxu1 }
 0x75d   :  { %v3872_v62 = vadd.f32 %v3871_v57, %v3859_v56 }
 0x75e   :  { %v3884_v2 = vpop.f32.mrf.mxu3 }
 0x75f   :  { %v3885_v18 = vadd.f32 %v3884_v2, %v3872_v62 }
 0x761   :  { %v4048_v25 = vmax.f32 %v3885_v18, 0.0 }
 0x763   :  { %v7479_v26 = vpack.c.bf16 %v4048_v25, %v4048_v25 }
 0x764   :  { %v3873_v27 = vpop.f32.mrf.mxu2 }
 0x766   :  { %v3886_v30 = vpop.f32.mrf.mxu3 }
 0x772   :  { %v3897_v32 = vpop.f32.mrf.mxu0 }
 0x773   :  { %v3898_v33 = vadd.f32 %v3897_v32, %v2337_v31 }
 0x774   :  { %v3910_v34 = vpop.f32.mrf.mxu1 }
 0x775   :  { %v3911_v14 = vadd.f32 %v3910_v34, %v3898_v33 }
 0x77a   :  { %v3899_v38 = vpop.f32.mrf.mxu0 }
 0x77c   :  { %v3923_v23 = vpop.f32.mrf.mxu2  ;;  %v3912_v39 = vpop.f32.mrf.mxu1 }
 0x77d   :  { %v3924_v35 = vadd.f32 %v3923_v23, %v3911_v14 }
 0x77e   :  { %v3936_v36 = vpop.f32.mrf.mxu3 }
 0x77f   :  { %v3937_v37 = vadd.f32 %v3936_v36, %v3924_v35 }
 0x781   :  { %v4049_v40 = vmax.f32 %v3937_v37, 0.0 }
 0x783   :  { %v7482_v41 = vpack.c.bf16 %v4049_v40, %v4049_v40 }
 0x784   :  { %v3925_v46 = vpop.f32.mrf.mxu2 }
 0x786   :  { %v3938_v47 = vpop.f32.mrf.mxu3 }
 0x792   :  { %v3949_v59 = vpop.f32.mrf.mxu0 }
 0x793   :  { %v3950_v61 = vadd.f32 %v3949_v59, %v2338_v55 }
 0x794   :  { %v3962_v60 = vpop.f32.mrf.mxu1 }
 0x795   :  { %v3963_v7 = vadd.f32 %v3962_v60, %v3950_v61 }
 0x79a   :  { %v3951_v22 = vpop.f32.mrf.mxu0 }
 0x79c   :  { %v3975_v8 = vpop.f32.mrf.mxu2  ;;  %v3964_v24 = vpop.f32.mrf.mxu1 }
 0x79d   :  { %v3976_v9 = vadd.f32 %v3975_v8, %v3963_v7 }
 0x79e   :  { %v3988_v11 = vpop.f32.mrf.mxu3 }
 0x79f   :  { %v3989_v16 = vadd.f32 %v3988_v11, %v3976_v9 }
 0x7a1   :  { %v4050_v28 = vmax.f32 %v3989_v16, 0.0 }
 0x7a3   :  { %v7485_v44 = vpack.c.bf16 %v4050_v28, %v4050_v28 }
 0x7a4   :  { %v3977_v45 = vpop.f32.mrf.mxu2 }
 0x7a6   :  { %v3990_v51 = vpop.f32.mrf.mxu3 }
 0x7b2   :  { %v4001_v0 = vpop.f32.mrf.mxu0 }
 0x7b3   :  { %v4002_v3 = vadd.f32 %v4001_v0, %v2339_v52 }
 0x7b4   :  { %v4014_v4 = vpop.f32.mrf.mxu1 }
 0x7b5   :  { %v4015_v10 = vadd.f32 %v4014_v4, %v4002_v3 }
 0x7ba   :  { %v4003_v21 = vpop.f32.mrf.mxu0 }
 0x7bc   :  { %v4027_v13 = vpop.f32.mrf.mxu2  ;;  %v4016_v5 = vpop.f32.mrf.mxu1 }
 0x7bd   :  { %v4028_v15 = vadd.f32 %v4027_v13, %v4015_v10 }
 0x7be   :  { %v4040_v17 = vpop.f32.mrf.mxu3 }
 0x7bf   :  { %v4041_v6 = vadd.f32 %v4040_v17, %v4028_v15 }
 0x7c1   :  { %v4051_v29 = vmax.f32 %v4041_v6, 0.0 }
 0x7c3   :  { %v7488_v53 = vpack.c.bf16 %v4051_v29, %v4051_v29 }
 0x7c4   :  { %v4029_v43 = vpop.f32.mrf.mxu2 }
 0x7c6   :  { %v4042_v50 = vpop.f32.mrf.mxu3 }
 0x7c7   :  { %6608 = dma.done.wait [#allocation4 + $0x1], 8192 }
 0x7c8   :  { %6609 = vsyncadd [#allocation4 + $0x1], 4294959104  ;;  %v6473_v54 = vld [vmem:[#allocation3 + $0x48] sm:$0xff]  ;;  %v6481_v48 = vld [vmem:[#allocation3 + $0x60] sm:$0xff]  ;;  %vm4881_vm0 = vcmask 1024  }
 0x7c9   :  { %v6489_v63 = vld [vmem:[#allocation3 + $0x28] sm:$0xff]  ;;  %4580 = vmatpush.bf16.msra.mxu0 %v6473_v54  ;;  %4593 = vmatpush.bf16.msra.mxu1 %v6481_v48  ;;  %v6472_v56 = vld [vmem:[#allocation3 + $0x130] sm:$0xff]  ;;  %v6488_v62 = vld [vmem:[#allocation3 + $0x1b8] sm:$0xff] }
 0x7ca   :  { %v6497_v49 = vld [vmem:[#allocation3 + $0x8] sm:$0xff]  ;;  %4606 = vmatpush.bf16.msra.mxu2 %v6489_v63  ;;  %v6496_v2 = vld [vmem:[#allocation3 + $0xf0] sm:$0xff]  ;;  %v6495_v25 = vld [vmem:[#allocation3] sm:$0xff] }
 0x7cb   :  { %v6480_v57 = vld [vmem:[#allocation3 + $0x108] sm:$0xff]  ;;  %4619 = vmatpush.bf16.msra.mxu3 %v6497_v49  ;;  %v6479_v19 = vld [vmem:[#allocation3 + $0x150] sm:$0xff]  ;;  %v6478_v30 = vld [vmem:[#allocation3 + $0x120] sm:$0xff] }
 0x7cc   :  { %v6471_v18 = vld [vmem:[#allocation3 + $0x168] sm:$0xff]  ;;  %v6470_v27 = vld [vmem:[#allocation3 + $0x50] sm:$0xff]  ;;  %v6486_v31 = vld [vmem:[#allocation3 + $0x80] sm:$0xff] }
 0x7cd   :  { %4581 = vmatpush.bf16.msra.mxu0 %v6472_v56  ;;  %4594 = vmatpush.bf16.msra.mxu1 %v6480_v57  ;;  %v6487_v20 = vld [vmem:[#allocation3 + $0x1a8] sm:$0xff]  ;;  %v6494_v32 = vld [vmem:[#allocation3 + $0x1e0] sm:$0xff]  ;;  %v6469_v33 = vld [vmem:[#allocation3 + $0x18] sm:$0xff] }
 0x7ce   :  { %4607 = vmatpush.bf16.msra.mxu2 %v6488_v62  ;;  %v6477_v34 = vld [vmem:[#allocation3 + $0x98] sm:$0xff]  ;;  %v6485_v14 = vld [vmem:[#allocation3 + $0x140] sm:$0xff]  ;;  %v6493_v23 = vld [vmem:[#allocation3 + $0x30] sm:$0xff] }
 0x7cf   :  { %4620 = vmatpush.bf16.msra.mxu3 %v6496_v2  ;;  %v6468_v35 = vld [vmem:[#allocation3 + $0xd8] sm:$0xff]  ;;  %v6492_v38 = vld [vmem:[#allocation3 + $0x160] sm:$0xff]  ;;  %v6467_v39 = vld [vmem:[#allocation3 + $0x1b0] sm:$0xff] }
 0x7d0   :  { %v6476_v36 = vld [vmem:[#allocation3 + $0x118] sm:$0xff]  ;;  %v6475_v40 = vld [vmem:[#allocation3 + $0x110] sm:$0xff]  ;;  %v6483_v46 = vld [vmem:[#allocation3 + $0x188] sm:$0xff] }
 0x7d1   :  { %4582 = vmatpush.bf16.msra.mxu0 %v6471_v18  ;;  %4595 = vmatpush.bf16.msra.mxu1 %v6479_v19  ;;  %v6484_v37 = vld [vmem:[#allocation3 + $0x138] sm:$0xff]  ;;  %v6466_v55 = vld [vmem:[#allocation3 + $0xb0] sm:$0xff]  ;;  %v6474_v59 = vld [vmem:[#allocation3 + $0x180] sm:$0xff] }
 0x7d2   :  { %4608 = vmatpush.bf16.msra.mxu2 %v6487_v20  ;;  %v6491_v47 = vld [vmem:[#allocation3 + $0xf8] sm:$0xff]  ;;  %v6482_v61 = vld [vmem:[#allocation3 + $0xe0] sm:$0xff]  ;;  %v6490_v60 = vld [vmem:[#allocation3 + $0x1e8] sm:$0xff] }
 0x7d3   :  { %4621 = vmatpush.bf16.msra.mxu3 %v6495_v25  ;;  %v6505_v7 = vld [vmem:[#allocation3 + $0x128] sm:$0xff]  ;;  %v6513_v8 = vld [vmem:[#allocation3 + $0xd0] sm:$0xff]  ;;  %v6529_v11 = vld [vmem:[#allocation3 + $0xa0] sm:$0xff] }
 0x7d4   :  { %v6521_v9 = vld [vmem:[#allocation3 + $0x190] sm:$0xff]  ;;  %v6504_v16 = vld [vmem:[#allocation3 + $0x20] sm:$0xff]  ;;  %v6512_v22 = vld [vmem:[#allocation3 + $0x1d8] sm:$0xff] }
 0x7d5   :  { %4583 = vmatpush.bf16.msra.mxu0 %v6470_v27  ;;  %4596 = vmatpush.bf16.msra.mxu1 %v6478_v30  ;;  %v6520_v24 = vld [vmem:[#allocation3 + $0x68] sm:$0xff]  ;;  %v6528_v28 = vld [vmem:[#allocation3 + $0x58] sm:$0xff]  ;;  %v6511_v51 = vld [vmem:[#allocation3 + $0x90] sm:$0xff] }
 0x7d6   :  { %4609 = vmatpush.bf16.msra.mxu2 %v6486_v31  ;;  %v6503_v45 = vld [vmem:[#allocation3 + $0x1f8] sm:$0xff]  ;;  %v6527_v0 = vld [vmem:[#allocation3 + $0x10] sm:$0xff]  ;;  %v6502_v3 = vld [vmem:[#allocation3 + $0x40] sm:$0xff] }
 0x7d7   :  { %4622 = vmatpush.bf16.msra.mxu3 %v6494_v32  ;;  %v6519_v52 = vld [vmem:[#allocation3 + $0x178] sm:$0xff]  ;;  %v6510_v4 = vld [vmem:[#allocation3 + $0x70] sm:$0xff]  ;;  %v6517_v10 = vld [vmem:[#allocation3 + $0x1c8] sm:$0xff] }
 0x7d8   :  { %v6525_v13 = vld [vmem:[#allocation3 + $0x1c0] sm:$0xff]  ;;  %v6508_v17 = vld [vmem:[#allocation3 + $0xe8] sm:$0xff]  ;;  %v6499_v6 = vld [vmem:[#allocation3 + $0x1d0] sm:$0xff] }
 0x7d9   :  { %4584 = vmatpush.bf16.msra.mxu0 %v6469_v33  ;;  %4597 = vmatpush.bf16.msra.mxu1 %v6477_v34  ;;  %v6500_v15 = vld [vmem:[#allocation3 + $0x100] sm:$0xff]  ;;  %v6516_v21 = vld [vmem:[#allocation3 + $0xa8] sm:$0xff]  ;;  %v6507_v29 = vld [vmem:[#allocation3 + $0x1f0] sm:$0xff] }
 0x7da   :  { %4610 = vmatpush.bf16.msra.mxu2 %v6485_v14  ;;  %v6524_v5 = vld [vmem:[#allocation3 + $0xc0] sm:$0xff]  ;;  %v6515_v43 = vld [vmem:[#allocation3 + $0x88] sm:$0xff]  ;;  %v6523_v50 = vld [vmem:[#allocation3 + $0x38] sm:$0xff] }
 0x7db   :  { %4623 = vmatpush.bf16.msra.mxu3 %v6493_v23  ;;  %v6498_v54 = vld [vmem:[#allocation3 + $0x148] sm:$0xff]  ;;  %v6506_v48 = vld [vmem:[#allocation3 + $0x1a0] sm:$0xff]  ;;  %v6514_v63 = vld [vmem:[#allocation3 + $0xb8] sm:$0xff] }
 0x7dc   :  { %v6522_v49 = vld [vmem:[#allocation3 + $0x198] sm:$0xff]  ;;  %v4687_v62 = vld [vmem:[%s7527_s12 + $0x10] sm:$0xff]  ;;  %v4685_v25 = vld [vmem:[%s7527_s12] sm:$0xff] }
 0x7dd   :  { %4585 = vmatpush.bf16.msra.mxu0 %v6468_v35  ;;  %4598 = vmatpush.bf16.msra.mxu1 %v6476_v36  ;;  %v4688_v56 = vld [vmem:[%s7527_s12 + $0x18] sm:$0xff]  ;;  %v4710_v18 = vand.u32 4294901760, %v4687_v62  ;;  %v4714_v32 = vand.u32 4294901760, %v4685_v25 }
 0x7de   :  { %4611 = vmatpush.bf16.msra.mxu2 %v6484_v37  ;;  %v4708_v57 = vand.u32 4294901760, %v4688_v56 }
 0x7df   :  { %4624 = vmatpush.bf16.msra.mxu3 %v6492_v38  ;;  %v4744_v19 = vsub.f32 %v4687_v62, %v4710_v18  ;;  %v4756_v35 = vsub.f32 %v4685_v25, %v4714_v32 }
 0x7e0   :  { %v4738_v2 = vsub.f32 %v4688_v56, %v4708_v57 }
 0x7e1   :  { %4586 = vmatpush.bf16.msra.mxu0 %v6467_v39  ;;  %4599 = vmatpush.bf16.msra.mxu1 %v6475_v40  ;;  %v4745_v30 = vand.u32 4294901760, %v4744_v19  ;;  %v4757_v40 = vand.u32 4294901760, %v4756_v35 }
 0x7e2   :  { %4612 = vmatpush.bf16.msra.mxu2 %v6483_v46 }
 0x7e3   :  { %4625 = vmatpush.bf16.msra.mxu3 %v6491_v47  ;;  %v4746_v34 = vsub.f32 %v4744_v19, %v4745_v30 }
 0x7e5   :  { %4587 = vmatpush.bf16.msra.mxu0 %v6466_v55  ;;  %4600 = vmatpush.bf16.msra.mxu1 %v6474_v59  ;;  %v4747_v37 = vand.u32 4294901760, %v4746_v34  ;;  %v4758_v55 = vsub.f32 %v4756_v35, %v4757_v40 }
 0x7e6   :  { %4613 = vmatpush.bf16.msra.mxu2 %v6482_v61  ;;  %v6580_v61 = vld [vmem:[%s7526_s11] ss:$0 sm:$0xff] }
 0x7e7   :  { %4626 = vmatpush.bf16.msra.mxu3 %v6490_v60  ;;  %v4759_v59 = vand.u32 4294901760, %v4758_v55 }
 0x7e8   :  { %4588 = vmatmul.bf16.vlgmr.msra.gmra.mxu0 %v7455_v12  ;;  %4601 = vmatmul.bf16.vlgmr.msra.gmra.mxu1 %v7462_v1  ;;  %v6526_v12 = vld [vmem:[#allocation3 + $0x158] sm:$0xff] }
 0x7e9   :  { %4632 = vmatpush.bf16.msrb.mxu0 %v6505_v7  ;;  %4645 = vmatpush.bf16.msrb.mxu1 %v6513_v8  ;;  %v6509_v1 = vld [vmem:[#allocation3 + $0x78] sm:$0xff] }
 0x7ea   :  { %4658 = vmatpush.bf16.msrb.mxu2 %v6521_v9  ;;  %4627 = vmatmul.bf16.vlgmr.msra.gmra.mxu3 %v7476_v58  ;;  %v6501_v58 = vld [vmem:[#allocation3 + $0xc8] sm:$0xff] }
 0x7eb   :  { %4671 = vmatpush.bf16.msrb.mxu3 %v6529_v11  ;;  %4614 = vmatmul.bf16.vlgmr.msra.gmra.mxu2 %v7469_v42  ;;  %v6518_v42 = vld [vmem:[#allocation3 + $0x170] sm:$0xff] }
 0x7ed   :  { %4633 = vmatpush.bf16.msrb.mxu0 %v6504_v16  ;;  %4646 = vmatpush.bf16.msrb.mxu1 %v6512_v22 }
 0x7ee   :  { %4659 = vmatpush.bf16.msrb.mxu2 %v6520_v24 }
 0x7ef   :  { %4672 = vmatpush.bf16.msrb.mxu3 %v6528_v28 }
 0x7f1   :  { %4634 = vmatpush.bf16.msrb.mxu0 %v6503_v45  ;;  %4647 = vmatpush.bf16.msrb.mxu1 %v6511_v51 }
 0x7f2   :  { %4660 = vmatpush.bf16.msrb.mxu2 %v6519_v52 }
 0x7f3   :  { %4673 = vmatpush.bf16.msrb.mxu3 %v6527_v0 }
 0x7f5   :  { %4635 = vmatpush.bf16.msrb.mxu0 %v6502_v3  ;;  %4648 = vmatpush.bf16.msrb.mxu1 %v6510_v4 }
 0x7f6   :  { %4661 = vmatpush.bf16.msrb.mxu2 %v6518_v42 }
 0x7f7   :  { %4674 = vmatpush.bf16.msrb.mxu3 %v6526_v12 }
 0x7f9   :  { %4636 = vmatpush.bf16.msrb.mxu0 %v6501_v58  ;;  %4649 = vmatpush.bf16.msrb.mxu1 %v6509_v1 }
 0x7fa   :  { %4662 = vmatpush.bf16.msrb.mxu2 %v6517_v10 }
 0x7fb   :  { %4675 = vmatpush.bf16.msrb.mxu3 %v6525_v13 }
 0x7fd   :  { %4637 = vmatpush.bf16.msrb.mxu0 %v6500_v15  ;;  %4650 = vmatpush.bf16.msrb.mxu1 %v6508_v17 }
 0x7fe   :  { %4663 = vmatpush.bf16.msrb.mxu2 %v6516_v21 }
 0x7ff   :  { %4676 = vmatpush.bf16.msrb.mxu3 %v6524_v5 }
 0x801   :  { %4638 = vmatpush.bf16.msrb.mxu0 %v6499_v6  ;;  %4651 = vmatpush.bf16.msrb.mxu1 %v6507_v29  ;;  %v6581_v6 = vld [vmem:[#allocation5] ss:$0 sm:$0xff] }
 0x802   :  { %4664 = vmatpush.bf16.msrb.mxu2 %v6515_v43 }
 0x803   :  { %4677 = vmatpush.bf16.msrb.mxu3 %v6523_v50 }
 0x805   :  { %4639 = vmatpush.bf16.msrb.mxu0 %v6498_v54  ;;  %4652 = vmatpush.bf16.msrb.mxu1 %v6506_v48 }
 0x806   :  { %4665 = vmatpush.bf16.msrb.mxu2 %v6514_v63 }
 0x807   :  { %4678 = vmatpush.bf16.msrb.mxu3 %v6522_v49 }
 0x808   :  { %4640 = vmatmul.bf16.vlgmr.msrb.gmra.mxu0 %v7479_v26  ;;  %4653 = vmatmul.bf16.vlgmr.msrb.gmra.mxu1 %v7482_v41  ;;  %v4686_v41 = vld [vmem:[%s7527_s12 + $0x8] sm:$0xff] }
 0x809   :  { %4666 = vmatmul.bf16.vlgmr.msrb.gmra.mxu2 %v7485_v44  ;;  %4709 = vmatpush.msra.mxu0 %v4708_v57  ;;  %v4712_v20 = vand.u32 4294901760, %v4686_v41 }
 0x80a   :  { %4679 = vmatmul.bf16.vlgmr.msrb.gmra.mxu3 %v7488_v53  ;;  %4780 = vmatpush.msra.mxu2 %v4738_v2  ;;  %v4739_v53 = vand.u32 4294901760, %v4738_v2 }
 0x80b   :  { %4809 = vmatpush.msra.mxu3 %v4708_v57  ;;  %4711 = vmatpush.msra.mxu0 %v4710_v18  ;;  %v4750_v31 = vsub.f32 %v4686_v41, %v4712_v20 }
 0x80c   :  { %v4740_v27 = vsub.f32 %v4738_v2, %v4739_v53  ;;  %4783 = vmatpush.msra.mxu2 %v4744_v19 }
 0x80d   :  { %4811 = vmatpush.msra.mxu3 %v4710_v18  ;;  %4713 = vmatpush.msra.mxu0 %v4712_v20  ;;  %v4751_v14 = vand.u32 4294901760, %v4750_v31 }
 0x80e   :  { %v4741_v33 = vand.u32 4294901760, %v4740_v27  ;;  %4786 = vmatpush.msra.mxu2 %v4750_v31 }
 0x80f   :  { %4813 = vmatpush.msra.mxu3 %v4712_v20  ;;  %4715 = vmatpush.msra.mxu0 %v4714_v32  ;;  %v4752_v38 = vsub.f32 %v4750_v31, %v4751_v14 }
 0x810   :  { %4742 = vmatpush.msra.mxu1 %v4741_v33  ;;  %4789 = vmatpush.msra.mxu2 %v4756_v35 }
 0x811   :  { %4815 = vmatpush.msra.mxu3 %v4714_v32  ;;  %4838 = vmatpush.msrb.mxu0 %v4739_v53  ;;  %v4753_v47 = vand.u32 4294901760, %v4752_v38 }
 0x812   :  { %4748 = vmatpush.msra.mxu1 %v4747_v37 }
 0x813   :  { %4842 = vmatpush.msrb.mxu0 %v4745_v30 }
 0x814   :  { %4754 = vmatpush.msra.mxu1 %v4753_v47 }
 0x815   :  { %4846 = vmatpush.msrb.mxu0 %v4751_v14 }
 0x816   :  { %4760 = vmatpush.msra.mxu1 %v4759_v59 }
 0x817   :  { %4850 = vmatpush.msrb.mxu0 %v4757_v40 }
 0x818   :  { %4869 = vmatpush.msrb.mxu1 %v4708_v57 }
 0x81a   :  { %4871 = vmatpush.msrb.mxu1 %v4710_v18 }
 0x81c   :  { %4873 = vmatpush.msrb.mxu1 %v4712_v20 }
 0x81e   :  { %4875 = vmatpush.msrb.mxu1 %v4714_v32 }
 0x865   :  { %v4589_v26 = vpop.f32.mrf.mxu0  ;;  %v4602_v44 = vpop.f32.mrf.mxu1 }
 0x866   :  { %v4590_v8 = vadd.f32 %v6580_v61, %v4589_v26 }
 0x868   :  { %v4603_v9 = vadd.f32 %v4602_v44, %v4590_v8 }
 0x86d   :  { %v4628_v36 = vpop.f32.mrf.mxu3  ;;  %v4591_v39 = vpop.f32.mrf.mxu0 }
 0x86e   :  { %v4615_v23 = vpop.f32.mrf.mxu2  ;;  %v4604_v46 = vpop.f32.mrf.mxu1 }
 0x86f   :  { %v4616_v11 = vadd.f32 %v4615_v23, %v4603_v9 }
 0x871   :  { %v4629_v16 = vadd.f32 %v4628_v36, %v4616_v11 }
 0x875   :  { %v4630_v7 = vpop.f32.mrf.mxu3 }
 0x876   :  { %v4617_v60 = vpop.f32.mrf.mxu2 }
 0x885   :  { %v4641_v22 = vpop.f32.mrf.mxu0  ;;  %v4654_v24 = vpop.f32.mrf.mxu1 }
 0x886   :  { %v4642_v28 = vadd.f32 %v4641_v22, %v4629_v16 }
 0x888   :  { %v4655_v45 = vadd.f32 %v4654_v24, %v4642_v28 }
 0x88c   :  { %v4667_v51 = vpop.f32.mrf.mxu2 }
 0x88d   :  { %v4680_v52 = vpop.f32.mrf.mxu3  ;;  %v4668_v0 = vadd.f32 %v4667_v51, %v4655_v45  ;;  %v4643_v3 = vpop.f32.mrf.mxu0 }
 0x88e   :  { %v4656_v4 = vpop.f32.mrf.mxu1 }
 0x88f   :  { %v4681_v42 = vadd.f32 %v4680_v52, %v4668_v0 }
 0x891   :  { %v4684_v12 = vmax.f32 %v4681_v42, 0.0 }
 0x893   :  { %v4694_v58 = vsel %vm938_vm10, %v4684_v12, 0 }
 0x894   :  { %v4716_v1 = vand.u32 4294901760, %v4694_v58  ;;  %v4669_v10 = vpop.f32.mrf.mxu2 }
 0x895   :  { %v4682_v13 = vpop.f32.mrf.mxu3 }
 0x896   :  { %v4717_v15 = vsub.f32 %v4694_v58, %v4716_v1  ;;  %4762 = vmatmul.f32.vlgmr.msra.gmra.mxu1 %v4716_v1 }
 0x898   :  { %v4718_v17 = vand.u32 4294901760, %v4717_v15  ;;  %4792 = vmatmul.f32.vlgmr.msra.gmra.mxu2 %v4717_v15 }
 0x89a   :  { %v4719_v21 = vsub.f32 %v4717_v15, %v4718_v17  ;;  %4819 = vmatmul.f32.vlgmr.msra.gmra.mxu3 %v4718_v17 }
 0x89c   :  { %v4720_v5 = vand.u32 4294901760, %v4719_v21 }
 0x89e   :  { %4721 = vmatmul.f32.vlgmr.msra.gmra.mxu0 %v4720_v5  ;;  %4877 = vmatmul.f32.vlgmr.msrb.gmra.mxu1 %v4716_v1 }
 0x8a6   :  { %4852 = vmatmul.f32.vlgmr.msrb.gmra.mxu0 %v4716_v1 }
 0x913   :  { %v4763_v29 = vpop.f32.mrf.mxu1 }
 0x91b   :  { %v4722_v43 = vpop.f32.mrf.mxu0  ;;  %v4793_v48 = vpop.f32.mrf.mxu2 }
 0x91c   :  { %v4723_v50 = vadd.f32 %v6581_v6, %v4722_v43  ;;  %v4878_v2 = vpop.f32.mrf.mxu1 }
 0x91d   :  { %v4820_v49 = vpop.f32.mrf.mxu3 }
 0x91e   :  { %v4764_v54 = vadd.f32 %v4763_v29, %v4723_v50 }
 0x920   :  { %v4794_v63 = vadd.f32 %v4793_v48, %v4764_v54 }
 0x922   :  { %v4821_v56 = vadd.f32 %v4820_v49, %v4794_v63 }
 0x923   :  { %v4853_v57 = vpop.f32.mrf.mxu0 }
 0x924   :  { %v4854_v62 = vadd.f32 %v4853_v57, %v4821_v56 }
 0x926   :  { %v4879_v18 = vadd.f32 %v4878_v2, %v4854_v62 }
 0x928   :  { %4882 = vst.msk [vmem:[%s7529_s14] sm:$0x3] %vm4881_vm0, %v4879_v18 }
 0x929   :  { %4887 = vsyncmov [#allocation4] }
 0x92c   :  { %s4888_s27 = vpop.sfrf %4887 }
 0x92d   :  { %p6208_p0 = scmp.ne.s32.totalorder %s4888_s27, 0 }
 0x92f   :  { %4892 = shalt.err (%p6208_p0)  }
 0x930   :  { %4894 = vsyncmov [#allocation4 + $0x1] }
 0x933   :  { %s4895_s29 = vpop.sfrf %4894 }
 0x934   :  { %p6209_p1 = scmp.ne.s32.totalorder %s4895_s29, 0 }
 0x936   :  { %4899 = shalt.err (%p6209_p1)  }

</bundles_post_ra>
